<compile_context>
chip_gen: v6e
topology: v6e:2x2x1
jax: 0.10.0
libtpu: 0.0.40
codegen_flags: <defaults>
</compile_context>

<pallas_src>
import math
from functools import partial

import numpy as np
import jax
import jax.numpy as jnp
from jax import lax
from jax.experimental import pallas as pl
from jax.experimental.pallas import tpu as pltpu

_SQRT1_2 = 0.7071067811865476
_EPS = 1e-6


# ---------------------------------------------------------------------------
# In-kernel helpers
# ---------------------------------------------------------------------------

def _erf(x):
    # Abramowitz & Stegun 7.1.26 (|err| < 1.5e-7); exp goes to the EUP.
    a1, a2, a3, a4, a5 = (0.254829592, -0.284496736, 1.421413741,
                          -1.453152027, 1.061405429)
    p = 0.3275911
    s = jnp.where(x >= 0.0, 1.0, -1.0)
    ax = jnp.abs(x)
    t = 1.0 / (1.0 + p * ax)
    poly = ((((a5 * t + a4) * t + a3) * t + a2) * t + a1) * t
    return s * (1.0 - poly * jnp.exp(-ax * ax))


def _gelu(x):
    # PyTorch nn.GELU(approximate='none'): 0.5 * x * (1 + erf(x / sqrt(2)))
    return 0.5 * x * (1.0 + _erf(x * _SQRT1_2))


def _masked_instance_norm(h, msk, inv_n, gamma, beta, eps=_EPS):
    # nn.InstanceNorm2d(eps=1e-6, affine=True): per-(batch, channel) stats over the valid
    # spatial rows.  Single pass: sum and sum-of-squares together; padded rows masked out.
    hm = h * msk
    s1 = jnp.sum(hm, axis=0, keepdims=True)
    s2 = jnp.sum(hm * hm, axis=0, keepdims=True)
    mean = s1 * inv_n
    var = jnp.maximum(s2 * inv_n - mean * mean, 0.0)
    return ((h - mean) * lax.rsqrt(var + eps) * gamma + beta) * msk


# ---------------------------------------------------------------------------
# Fused SFNO kernel: grid step l == one FourierNeuralOperatorBlock (+ encoder at
# step 0 and decoder + big skip at the last step).
# ---------------------------------------------------------------------------

def _sfno_kernel(meta_ref,                                    # SMEM (total, 3) int32
                 x_ref, xres_ref,                             # (HWmax, B*Cin), (B*Cout, HWmax)
                 ew1_ref, eb1_ref, ew2_ref,                   # encoder
                 rrep_ref, dmask_ref,                         # dhconv expansion helpers
                 T_ref, G_ref, Wcr_ref, Wci_ref,              # per-layer bases / filter weights
                 n0g_ref, n0b_ref,
                 mw1_ref, mb1_ref, mw2_ref, mb2_ref,
                 n1g_ref, n1b_ref, wsk_ref,
                 dw1_ref, db1_ref, dw2_ref, wres_ref,         # decoder + big skip
                 o_ref,                                       # (B*Cout, HWmax)
                 h_ref,                                       # VMEM scratch (HWmax, BE)
                 *, L, Mp, BE, HWmax):
    l = pl.program_id(0)
    nl = pl.num_programs(0)
    LMp = L * Mp

    rows = lax.broadcasted_iota(jnp.int32, (HWmax, 1), 0)

    # ---- encoder (first grid step only): Conv1x1 + GELU + Conv1x1 (2nd conv no bias) ----
    @pl.when(l == 0)
    def _():
        t = _gelu(jnp.dot(x_ref[...], ew1_ref[...],
                          preferred_element_type=jnp.float32) + eb1_ref[...])
        h0 = jnp.dot(t, ew2_ref[...], preferred_element_type=jnp.float32)
        msk_in = (rows < meta_ref[0, 2]).astype(jnp.float32)
        h_ref[...] = h0 * msk_in

    x_in = h_ref[...]                                               # (HWmax, BE)

    # ---- RealSHT analysis: stacked [real; imag] coefficients in one MXU matmul ----
    cs = jnp.dot(T_ref[0], x_in, preferred_element_type=jnp.float32)   # (2*LMp, BE)

    # ---- dhconv (einsum 'bilm,iol->bolm', complex), block-diagonal over l:
    #      replicate cs across the l' lane blocks (0/1 matmul), mask to delta(l, l'),
    #      then one matmul each against the stacked per-l real / imag kron(I_B, W_l) weights.
    cs_exp = jnp.dot(cs, rrep_ref[...],
                     preferred_element_type=jnp.float32) * dmask_ref[...]   # (2*LMp, L*BE)
    p_r = jnp.dot(cs_exp, Wcr_ref[0], preferred_element_type=jnp.float32)   # (2*LMp, BE)
    p_i = jnp.dot(cs_exp, Wci_ref[0], preferred_element_type=jnp.float32)   # (2*LMp, BE)
    fr = p_r[:LMp, :] - p_i[LMp:, :]          # Re:  cr@Wr - ci@Wi
    fi = p_i[:LMp, :] + p_r[LMp:, :]          # Im:  cr@Wi + ci@Wr
    fs = jnp.concatenate([fr, fi], axis=0)    # (2*LMp, BE), built in registers (no scratch stores)

    # ---- InverseRealSHT synthesis of the filtered field and of the regridded residual ----
    h = jnp.dot(G_ref[0], fs, preferred_element_type=jnp.float32)       # (HWmax, BE)
    regrid = jnp.dot(G_ref[0], cs, preferred_element_type=jnp.float32)  # (HWmax, BE)

    f = (meta_ref[l, 1] > 0).astype(jnp.float32)      # scale_residual flag for this layer
    residual = regrid * f + x_in * (1.0 - f)

    hw_out = meta_ref[l, 0]
    msk = (rows < hw_out).astype(jnp.float32)
    inv_n = 1.0 / hw_out.astype(jnp.float32)

    # ---- norm0 -> GELU -> MLP -> norm1 -> outer skip (inner_skip='none', dropouts 0) ----
    h = _gelu(_masked_instance_norm(h, msk, inv_n, n0g_ref[0], n0b_ref[0]))
    h = _gelu(jnp.dot(h, mw1_ref[0], preferred_element_type=jnp.float32) + mb1_ref[0])
    h = jnp.dot(h, mw2_ref[0], preferred_element_type=jnp.float32) + mb2_ref[0]
    h = _masked_instance_norm(h, msk, inv_n, n1g_ref[0], n1b_ref[0])
    h = (h + jnp.dot(residual, wsk_ref[0], preferred_element_type=jnp.float32)) * msk
    h_ref[...] = h

    # ---- decoder + big skip (last grid step only), computed channels-on-rows so the
    #      output store is lane-dense (B*Cout, H*W) and already NCHW after a host reshape.
    @pl.when(l == nl - 1)
    def _():
        t = lax.dot_general(dw1_ref[...], h, (((1,), (1,)), ((), ())),
                            preferred_element_type=jnp.float32) + db1_ref[...]
        t = _gelu(t)                                                    # (B*dec_h, HWmax)
        y = jnp.dot(dw2_ref[...], t, preferred_element_type=jnp.float32)
        o_ref[...] = y + jnp.dot(wres_ref[...], xres_ref[...],
                                 preferred_element_type=jnp.float32)


# ---------------------------------------------------------------------------
# pallas_call wrapper
# ---------------------------------------------------------------------------

def _sfno_call(x_cl, x_res, prep, cfg):
    B, E = cfg["batch"], cfg["embed_dim"]
    Cout = cfg["out_chans"]
    L, Mp = cfg["modes_lat"], cfg["m_pad"]
    HWmax = cfg["hw_max"]
    BE = B * E
    total = prep["meta"].shape[0]

    def const(a):
        nd = a.ndim
        return pl.BlockSpec(tuple(a.shape), lambda i, s, _n=nd: (0,) * _n)

    def per_layer(a):
        nd = a.ndim
        return pl.BlockSpec((1,) + tuple(a.shape[1:]),
                            lambda i, s, _n=nd: (i,) + (0,) * (_n - 1))

    kernel = partial(_sfno_kernel, L=L, Mp=Mp, BE=BE, HWmax=HWmax)

    in_specs = [
        const(x_cl), const(x_res),
        const(prep["enc_w1"]), const(prep["enc_b1"]), const(prep["enc_w2"]),
        const(prep["rrep"]), const(prep["dh_mask"]),
        per_layer(prep["T"]), per_layer(prep["G"]),
        per_layer(prep["Wcr"]), per_layer(prep["Wci"]),
        per_layer(prep["n0_g"]), per_layer(prep["n0_b"]),
        per_layer(prep["mlp_w1"]), per_layer(prep["mlp_b1"]),
        per_layer(prep["mlp_w2"]), per_layer(prep["mlp_b2"]),
        per_layer(prep["n1_g"]), per_layer(prep["n1_b"]),
        per_layer(prep["skip_w"]),
        const(prep["dec_w1"]), const(prep["dec_b1"]),
        const(prep["dec_w2"]), const(prep["res_w"]),
    ]
    operands = (x_cl, x_res,
                prep["enc_w1"], prep["enc_b1"], prep["enc_w2"],
                prep["rrep"], prep["dh_mask"],
                prep["T"], prep["G"], prep["Wcr"], prep["Wci"],
                prep["n0_g"], prep["n0_b"],
                prep["mlp_w1"], prep["mlp_b1"], prep["mlp_w2"], prep["mlp_b2"],
                prep["n1_g"], prep["n1_b"], prep["skip_w"],
                prep["dec_w1"], prep["dec_b1"], prep["dec_w2"], prep["res_w"])

    grid_spec = pltpu.PrefetchScalarGridSpec(
        num_scalar_prefetch=1,
        grid=(total,),
        in_specs=in_specs,
        out_specs=pl.BlockSpec((B * Cout, HWmax), lambda i, s: (0, 0)),
        scratch_shapes=[pltpu.VMEM((HWmax, BE), jnp.float32)],
    )
    return pl.pallas_call(
        kernel,
        out_shape=jax.ShapeDtypeStruct((B * Cout, HWmax), jnp.float32),
        grid_spec=grid_spec,
        compiler_params=pltpu.CompilerParams(
            dimension_semantics=("arbitrary",)),
    )(prep["meta"], *operands)


# ---------------------------------------------------------------------------
# SHT basis construction (host-side numpy; torch_harmonics RealSHT / InverseRealSHT,
# norm='ortho', csphase=True, lon-FFT + lat-quadrature folded into dense matrices).
# Layout: analysis T (2*L*Mp, nlat*nlon) rows = [real (l-major, m-padded) | imag],
#         synthesis G (nlat*nlon, 2*L*Mp) columns likewise (padded m columns zero).
# ---------------------------------------------------------------------------

def _legendre_gauss_nodes(nlat):
    return np.polynomial.legendre.leggauss(nlat)


def _clenshaw_curtiss_nodes(nlat):
    N = nlat - 1
    tj = np.pi * np.arange(nlat) / N
    xj = np.cos(tj)
    w = np.zeros(nlat)
    for k in range(nlat):
        s = 0.0
        for j in range(1, N // 2 + 1):
            bj = 1.0 if 2 * j == N else 2.0
            s += bj / (4.0 * j * j - 1.0) * np.cos(2.0 * j * tj[k])
        w[k] = 2.0 / N * (1.0 - s)
    w[0] *= 0.5
    w[-1] *= 0.5
    return xj, w


def _quad(nlat, grid):
    if grid == "legendre-gauss":
        return _legendre_gauss_nodes(nlat)
    if grid == "equiangular":
        return _clenshaw_curtiss_nodes(nlat)
    raise ValueError(grid)


def _legpoly(mmax, lmax, x, csphase=True):
    nmax = max(mmax, lmax)
    vdm = np.zeros((nmax, nmax, len(x)), dtype=np.float64)
    vdm[0, 0, :] = 1.0 / np.sqrt(4.0 * np.pi)
    for l in range(1, nmax):
        vdm[l - 1, l, :] = np.sqrt(2 * l + 1.0) * x * vdm[l - 1, l - 1, :]
        vdm[l, l, :] = np.sqrt((2 * l + 1.0) * (1.0 + x) * (1.0 - x) / (2.0 * l)) * vdm[l - 1, l - 1, :]
    for l in range(2, nmax):
        for m in range(0, l - 1):
            a = np.sqrt((2 * l - 1.0) / (l - m) * (2 * l + 1.0) / (l + m))
            b = np.sqrt((l + m - 1.0) / (l - m) * (2 * l + 1.0) / (2 * l - 3.0) * (l - m - 1.0) / (l + m))
            vdm[m, l, :] = x * a * vdm[m, l - 1, :] - b * vdm[m, l - 2, :]
    vdm = vdm[:mmax, :lmax]
    if csphase:
        for m in range(1, mmax, 2):
            vdm[m] = -vdm[m]
    return vdm


def _sht_fwd_basis(nlat, nlon, lmax, mmax, mpad, grid):
    cost, w = _quad(nlat, grid)
    tq = np.flip(np.arccos(cost))
    wq = np.flip(w)
    pct = _legpoly(mmax, lmax, np.cos(tq))
    wlat = pct * wq[None, None, :]
    j = np.arange(nlon)
    m = np.arange(mmax)
    ang = 2.0 * np.pi * np.outer(j, m) / nlon
    fr = (2.0 * np.pi / nlon) * np.cos(ang)
    fi = -(2.0 * np.pi / nlon) * np.sin(ang)
    Tr = np.einsum("mlk,jm->lmkj", wlat, fr).reshape(lmax, mmax, nlat * nlon)
    Ti = np.einsum("mlk,jm->lmkj", wlat, fi).reshape(lmax, mmax, nlat * nlon)
    T = np.zeros((2 * lmax * mpad, nlat * nlon), np.float64)
    for l in range(lmax):
        T[l * mpad:l * mpad + mmax, :] = Tr[l]
        T[lmax * mpad + l * mpad:lmax * mpad + l * mpad + mmax, :] = Ti[l]
    return {"T": np.asarray(T, np.float32), "nlat": nlat, "nlon": nlon, "grid": grid}


def _sht_inv_basis(nlat, nlon, lmax, mmax, mpad, grid):
    cost, _ = _quad(nlat, grid)
    t = np.flip(np.arccos(cost))
    pct = _legpoly(mmax, lmax, np.cos(t))
    m = np.arange(mmax)
    j = np.arange(nlon)
    ang = 2.0 * np.pi * np.outer(m, j) / nlon
    cm = np.full((mmax,), 2.0)
    cm[0] = 1.0
    if mmax - 1 == nlon // 2:
        cm[-1] = 1.0
    gr = cm[:, None] * np.cos(ang)
    gi = -cm[:, None] * np.sin(ang)
    Gr = np.einsum("mlk,mj->lmkj", pct, gr).reshape(lmax, mmax, nlat * nlon)
    Gi = np.einsum("mlk,mj->lmkj", pct, gi).reshape(lmax, mmax, nlat * nlon)
    G = np.zeros((nlat * nlon, 2 * lmax * mpad), np.float64)
    for l in range(lmax):
        G[:, l * mpad:l * mpad + mmax] = Gr[l].T
        G[:, lmax * mpad + l * mpad:lmax * mpad + l * mpad + mmax] = Gi[l].T
    return {"G": np.asarray(G, np.float32), "nlat": nlat, "nlon": nlon, "grid": grid}


def make_bases(cfg):
    L, M, Mp = cfg["modes_lat"], cfg["modes_lon"], cfg["m_pad"]
    Hin, Win = cfg["inp_shape"]
    Hout, Wout = cfg["out_shape"]
    h, w = cfg["h"], cfg["w"]
    return {
        "trans_down": _sht_fwd_basis(Hin, Win, L, M, Mp, cfg["model_grid_type"]),
        "trans": _sht_fwd_basis(h, w, L, M, Mp, cfg["sht_grid_type"]),
        "itrans": _sht_inv_basis(h, w, L, M, Mp, cfg["sht_grid_type"]),
        "itrans_up": _sht_inv_basis(Hout, Wout, L, M, Mp, cfg["model_grid_type"]),
    }


# ---------------------------------------------------------------------------
# Parameters (synthetic init; PyTorch Conv2d (Cout,Cin,1,1) stored as (in, out))
# ---------------------------------------------------------------------------

def init_params(key, cfg):
    E = cfg["embed_dim"]
    Cin, Cout = cfg["inp_chans"], cfg["out_chans"]
    enc_h = int(cfg["encoder_ratio"] * E)
    dec_h = int(cfg["decoder_ratio"] * E)
    mlp_h = int(cfg["mlp_ratio"] * E)
    L = cfg["modes_lat"]
    keys = iter(jax.random.split(key, 64))

    def nrm(shape, std):
        return jax.random.normal(next(keys), shape, jnp.float32) * std

    p = {
        "enc_w1": nrm((Cin, enc_h), math.sqrt(2.0 / Cin)),
        "enc_b1": jnp.zeros((enc_h,), jnp.float32),
        "enc_w2": nrm((enc_h, E), math.sqrt(1.0 / enc_h)),
        "dec_w1": nrm((E, dec_h), math.sqrt(2.0 / E)),
        "dec_b1": jnp.zeros((dec_h,), jnp.float32),
        "dec_w2": nrm((dec_h, Cout), math.sqrt(0.5 / dec_h)),   # gain 0.5 because big_skip
        "res_w": nrm((Cout, Cout), math.sqrt(0.5 / Cout)),      # residual_transform
        "blocks": [],
    }
    for _ in range(cfg["num_layers"]):
        std = math.sqrt(2.0 / E)     # SpectralConv gain_factor=2.0 (GELU, inner_skip='none')
        p["blocks"].append({
            "wr": nrm((E, E, L), std),                           # complex dhconv weight (in,out,l)
            "wi": nrm((E, E, L), std),
            "n0_g": jnp.ones((E,), jnp.float32), "n0_b": jnp.zeros((E,), jnp.float32),
            "mlp_w1": nrm((E, mlp_h), math.sqrt(2.0 / E)),
            "mlp_b1": jnp.zeros((mlp_h,), jnp.float32),
            "mlp_w2": nrm((mlp_h, E), math.sqrt(0.5 / mlp_h)),   # MLP gain 0.5 (outer_skip linear)
            "mlp_b2": jnp.zeros((E,), jnp.float32),
            "n1_g": jnp.ones((E,), jnp.float32), "n1_b": jnp.zeros((E,), jnp.float32),
            "outer_w": nrm((E, E), math.sqrt(0.5 / E)),
        })
    return p


# ---------------------------------------------------------------------------
# Host-side one-time packing: kron over batch, per-layer stacks, padded bases.
# ---------------------------------------------------------------------------

def prepare_model(params, bases, cfg):
    B, E = cfg["batch"], cfg["embed_dim"]
    L, Mp = cfg["modes_lat"], cfg["m_pad"]
    nl, rep = cfg["num_layers"], cfg["repeat_layers"]
    HWmax = cfg["hw_max"]
    BE = B * E
    eyeB = np.eye(B, dtype=np.float32)

    def kron_cl(w):    # channels-on-lanes (right-multiply) weight
        return np.kron(eyeB, np.asarray(w, np.float32))

    def kron_rows(w):  # channels-on-rows (left-multiply) weight
        return np.kron(eyeB, np.asarray(w, np.float32).T)

    def lane_vec(v):   # (C,) -> (1, B*C), batch-major lanes
        return np.tile(np.asarray(v, np.float32).reshape(1, -1), (1, B))

    total = nl * rep
    T_l, G_l, Wcr_l, Wci_l = [], [], [], []
    n0g, n0b, mw1, mb1, mw2, mb2, n1g, n1b, wsk = ([] for _ in range(9))
    meta = []
    for step in range(total):
        i = step % nl
        fwd = bases["trans_down"] if i == 0 else bases["trans"]
        inv = bases["itrans_up"] if i == nl - 1 else bases["itrans"]

        T = np.zeros((2 * L * Mp, HWmax), np.float32)
        T[:, :fwd["T"].shape[1]] = fwd["T"]
        G = np.zeros((HWmax, 2 * L * Mp), np.float32)
        G[:inv["G"].shape[0], :] = inv["G"]
        T_l.append(T)
        G_l.append(G)

        blk = params["blocks"][i]
        wr = np.asarray(blk["wr"], np.float32)
        wi = np.asarray(blk["wi"], np.float32)
        Wcr = np.zeros((L * BE, BE), np.float32)
        Wci = np.zeros((L * BE, BE), np.float32)
        for ll in range(L):
            Wcr[ll * BE:(ll + 1) * BE, :] = np.kron(eyeB, wr[:, :, ll])
            Wci[ll * BE:(ll + 1) * BE, :] = np.kron(eyeB, wi[:, :, ll])
        Wcr_l.append(Wcr)
        Wci_l.append(Wci)

        n0g.append(lane_vec(blk["n0_g"])); n0b.append(lane_vec(blk["n0_b"]))
        n1g.append(lane_vec(blk["n1_g"])); n1b.append(lane_vec(blk["n1_b"]))
        mw1.append(kron_cl(blk["mlp_w1"])); mb1.append(lane_vec(blk["mlp_b1"]))
        mw2.append(kron_cl(blk["mlp_w2"])); mb2.append(lane_vec(blk["mlp_b2"]))
        wsk.append(kron_cl(blk["outer_w"]))

        scale_res = ((fwd["nlat"], fwd["nlon"], fwd["grid"])
                     != (inv["nlat"], inv["nlon"], inv["grid"]))
        meta.append([inv["nlat"] * inv["nlon"], int(scale_res),
                     fwd["nlat"] * fwd["nlon"]])

    LMp = L * Mp
    rrep = np.tile(np.eye(BE, dtype=np.float32), (1, L))                   # (BE, L*BE)
    rr = np.arange(2 * LMp)
    cc = np.arange(L * BE)
    dh_mask = (((rr % LMp) // Mp)[:, None] == (cc // BE)[None, :]).astype(np.float32)

    j32 = lambda a: jnp.asarray(np.asarray(a, np.float32))
    return {
        "meta": jnp.asarray(np.asarray(meta, np.int32)),
        "enc_w1": j32(kron_cl(params["enc_w1"])),
        "enc_b1": j32(lane_vec(params["enc_b1"])),
        "enc_w2": j32(kron_cl(params["enc_w2"])),
        "rrep": j32(rrep),
        "dh_mask": j32(dh_mask),
        "T": j32(np.stack(T_l)), "G": j32(np.stack(G_l)),
        "Wcr": j32(np.stack(Wcr_l)), "Wci": j32(np.stack(Wci_l)),
        "n0_g": j32(np.stack(n0g)), "n0_b": j32(np.stack(n0b)),
        "mlp_w1": j32(np.stack(mw1)), "mlp_b1": j32(np.stack(mb1)),
        "mlp_w2": j32(np.stack(mw2)), "mlp_b2": j32(np.stack(mb2)),
        "n1_g": j32(np.stack(n1g)), "n1_b": j32(np.stack(n1b)),
        "skip_w": j32(np.stack(wsk)),
        "dec_w1": j32(kron_rows(params["dec_w1"])),
        "dec_b1": j32(np.tile(np.asarray(params["dec_b1"], np.float32), B).reshape(-1, 1)),
        "dec_w2": j32(kron_rows(params["dec_w2"])),
        "res_w": j32(kron_rows(params["res_w"])),
    }


# ---------------------------------------------------------------------------
# Model forward
# ---------------------------------------------------------------------------

def sfno_forward(x, prep, cfg):
    B, Cin, H, W = x.shape
    assert B == cfg["batch"]
    Cout = cfg["out_chans"]
    HW = H * W
    HWmax = cfg["hw_max"]

    # channels-last packed encoder input: rows = space, lanes = (batch, channel)
    x_cl = jnp.transpose(x, (2, 3, 0, 1)).reshape(HW, B * Cin)
    if HW < HWmax:
        x_cl = jnp.pad(x_cl, ((0, HWmax - HW), (0, 0)))
    # big-skip residual in NCHW-native (channels-on-rows) layout -- no transpose needed
    # TODO(synk): out_shape != inp_shape would require the SHT-regrid big-skip path.
    x_res = x[:, :Cout].reshape(B * Cout, HW)
    if HW < HWmax:
        x_res = jnp.pad(x_res, ((0, 0), (0, HWmax - HW)))

    y = _sfno_call(x_cl, x_res, prep, cfg)                 # (B*Cout, HWmax), NCHW-native
    Ho, Wo = cfg["out_shape"]
    return y[:, :Ho * Wo].reshape(B, Cout, Ho, Wo)


# ---------------------------------------------------------------------------
# Main
# ---------------------------------------------------------------------------

if __name__ == "__main__":
    cfg = {
        "inp_shape": (8, 16),
        "out_shape": (8, 16),
        "scale_factor": 2,
        "inp_chans": 4,
        "out_chans": 4,
        "embed_dim": 16,
        "num_layers": 2,
        "repeat_layers": 1,
        "mlp_ratio": 2.0,
        "encoder_ratio": 1,
        "decoder_ratio": 1,
        "model_grid_type": "equiangular",
        "sht_grid_type": "legendre-gauss",
        "batch": 2,
    }
    cfg["h"] = cfg["inp_shape"][0] // cfg["scale_factor"]        # 4
    cfg["w"] = cfg["inp_shape"][1] // cfg["scale_factor"]        # 8
    cfg["modes_lat"] = cfg["h"]                                  # hard_thresholding_fraction = 1.0
    cfg["modes_lon"] = cfg["w"] // 2 + 1                         # 5
    cfg["m_pad"] = ((cfg["modes_lon"] + 7) // 8) * 8             # sublane-aligned mode padding
    cfg["hw_max"] = max(cfg["inp_shape"][0] * cfg["inp_shape"][1],
                        cfg["out_shape"][0] * cfg["out_shape"][1],
                        cfg["h"] * cfg["w"])

    key = jax.random.PRNGKey(0)
    k_par, k_inp = jax.random.split(key)
    params = init_params(k_par, cfg)
    bases = make_bases(cfg)
    prep = prepare_model(params, bases, cfg)

    x = jax.random.normal(k_inp, (cfg["batch"], cfg["inp_chans"]) + cfg["inp_shape"],
                          jnp.float32)

    fwd_fn = jax.jit(lambda xx, pp: sfno_forward(xx, pp, cfg))
    y = fwd_fn(x, prep)
    jax.block_until_ready(y)

    assert y.shape == (cfg["batch"], cfg["out_chans"]) + cfg["out_shape"], y.shape
    assert y.dtype == jnp.float32
    assert bool(jnp.all(jnp.isfinite(y)))
    print("KERNEL_OK")
</pallas_src>

<mosaic_0001>
module attributes {stable_mosaic.version = 11 : i64} {
  func.func @_sfno_kernel(%arg0: i32, %arg1: memref<2x3xi32, #tpu.memory_space<smem>>, %arg2: memref<128x8xf32, #tpu.memory_space<vmem>>, %arg3: memref<8x128xf32, #tpu.memory_space<vmem>>, %arg4: memref<8x32xf32, #tpu.memory_space<vmem>>, %arg5: memref<1x32xf32, #tpu.memory_space<vmem>>, %arg6: memref<32x32xf32, #tpu.memory_space<vmem>>, %arg7: memref<32x128xf32, #tpu.memory_space<vmem>>, %arg8: memref<64x128xf32, #tpu.memory_space<vmem>>, %arg9: memref<1x64x128xf32, #tpu.memory_space<vmem>>, %arg10: memref<1x128x64xf32, #tpu.memory_space<vmem>>, %arg11: memref<1x128x32xf32, #tpu.memory_space<vmem>>, %arg12: memref<1x128x32xf32, #tpu.memory_space<vmem>>, %arg13: memref<1x1x32xf32, #tpu.memory_space<vmem>>, %arg14: memref<1x1x32xf32, #tpu.memory_space<vmem>>, %arg15: memref<1x32x64xf32, #tpu.memory_space<vmem>>, %arg16: memref<1x1x64xf32, #tpu.memory_space<vmem>>, %arg17: memref<1x64x32xf32, #tpu.memory_space<vmem>>, %arg18: memref<1x1x32xf32, #tpu.memory_space<vmem>>, %arg19: memref<1x1x32xf32, #tpu.memory_space<vmem>>, %arg20: memref<1x1x32xf32, #tpu.memory_space<vmem>>, %arg21: memref<1x32x32xf32, #tpu.memory_space<vmem>>, %arg22: memref<32x32xf32, #tpu.memory_space<vmem>>, %arg23: memref<32x1xf32, #tpu.memory_space<vmem>>, %arg24: memref<8x32xf32, #tpu.memory_space<vmem>>, %arg25: memref<8x8xf32, #tpu.memory_space<vmem>>, %arg26: memref<8x128xf32, #tpu.memory_space<vmem>>, %arg27: memref<128x32xf32, #tpu.memory_space<vmem>>) attributes {dimension_semantics = [#tpu.dimension_semantics<arbitrary>], iteration_bounds = array<i64: 2>, scalar_prefetch = 1 : i64, scratch_operands = 1 : i64, tpu.core_type = #tpu.core_type<tc>, window_params = [{pipeline_mode = #tpu.pipeline_mode<synchronous>, transform_indices = @transform_0, window_bounds = array<i64: 128, 8>}, {pipeline_mode = #tpu.pipeline_mode<synchronous>, transform_indices = @transform_1, window_bounds = array<i64: 8, 128>}, {pipeline_mode = #tpu.pipeline_mode<synchronous>, transform_indices = @transform_2, window_bounds = array<i64: 8, 32>}, {pipeline_mode = #tpu.pipeline_mode<synchronous>, transform_indices = @transform_3, window_bounds = array<i64: 1, 32>}, {pipeline_mode = #tpu.pipeline_mode<synchronous>, transform_indices = @transform_4, window_bounds = array<i64: 32, 32>}, {pipeline_mode = #tpu.pipeline_mode<synchronous>, transform_indices = @transform_5, window_bounds = array<i64: 32, 128>}, {pipeline_mode = #tpu.pipeline_mode<synchronous>, transform_indices = @transform_6, window_bounds = array<i64: 64, 128>}, {transform_indices = @transform_7, window_bounds = array<i64: 1, 64, 128>}, {transform_indices = @transform_8, window_bounds = array<i64: 1, 128, 64>}, {transform_indices = @transform_9, window_bounds = array<i64: 1, 128, 32>}, {transform_indices = @transform_10, window_bounds = array<i64: 1, 128, 32>}, {transform_indices = @transform_11, window_bounds = array<i64: 1, 1, 32>}, {transform_indices = @transform_12, window_bounds = array<i64: 1, 1, 32>}, {transform_indices = @transform_13, window_bounds = array<i64: 1, 32, 64>}, {transform_indices = @transform_14, window_bounds = array<i64: 1, 1, 64>}, {transform_indices = @transform_15, window_bounds = array<i64: 1, 64, 32>}, {transform_indices = @transform_16, window_bounds = array<i64: 1, 1, 32>}, {transform_indices = @transform_17, window_bounds = array<i64: 1, 1, 32>}, {transform_indices = @transform_18, window_bounds = array<i64: 1, 1, 32>}, {transform_indices = @transform_19, window_bounds = array<i64: 1, 32, 32>}, {pipeline_mode = #tpu.pipeline_mode<synchronous>, transform_indices = @transform_20, window_bounds = array<i64: 32, 32>}, {pipeline_mode = #tpu.pipeline_mode<synchronous>, transform_indices = @transform_21, window_bounds = array<i64: 32, 1>}, {pipeline_mode = #tpu.pipeline_mode<synchronous>, transform_indices = @transform_22, window_bounds = array<i64: 8, 32>}, {pipeline_mode = #tpu.pipeline_mode<synchronous>, transform_indices = @transform_23, window_bounds = array<i64: 8, 8>}, {pipeline_mode = #tpu.pipeline_mode<synchronous>, transform_indices = @transform_24, window_bounds = array<i64: 8, 128>}]} {
    %0 = tpu.iota {dimensions = array<i32: 0>} : vector<128x1xi32>
    %c0_i32 = arith.constant 0 : i32
    %1 = arith.cmpi eq, %arg0, %c0_i32 : i32
    %2 = arith.extui %1 : i1 to i32
    %c0_i32_0 = arith.constant 0 : i32
    %3 = arith.cmpi ne, %2, %c0_i32_0 : i32
    scf.if %3 {
      %c0_103 = arith.constant 0 : index
      %c0_104 = arith.constant 0 : index
      %220 = vector.load %arg2[%c0_103, %c0_104] : memref<128x8xf32, #tpu.memory_space<vmem>>, vector<128x8xf32>
      %c0_105 = arith.constant 0 : index
      %c0_106 = arith.constant 0 : index
      %221 = vector.load %arg4[%c0_105, %c0_106] : memref<8x32xf32, #tpu.memory_space<vmem>>, vector<8x32xf32>
      %cst_107 = arith.constant dense<0.000000e+00> : vector<128x32xf32>
      %222 = tpu.matmul %220, %221, %cst_107 {dimension_numbers = #tpu.dot_dimension_numbers<[1], [0], [0], [1], [0, 0, 1, 1], [], []>} : vector<128x8xf32>, vector<8x32xf32>, vector<128x32xf32> -> vector<128x32xf32>
      %c0_108 = arith.constant 0 : index
      %c0_109 = arith.constant 0 : index
      %223 = vector.load %arg5[%c0_108, %c0_109] : memref<1x32xf32, #tpu.memory_space<vmem>>, vector<1x32xf32>
      %224 = vector.broadcast %223 : vector<1x32xf32> to vector<128x32xf32>
      %225 = arith.addf %222, %224 : vector<128x32xf32>
      %cst_110 = arith.constant 5.000000e-01 : f32
      %226 = vector.broadcast %cst_110 : f32 to vector<128x32xf32>
      %227 = arith.mulf %226, %225 : vector<128x32xf32>
      %cst_111 = arith.constant 0.707106769 : f32
      %228 = vector.broadcast %cst_111 : f32 to vector<128x32xf32>
      %229 = arith.mulf %225, %228 : vector<128x32xf32>
      %cst_112 = arith.constant 0.000000e+00 : f32
      %230 = vector.broadcast %cst_112 : f32 to vector<128x32xf32>
      %231 = arith.cmpf oge, %229, %230 : vector<128x32xf32>
      %cst_113 = arith.constant 1.000000e+00 : f32
      %cst_114 = arith.constant -1.000000e+00 : f32
      %232 = vector.broadcast %cst_113 : f32 to vector<128x32xf32>
      %233 = vector.broadcast %cst_114 : f32 to vector<128x32xf32>
      %234 = arith.select %231, %232, %233 : vector<128x32xi1>, vector<128x32xf32>
      %235 = math.absf %229 : vector<128x32xf32>
      %cst_115 = arith.constant 0.327591091 : f32
      %236 = vector.broadcast %cst_115 : f32 to vector<128x32xf32>
      %237 = arith.mulf %236, %235 : vector<128x32xf32>
      %cst_116 = arith.constant 1.000000e+00 : f32
      %238 = vector.broadcast %cst_116 : f32 to vector<128x32xf32>
      %239 = arith.addf %238, %237 : vector<128x32xf32>
      %cst_117 = arith.constant 1.000000e+00 : f32
      %240 = vector.broadcast %cst_117 : f32 to vector<128x32xf32>
      %241 = arith.divf %240, %239 : vector<128x32xf32>
      %cst_118 = arith.constant 1.06140542 : f32
      %242 = vector.broadcast %cst_118 : f32 to vector<128x32xf32>
      %243 = arith.mulf %242, %241 : vector<128x32xf32>
      %cst_119 = arith.constant -1.45315206 : f32
      %244 = vector.broadcast %cst_119 : f32 to vector<128x32xf32>
      %245 = arith.addf %243, %244 : vector<128x32xf32>
      %246 = arith.mulf %245, %241 : vector<128x32xf32>
      %cst_120 = arith.constant 1.42141378 : f32
      %247 = vector.broadcast %cst_120 : f32 to vector<128x32xf32>
      %248 = arith.addf %246, %247 : vector<128x32xf32>
      %249 = arith.mulf %248, %241 : vector<128x32xf32>
      %cst_121 = arith.constant -0.284496725 : f32
      %250 = vector.broadcast %cst_121 : f32 to vector<128x32xf32>
      %251 = arith.addf %249, %250 : vector<128x32xf32>
      %252 = arith.mulf %251, %241 : vector<128x32xf32>
      %cst_122 = arith.constant 0.254829586 : f32
      %253 = vector.broadcast %cst_122 : f32 to vector<128x32xf32>
      %254 = arith.addf %252, %253 : vector<128x32xf32>
      %255 = arith.mulf %254, %241 : vector<128x32xf32>
      %cst_123 = arith.constant 0.000000e+00 : f32
      %256 = vector.broadcast %cst_123 : f32 to vector<128x32xf32>
      %257 = arith.subf %256, %235 : vector<128x32xf32>
      %258 = arith.mulf %257, %235 : vector<128x32xf32>
      %259 = math.exp %258 : vector<128x32xf32>
      %260 = arith.mulf %255, %259 : vector<128x32xf32>
      %cst_124 = arith.constant 1.000000e+00 : f32
      %261 = vector.broadcast %cst_124 : f32 to vector<128x32xf32>
      %262 = arith.subf %261, %260 : vector<128x32xf32>
      %263 = arith.mulf %234, %262 : vector<128x32xf32>
      %cst_125 = arith.constant 1.000000e+00 : f32
      %264 = vector.broadcast %cst_125 : f32 to vector<128x32xf32>
      %265 = arith.addf %264, %263 : vector<128x32xf32>
      %266 = arith.mulf %227, %265 : vector<128x32xf32>
      %c0_126 = arith.constant 0 : index
      %c0_127 = arith.constant 0 : index
      %267 = vector.load %arg6[%c0_126, %c0_127] : memref<32x32xf32, #tpu.memory_space<vmem>>, vector<32x32xf32>
      %cst_128 = arith.constant dense<0.000000e+00> : vector<128x32xf32>
      %268 = tpu.matmul %266, %267, %cst_128 {dimension_numbers = #tpu.dot_dimension_numbers<[1], [0], [0], [1], [0, 0, 1, 1], [], []>} : vector<128x32xf32>, vector<32x32xf32>, vector<128x32xf32> -> vector<128x32xf32>
      %c0_129 = arith.constant 0 : index
      %c2 = arith.constant 2 : index
      %269 = memref.load %arg1[%c0_129, %c2] : memref<2x3xi32, #tpu.memory_space<smem>>
      %270 = vector.broadcast %269 : i32 to vector<128x1xi32>
      %271 = arith.cmpi slt, %0, %270 : vector<128x1xi32>
      %272 = arith.extui %271 : vector<128x1xi1> to vector<128x1xi32>
      %273 = arith.sitofp %272 : vector<128x1xi32> to vector<128x1xf32>
      %274 = vector.broadcast %273 : vector<128x1xf32> to vector<128x32xf32>
      %275 = arith.mulf %268, %274 : vector<128x32xf32>
      %c0_130 = arith.constant 0 : index
      %c0_131 = arith.constant 0 : index
      %276 = vector.load %arg27[%c0_130, %c0_131] : memref<128x32xf32, #tpu.memory_space<vmem>>, vector<128x32xf32>
      tpu.vector_store %arg27[%c0_130, %c0_131], %275 {strides = array<i32>} : memref<128x32xf32, #tpu.memory_space<vmem>>, vector<128x32xf32>,
    } else {
    }
    %c0 = arith.constant 0 : index
    %c0_1 = arith.constant 0 : index
    %4 = vector.load %arg27[%c0, %c0_1] : memref<128x32xf32, #tpu.memory_space<vmem>>, vector<128x32xf32>
    %c0_2 = arith.constant 0 : index
    %c0_3 = arith.constant 0 : index
    %c0_4 = arith.constant 0 : index
    %5 = vector.load %arg9[%c0_2, %c0_3, %c0_4] : memref<1x64x128xf32, #tpu.memory_space<vmem>>, vector<1x64x128xf32>
    %6 = vector.shape_cast %5 : vector<1x64x128xf32> to vector<64x128xf32>
    %cst = arith.constant dense<0.000000e+00> : vector<64x32xf32>
    %7 = tpu.matmul %6, %4, %cst {dimension_numbers = #tpu.dot_dimension_numbers<[1], [0], [0], [1], [0, 0, 1, 1], [], []>} : vector<64x128xf32>, vector<128x32xf32>, vector<64x32xf32> -> vector<64x32xf32>
    %c0_5 = arith.constant 0 : index
    %c0_6 = arith.constant 0 : index
    %8 = vector.load %arg7[%c0_5, %c0_6] : memref<32x128xf32, #tpu.memory_space<vmem>>, vector<32x128xf32>
    %cst_7 = arith.constant dense<0.000000e+00> : vector<64x128xf32>
    %9 = tpu.matmul %7, %8, %cst_7 {dimension_numbers = #tpu.dot_dimension_numbers<[1], [0], [0], [1], [0, 0, 1, 1], [], []>} : vector<64x32xf32>, vector<32x128xf32>, vector<64x128xf32> -> vector<64x128xf32>
    %c0_8 = arith.constant 0 : index
    %c0_9 = arith.constant 0 : index
    %10 = vector.load %arg8[%c0_8, %c0_9] : memref<64x128xf32, #tpu.memory_space<vmem>>, vector<64x128xf32>
    %11 = arith.mulf %9, %10 : vector<64x128xf32>
    %c0_10 = arith.constant 0 : index
    %c0_11 = arith.constant 0 : index
    %c0_12 = arith.constant 0 : index
    %12 = vector.load %arg11[%c0_10, %c0_11, %c0_12] : memref<1x128x32xf32, #tpu.memory_space<vmem>>, vector<1x128x32xf32>
    %13 = vector.shape_cast %12 : vector<1x128x32xf32> to vector<128x32xf32>
    %cst_13 = arith.constant dense<0.000000e+00> : vector<64x32xf32>
    %14 = tpu.matmul %11, %13, %cst_13 {dimension_numbers = #tpu.dot_dimension_numbers<[1], [0], [0], [1], [0, 0, 1, 1], [], []>} : vector<64x128xf32>, vector<128x32xf32>, vector<64x32xf32> -> vector<64x32xf32>
    %c0_14 = arith.constant 0 : index
    %c0_15 = arith.constant 0 : index
    %c0_16 = arith.constant 0 : index
    %15 = vector.load %arg12[%c0_14, %c0_15, %c0_16] : memref<1x128x32xf32, #tpu.memory_space<vmem>>, vector<1x128x32xf32>
    %16 = vector.shape_cast %15 : vector<1x128x32xf32> to vector<128x32xf32>
    %cst_17 = arith.constant dense<0.000000e+00> : vector<64x32xf32>
    %17 = tpu.matmul %11, %16, %cst_17 {dimension_numbers = #tpu.dot_dimension_numbers<[1], [0], [0], [1], [0, 0, 1, 1], [], []>} : vector<64x128xf32>, vector<128x32xf32>, vector<64x32xf32> -> vector<64x32xf32>
    %18 = vector.extract_strided_slice %14 {offsets = [0, 0], sizes = [32, 32], strides = [1, 1]} : vector<64x32xf32> to vector<32x32xf32>
    %19 = vector.extract_strided_slice %17 {offsets = [32, 0], sizes = [32, 32], strides = [1, 1]} : vector<64x32xf32> to vector<32x32xf32>
    %20 = arith.subf %18, %19 : vector<32x32xf32>
    %21 = vector.extract_strided_slice %17 {offsets = [0, 0], sizes = [32, 32], strides = [1, 1]} : vector<64x32xf32> to vector<32x32xf32>
    %22 = vector.extract_strided_slice %14 {offsets = [32, 0], sizes = [32, 32], strides = [1, 1]} : vector<64x32xf32> to vector<32x32xf32>
    %23 = arith.addf %21, %22 : vector<32x32xf32>
    %24 = tpu.concatenate %20, %23 in 0 : vector<32x32xf32>, vector<32x32xf32> -> vector<64x32xf32>
    %c0_18 = arith.constant 0 : index
    %c0_19 = arith.constant 0 : index
    %c0_20 = arith.constant 0 : index
    %25 = vector.load %arg10[%c0_18, %c0_19, %c0_20] : memref<1x128x64xf32, #tpu.memory_space<vmem>>, vector<1x128x64xf32>
    %26 = vector.shape_cast %25 : vector<1x128x64xf32> to vector<128x64xf32>
    %cst_21 = arith.constant dense<0.000000e+00> : vector<128x32xf32>
    %27 = tpu.matmul %26, %24, %cst_21 {dimension_numbers = #tpu.dot_dimension_numbers<[1], [0], [0], [1], [0, 0, 1, 1], [], []>} : vector<128x64xf32>, vector<64x32xf32>, vector<128x32xf32> -> vector<128x32xf32>
    %c0_22 = arith.constant 0 : index
    %c0_23 = arith.constant 0 : index
    %c0_24 = arith.constant 0 : index
    %28 = vector.load %arg10[%c0_22, %c0_23, %c0_24] : memref<1x128x64xf32, #tpu.memory_space<vmem>>, vector<1x128x64xf32>
    %29 = vector.shape_cast %28 : vector<1x128x64xf32> to vector<128x64xf32>
    %cst_25 = arith.constant dense<0.000000e+00> : vector<128x32xf32>
    %30 = tpu.matmul %29, %7, %cst_25 {dimension_numbers = #tpu.dot_dimension_numbers<[1], [0], [0], [1], [0, 0, 1, 1], [], []>} : vector<128x64xf32>, vector<64x32xf32>, vector<128x32xf32> -> vector<128x32xf32>
    %31 = arith.index_cast %arg0 : i32 to index
    %c1 = arith.constant 1 : index
    %32 = memref.load %arg1[%31, %c1] : memref<2x3xi32, #tpu.memory_space<smem>>
    %c0_i32_26 = arith.constant 0 : i32
    %33 = arith.cmpi sgt, %32, %c0_i32_26 : i32
    %34 = arith.extui %33 : i1 to i32
    %35 = arith.sitofp %34 : i32 to f32
    %36 = vector.broadcast %35 : f32 to vector<128x32xf32>
    %37 = arith.mulf %30, %36 : vector<128x32xf32>
    %cst_27 = arith.constant 1.000000e+00 : f32
    %38 = arith.subf %cst_27, %35 : f32
    %39 = vector.broadcast %38 : f32 to vector<128x32xf32>
    %40 = arith.mulf %4, %39 : vector<128x32xf32>
    %41 = arith.addf %37, %40 : vector<128x32xf32>
    %42 = arith.index_cast %arg0 : i32 to index
    %c0_28 = arith.constant 0 : index
    %43 = memref.load %arg1[%42, %c0_28] : memref<2x3xi32, #tpu.memory_space<smem>>
    %44 = vector.broadcast %43 : i32 to vector<128x1xi32>
    %45 = arith.cmpi slt, %0, %44 : vector<128x1xi32>
    %46 = arith.extui %45 : vector<128x1xi1> to vector<128x1xi32>
    %47 = arith.sitofp %46 : vector<128x1xi32> to vector<128x1xf32>
    %48 = arith.sitofp %43 : i32 to f32
    %cst_29 = arith.constant 1.000000e+00 : f32
    %49 = arith.divf %cst_29, %48 : f32
    %c0_30 = arith.constant 0 : index
    %c0_31 = arith.constant 0 : index
    %c0_32 = arith.constant 0 : index
    %50 = vector.load %arg13[%c0_30, %c0_31, %c0_32] : memref<1x1x32xf32, #tpu.memory_space<vmem>>, vector<1x1x32xf32>
    %51 = vector.shape_cast %50 : vector<1x1x32xf32> to vector<1x32xf32>
    %c0_33 = arith.constant 0 : index
    %c0_34 = arith.constant 0 : index
    %c0_35 = arith.constant 0 : index
    %52 = vector.load %arg14[%c0_33, %c0_34, %c0_35] : memref<1x1x32xf32, #tpu.memory_space<vmem>>, vector<1x1x32xf32>
    %53 = vector.shape_cast %52 : vector<1x1x32xf32> to vector<1x32xf32>
    %54 = vector.broadcast %47 : vector<128x1xf32> to vector<128x32xf32>
    %55 = arith.mulf %27, %54 : vector<128x32xf32>
    %cst_36 = arith.constant dense<0.000000e+00> : vector<32xf32>
    %56 = vector.multi_reduction <add>, %55, %cst_36 [0] : vector<128x32xf32> to vector<32xf32>
    %57 = vector.shape_cast %56 : vector<32xf32> to vector<1x32xf32>
    %58 = arith.mulf %55, %55 : vector<128x32xf32>
    %cst_37 = arith.constant dense<0.000000e+00> : vector<32xf32>
    %59 = vector.multi_reduction <add>, %58, %cst_37 [0] : vector<128x32xf32> to vector<32xf32>
    %60 = vector.shape_cast %59 : vector<32xf32> to vector<1x32xf32>
    %61 = vector.broadcast %49 : f32 to vector<1x32xf32>
    %62 = arith.mulf %57, %61 : vector<1x32xf32>
    %63 = vector.broadcast %49 : f32 to vector<1x32xf32>
    %64 = arith.mulf %60, %63 : vector<1x32xf32>
    %65 = arith.mulf %62, %62 : vector<1x32xf32>
    %66 = arith.subf %64, %65 : vector<1x32xf32>
    %cst_38 = arith.constant 0.000000e+00 : f32
    %67 = vector.broadcast %cst_38 : f32 to vector<1x32xf32>
    %68 = arith.maximumf %66, %67 : vector<1x32xf32>
    %69 = vector.broadcast %62 : vector<1x32xf32> to vector<128x32xf32>
    %70 = arith.subf %27, %69 : vector<128x32xf32>
    %cst_39 = arith.constant 9.99999997E-7 : f32
    %71 = vector.broadcast %cst_39 : f32 to vector<1x32xf32>
    %72 = arith.addf %68, %71 : vector<1x32xf32>
    %73 = math.rsqrt %72 : vector<1x32xf32>
    %74 = vector.broadcast %73 : vector<1x32xf32> to vector<128x32xf32>
    %75 = arith.mulf %70, %74 : vector<128x32xf32>
    %76 = vector.broadcast %51 : vector<1x32xf32> to vector<128x32xf32>
    %77 = arith.mulf %75, %76 : vector<128x32xf32>
    %78 = vector.broadcast %53 : vector<1x32xf32> to vector<128x32xf32>
    %79 = arith.addf %77, %78 : vector<128x32xf32>
    %80 = vector.broadcast %47 : vector<128x1xf32> to vector<128x32xf32>
    %81 = arith.mulf %79, %80 : vector<128x32xf32>
    %cst_40 = arith.constant 5.000000e-01 : f32
    %82 = vector.broadcast %cst_40 : f32 to vector<128x32xf32>
    %83 = arith.mulf %82, %81 : vector<128x32xf32>
    %cst_41 = arith.constant 0.707106769 : f32
    %84 = vector.broadcast %cst_41 : f32 to vector<128x32xf32>
    %85 = arith.mulf %81, %84 : vector<128x32xf32>
    %cst_42 = arith.constant 0.000000e+00 : f32
    %86 = vector.broadcast %cst_42 : f32 to vector<128x32xf32>
    %87 = arith.cmpf oge, %85, %86 : vector<128x32xf32>
    %cst_43 = arith.constant 1.000000e+00 : f32
    %cst_44 = arith.constant -1.000000e+00 : f32
    %88 = vector.broadcast %cst_43 : f32 to vector<128x32xf32>
    %89 = vector.broadcast %cst_44 : f32 to vector<128x32xf32>
    %90 = arith.select %87, %88, %89 : vector<128x32xi1>, vector<128x32xf32>
    %91 = math.absf %85 : vector<128x32xf32>
    %cst_45 = arith.constant 0.327591091 : f32
    %92 = vector.broadcast %cst_45 : f32 to vector<128x32xf32>
    %93 = arith.mulf %92, %91 : vector<128x32xf32>
    %cst_46 = arith.constant 1.000000e+00 : f32
    %94 = vector.broadcast %cst_46 : f32 to vector<128x32xf32>
    %95 = arith.addf %94, %93 : vector<128x32xf32>
    %cst_47 = arith.constant 1.000000e+00 : f32
    %96 = vector.broadcast %cst_47 : f32 to vector<128x32xf32>
    %97 = arith.divf %96, %95 : vector<128x32xf32>
    %cst_48 = arith.constant 1.06140542 : f32
    %98 = vector.broadcast %cst_48 : f32 to vector<128x32xf32>
    %99 = arith.mulf %98, %97 : vector<128x32xf32>
    %cst_49 = arith.constant -1.45315206 : f32
    %100 = vector.broadcast %cst_49 : f32 to vector<128x32xf32>
    %101 = arith.addf %99, %100 : vector<128x32xf32>
    %102 = arith.mulf %101, %97 : vector<128x32xf32>
    %cst_50 = arith.constant 1.42141378 : f32
    %103 = vector.broadcast %cst_50 : f32 to vector<128x32xf32>
    %104 = arith.addf %102, %103 : vector<128x32xf32>
    %105 = arith.mulf %104, %97 : vector<128x32xf32>
    %cst_51 = arith.constant -0.284496725 : f32
    %106 = vector.broadcast %cst_51 : f32 to vector<128x32xf32>
    %107 = arith.addf %105, %106 : vector<128x32xf32>
    %108 = arith.mulf %107, %97 : vector<128x32xf32>
    %cst_52 = arith.constant 0.254829586 : f32
    %109 = vector.broadcast %cst_52 : f32 to vector<128x32xf32>
    %110 = arith.addf %108, %109 : vector<128x32xf32>
    %111 = arith.mulf %110, %97 : vector<128x32xf32>
    %cst_53 = arith.constant 0.000000e+00 : f32
    %112 = vector.broadcast %cst_53 : f32 to vector<128x32xf32>
    %113 = arith.subf %112, %91 : vector<128x32xf32>
    %114 = arith.mulf %113, %91 : vector<128x32xf32>
    %115 = math.exp %114 : vector<128x32xf32>
    %116 = arith.mulf %111, %115 : vector<128x32xf32>
    %cst_54 = arith.constant 1.000000e+00 : f32
    %117 = vector.broadcast %cst_54 : f32 to vector<128x32xf32>
    %118 = arith.subf %117, %116 : vector<128x32xf32>
    %119 = arith.mulf %90, %118 : vector<128x32xf32>
    %cst_55 = arith.constant 1.000000e+00 : f32
    %120 = vector.broadcast %cst_55 : f32 to vector<128x32xf32>
    %121 = arith.addf %120, %119 : vector<128x32xf32>
    %122 = arith.mulf %83, %121 : vector<128x32xf32>
    %c0_56 = arith.constant 0 : index
    %c0_57 = arith.constant 0 : index
    %c0_58 = arith.constant 0 : index
    %123 = vector.load %arg15[%c0_56, %c0_57, %c0_58] : memref<1x32x64xf32, #tpu.memory_space<vmem>>, vector<1x32x64xf32>
    %124 = vector.shape_cast %123 : vector<1x32x64xf32> to vector<32x64xf32>
    %cst_59 = arith.constant dense<0.000000e+00> : vector<128x64xf32>
    %125 = tpu.matmul %122, %124, %cst_59 {dimension_numbers = #tpu.dot_dimension_numbers<[1], [0], [0], [1], [0, 0, 1, 1], [], []>} : vector<128x32xf32>, vector<32x64xf32>, vector<128x64xf32> -> vector<128x64xf32>
    %c0_60 = arith.constant 0 : index
    %c0_61 = arith.constant 0 : index
    %c0_62 = arith.constant 0 : index
    %126 = vector.load %arg16[%c0_60, %c0_61, %c0_62] : memref<1x1x64xf32, #tpu.memory_space<vmem>>, vector<1x1x64xf32>
    %127 = vector.shape_cast %126 : vector<1x1x64xf32> to vector<1x64xf32>
    %128 = vector.broadcast %127 : vector<1x64xf32> to vector<128x64xf32>
    %129 = arith.addf %125, %128 : vector<128x64xf32>
    %cst_63 = arith.constant 5.000000e-01 : f32
    %130 = vector.broadcast %cst_63 : f32 to vector<128x64xf32>
    %131 = arith.mulf %130, %129 : vector<128x64xf32>
    %cst_64 = arith.constant 0.707106769 : f32
    %132 = vector.broadcast %cst_64 : f32 to vector<128x64xf32>
    %133 = arith.mulf %129, %132 : vector<128x64xf32>
    %cst_65 = arith.constant 0.000000e+00 : f32
    %134 = vector.broadcast %cst_65 : f32 to vector<128x64xf32>
    %135 = arith.cmpf oge, %133, %134 : vector<128x64xf32>
    %cst_66 = arith.constant 1.000000e+00 : f32
    %cst_67 = arith.constant -1.000000e+00 : f32
    %136 = vector.broadcast %cst_66 : f32 to vector<128x64xf32>
    %137 = vector.broadcast %cst_67 : f32 to vector<128x64xf32>
    %138 = arith.select %135, %136, %137 : vector<128x64xi1>, vector<128x64xf32>
    %139 = math.absf %133 : vector<128x64xf32>
    %cst_68 = arith.constant 0.327591091 : f32
    %140 = vector.broadcast %cst_68 : f32 to vector<128x64xf32>
    %141 = arith.mulf %140, %139 : vector<128x64xf32>
    %cst_69 = arith.constant 1.000000e+00 : f32
    %142 = vector.broadcast %cst_69 : f32 to vector<128x64xf32>
    %143 = arith.addf %142, %141 : vector<128x64xf32>
    %cst_70 = arith.constant 1.000000e+00 : f32
    %144 = vector.broadcast %cst_70 : f32 to vector<128x64xf32>
    %145 = arith.divf %144, %143 : vector<128x64xf32>
    %cst_71 = arith.constant 1.06140542 : f32
    %146 = vector.broadcast %cst_71 : f32 to vector<128x64xf32>
    %147 = arith.mulf %146, %145 : vector<128x64xf32>
    %cst_72 = arith.constant -1.45315206 : f32
    %148 = vector.broadcast %cst_72 : f32 to vector<128x64xf32>
    %149 = arith.addf %147, %148 : vector<128x64xf32>
    %150 = arith.mulf %149, %145 : vector<128x64xf32>
    %cst_73 = arith.constant 1.42141378 : f32
    %151 = vector.broadcast %cst_73 : f32 to vector<128x64xf32>
    %152 = arith.addf %150, %151 : vector<128x64xf32>
    %153 = arith.mulf %152, %145 : vector<128x64xf32>
    %cst_74 = arith.constant -0.284496725 : f32
    %154 = vector.broadcast %cst_74 : f32 to vector<128x64xf32>
    %155 = arith.addf %153, %154 : vector<128x64xf32>
    %156 = arith.mulf %155, %145 : vector<128x64xf32>
    %cst_75 = arith.constant 0.254829586 : f32
    %157 = vector.broadcast %cst_75 : f32 to vector<128x64xf32>
    %158 = arith.addf %156, %157 : vector<128x64xf32>
    %159 = arith.mulf %158, %145 : vector<128x64xf32>
    %cst_76 = arith.constant 0.000000e+00 : f32
    %160 = vector.broadcast %cst_76 : f32 to vector<128x64xf32>
    %161 = arith.subf %160, %139 : vector<128x64xf32>
    %162 = arith.mulf %161, %139 : vector<128x64xf32>
    %163 = math.exp %162 : vector<128x64xf32>
    %164 = arith.mulf %159, %163 : vector<128x64xf32>
    %cst_77 = arith.constant 1.000000e+00 : f32
    %165 = vector.broadcast %cst_77 : f32 to vector<128x64xf32>
    %166 = arith.subf %165, %164 : vector<128x64xf32>
    %167 = arith.mulf %138, %166 : vector<128x64xf32>
    %cst_78 = arith.constant 1.000000e+00 : f32
    %168 = vector.broadcast %cst_78 : f32 to vector<128x64xf32>
    %169 = arith.addf %168, %167 : vector<128x64xf32>
    %170 = arith.mulf %131, %169 : vector<128x64xf32>
    %c0_79 = arith.constant 0 : index
    %c0_80 = arith.constant 0 : index
    %c0_81 = arith.constant 0 : index
    %171 = vector.load %arg17[%c0_79, %c0_80, %c0_81] : memref<1x64x32xf32, #tpu.memory_space<vmem>>, vector<1x64x32xf32>
    %172 = vector.shape_cast %171 : vector<1x64x32xf32> to vector<64x32xf32>
    %cst_82 = arith.constant dense<0.000000e+00> : vector<128x32xf32>
    %173 = tpu.matmul %170, %172, %cst_82 {dimension_numbers = #tpu.dot_dimension_numbers<[1], [0], [0], [1], [0, 0, 1, 1], [], []>} : vector<128x64xf32>, vector<64x32xf32>, vector<128x32xf32> -> vector<128x32xf32>
    %c0_83 = arith.constant 0 : index
    %c0_84 = arith.constant 0 : index
    %c0_85 = arith.constant 0 : index
    %174 = vector.load %arg18[%c0_83, %c0_84, %c0_85] : memref<1x1x32xf32, #tpu.memory_space<vmem>>, vector<1x1x32xf32>
    %175 = vector.shape_cast %174 : vector<1x1x32xf32> to vector<1x32xf32>
    %176 = vector.broadcast %175 : vector<1x32xf32> to vector<128x32xf32>
    %177 = arith.addf %173, %176 : vector<128x32xf32>
    %c0_86 = arith.constant 0 : index
    %c0_87 = arith.constant 0 : index
    %c0_88 = arith.constant 0 : index
    %178 = vector.load %arg19[%c0_86, %c0_87, %c0_88] : memref<1x1x32xf32, #tpu.memory_space<vmem>>, vector<1x1x32xf32>
    %179 = vector.shape_cast %178 : vector<1x1x32xf32> to vector<1x32xf32>
    %c0_89 = arith.constant 0 : index
    %c0_90 = arith.constant 0 : index
    %c0_91 = arith.constant 0 : index
    %180 = vector.load %arg20[%c0_89, %c0_90, %c0_91] : memref<1x1x32xf32, #tpu.memory_space<vmem>>, vector<1x1x32xf32>
    %181 = vector.shape_cast %180 : vector<1x1x32xf32> to vector<1x32xf32>
    %182 = vector.broadcast %47 : vector<128x1xf32> to vector<128x32xf32>
    %183 = arith.mulf %177, %182 : vector<128x32xf32>
    %cst_92 = arith.constant dense<0.000000e+00> : vector<32xf32>
    %184 = vector.multi_reduction <add>, %183, %cst_92 [0] : vector<128x32xf32> to vector<32xf32>
    %185 = vector.shape_cast %184 : vector<32xf32> to vector<1x32xf32>
    %186 = arith.mulf %183, %183 : vector<128x32xf32>
    %cst_93 = arith.constant dense<0.000000e+00> : vector<32xf32>
    %187 = vector.multi_reduction <add>, %186, %cst_93 [0] : vector<128x32xf32> to vector<32xf32>
    %188 = vector.shape_cast %187 : vector<32xf32> to vector<1x32xf32>
    %189 = vector.broadcast %49 : f32 to vector<1x32xf32>
    %190 = arith.mulf %185, %189 : vector<1x32xf32>
    %191 = vector.broadcast %49 : f32 to vector<1x32xf32>
    %192 = arith.mulf %188, %191 : vector<1x32xf32>
    %193 = arith.mulf %190, %190 : vector<1x32xf32>
    %194 = arith.subf %192, %193 : vector<1x32xf32>
    %cst_94 = arith.constant 0.000000e+00 : f32
    %195 = vector.broadcast %cst_94 : f32 to vector<1x32xf32>
    %196 = arith.maximumf %194, %195 : vector<1x32xf32>
    %197 = vector.broadcast %190 : vector<1x32xf32> to vector<128x32xf32>
    %198 = arith.subf %177, %197 : vector<128x32xf32>
    %cst_95 = arith.constant 9.99999997E-7 : f32
    %199 = vector.broadcast %cst_95 : f32 to vector<1x32xf32>
    %200 = arith.addf %196, %199 : vector<1x32xf32>
    %201 = math.rsqrt %200 : vector<1x32xf32>
    %202 = vector.broadcast %201 : vector<1x32xf32> to vector<128x32xf32>
    %203 = arith.mulf %198, %202 : vector<128x32xf32>
    %204 = vector.broadcast %179 : vector<1x32xf32> to vector<128x32xf32>
    %205 = arith.mulf %203, %204 : vector<128x32xf32>
    %206 = vector.broadcast %181 : vector<1x32xf32> to vector<128x32xf32>
    %207 = arith.addf %205, %206 : vector<128x32xf32>
    %208 = vector.broadcast %47 : vector<128x1xf32> to vector<128x32xf32>
    %209 = arith.mulf %207, %208 : vector<128x32xf32>
    %c0_96 = arith.constant 0 : index
    %c0_97 = arith.constant 0 : index
    %c0_98 = arith.constant 0 : index
    %210 = vector.load %arg21[%c0_96, %c0_97, %c0_98] : memref<1x32x32xf32, #tpu.memory_space<vmem>>, vector<1x32x32xf32>
    %211 = vector.shape_cast %210 : vector<1x32x32xf32> to vector<32x32xf32>
    %cst_99 = arith.constant dense<0.000000e+00> : vector<128x32xf32>
    %212 = tpu.matmul %41, %211, %cst_99 {dimension_numbers = #tpu.dot_dimension_numbers<[1], [0], [0], [1], [0, 0, 1, 1], [], []>} : vector<128x32xf32>, vector<32x32xf32>, vector<128x32xf32> -> vector<128x32xf32>
    %213 = arith.addf %209, %212 : vector<128x32xf32>
    %214 = vector.broadcast %47 : vector<128x1xf32> to vector<128x32xf32>
    %215 = arith.mulf %213, %214 : vector<128x32xf32>
    %c0_100 = arith.constant 0 : index
    %c0_101 = arith.constant 0 : index
    %216 = vector.load %arg27[%c0_100, %c0_101] : memref<128x32xf32, #tpu.memory_space<vmem>>, vector<128x32xf32>
    tpu.vector_store %arg27[%c0_100, %c0_101], %215 {strides = array<i32>} : memref<128x32xf32, #tpu.memory_space<vmem>>, vector<128x32xf32>,
    %c1_i32 = arith.constant 1 : i32
    %217 = arith.cmpi eq, %arg0, %c1_i32 : i32
    %218 = arith.extui %217 : i1 to i32
    %c0_i32_102 = arith.constant 0 : i32
    %219 = arith.cmpi ne, %218, %c0_i32_102 : i32
    scf.if %219 {
      %c0_103 = arith.constant 0 : index
      %c0_104 = arith.constant 0 : index
      %220 = vector.load %arg22[%c0_103, %c0_104] : memref<32x32xf32, #tpu.memory_space<vmem>>, vector<32x32xf32>
      %cst_105 = arith.constant dense<0.000000e+00> : vector<32x128xf32>
      %221 = tpu.matmul %220, %215, %cst_105 {dimension_numbers = #tpu.dot_dimension_numbers<[1], [1], [0], [0], [0, 0, 1, 0], [], []>} : vector<32x32xf32>, vector<128x32xf32>, vector<32x128xf32> -> vector<32x128xf32>
      %c0_106 = arith.constant 0 : index
      %c0_107 = arith.constant 0 : index
      %222 = vector.load %arg23[%c0_106, %c0_107] : memref<32x1xf32, #tpu.memory_space<vmem>>, vector<32x1xf32>
      %223 = vector.broadcast %222 : vector<32x1xf32> to vector<32x128xf32>
      %224 = arith.addf %221, %223 : vector<32x128xf32>
      %cst_108 = arith.constant 5.000000e-01 : f32
      %225 = vector.broadcast %cst_108 : f32 to vector<32x128xf32>
      %226 = arith.mulf %225, %224 : vector<32x128xf32>
      %cst_109 = arith.constant 0.707106769 : f32
      %227 = vector.broadcast %cst_109 : f32 to vector<32x128xf32>
      %228 = arith.mulf %224, %227 : vector<32x128xf32>
      %cst_110 = arith.constant 0.000000e+00 : f32
      %229 = vector.broadcast %cst_110 : f32 to vector<32x128xf32>
      %230 = arith.cmpf oge, %228, %229 : vector<32x128xf32>
      %cst_111 = arith.constant 1.000000e+00 : f32
      %cst_112 = arith.constant -1.000000e+00 : f32
      %231 = vector.broadcast %cst_111 : f32 to vector<32x128xf32>
      %232 = vector.broadcast %cst_112 : f32 to vector<32x128xf32>
      %233 = arith.select %230, %231, %232 : vector<32x128xi1>, vector<32x128xf32>
      %234 = math.absf %228 : vector<32x128xf32>
      %cst_113 = arith.constant 0.327591091 : f32
      %235 = vector.broadcast %cst_113 : f32 to vector<32x128xf32>
      %236 = arith.mulf %235, %234 : vector<32x128xf32>
      %cst_114 = arith.constant 1.000000e+00 : f32
      %237 = vector.broadcast %cst_114 : f32 to vector<32x128xf32>
      %238 = arith.addf %237, %236 : vector<32x128xf32>
      %cst_115 = arith.constant 1.000000e+00 : f32
      %239 = vector.broadcast %cst_115 : f32 to vector<32x128xf32>
      %240 = arith.divf %239, %238 : vector<32x128xf32>
      %cst_116 = arith.constant 1.06140542 : f32
      %241 = vector.broadcast %cst_116 : f32 to vector<32x128xf32>
      %242 = arith.mulf %241, %240 : vector<32x128xf32>
      %cst_117 = arith.constant -1.45315206 : f32
      %243 = vector.broadcast %cst_117 : f32 to vector<32x128xf32>
      %244 = arith.addf %242, %243 : vector<32x128xf32>
      %245 = arith.mulf %244, %240 : vector<32x128xf32>
      %cst_118 = arith.constant 1.42141378 : f32
      %246 = vector.broadcast %cst_118 : f32 to vector<32x128xf32>
      %247 = arith.addf %245, %246 : vector<32x128xf32>
      %248 = arith.mulf %247, %240 : vector<32x128xf32>
      %cst_119 = arith.constant -0.284496725 : f32
      %249 = vector.broadcast %cst_119 : f32 to vector<32x128xf32>
      %250 = arith.addf %248, %249 : vector<32x128xf32>
      %251 = arith.mulf %250, %240 : vector<32x128xf32>
      %cst_120 = arith.constant 0.254829586 : f32
      %252 = vector.broadcast %cst_120 : f32 to vector<32x128xf32>
      %253 = arith.addf %251, %252 : vector<32x128xf32>
      %254 = arith.mulf %253, %240 : vector<32x128xf32>
      %cst_121 = arith.constant 0.000000e+00 : f32
      %255 = vector.broadcast %cst_121 : f32 to vector<32x128xf32>
      %256 = arith.subf %255, %234 : vector<32x128xf32>
      %257 = arith.mulf %256, %234 : vector<32x128xf32>
      %258 = math.exp %257 : vector<32x128xf32>
      %259 = arith.mulf %254, %258 : vector<32x128xf32>
      %cst_122 = arith.constant 1.000000e+00 : f32
      %260 = vector.broadcast %cst_122 : f32 to vector<32x128xf32>
      %261 = arith.subf %260, %259 : vector<32x128xf32>
      %262 = arith.mulf %233, %261 : vector<32x128xf32>
      %cst_123 = arith.constant 1.000000e+00 : f32
      %263 = vector.broadcast %cst_123 : f32 to vector<32x128xf32>
      %264 = arith.addf %263, %262 : vector<32x128xf32>
      %265 = arith.mulf %226, %264 : vector<32x128xf32>
      %c0_124 = arith.constant 0 : index
      %c0_125 = arith.constant 0 : index
      %266 = vector.load %arg24[%c0_124, %c0_125] : memref<8x32xf32, #tpu.memory_space<vmem>>, vector<8x32xf32>
      %cst_126 = arith.constant dense<0.000000e+00> : vector<8x128xf32>
      %267 = tpu.matmul %266, %265, %cst_126 {dimension_numbers = #tpu.dot_dimension_numbers<[1], [0], [0], [1], [0, 0, 1, 1], [], []>} : vector<8x32xf32>, vector<32x128xf32>, vector<8x128xf32> -> vector<8x128xf32>
      %c0_127 = arith.constant 0 : index
      %c0_128 = arith.constant 0 : index
      %268 = vector.load %arg25[%c0_127, %c0_128] : memref<8x8xf32, #tpu.memory_space<vmem>>, vector<8x8xf32>
      %c0_129 = arith.constant 0 : index
      %c0_130 = arith.constant 0 : index
      %269 = vector.load %arg3[%c0_129, %c0_130] : memref<8x128xf32, #tpu.memory_space<vmem>>, vector<8x128xf32>
      %cst_131 = arith.constant dense<0.000000e+00> : vector<8x128xf32>
      %270 = tpu.matmul %268, %269, %cst_131 {dimension_numbers = #tpu.dot_dimension_numbers<[1], [0], [0], [1], [0, 0, 1, 1], [], []>} : vector<8x8xf32>, vector<8x128xf32>, vector<8x128xf32> -> vector<8x128xf32>
      %271 = arith.addf %267, %270 : vector<8x128xf32>
      %c0_132 = arith.constant 0 : index
      %c0_133 = arith.constant 0 : index
      %272 = vector.load %arg26[%c0_132, %c0_133] : memref<8x128xf32, #tpu.memory_space<vmem>>, vector<8x128xf32>
      tpu.vector_store %arg26[%c0_132, %c0_133], %271 {strides = array<i32>} : memref<8x128xf32, #tpu.memory_space<vmem>>, vector<8x128xf32>,
    } else {
    }
    return
  }
  func.func @transform_0(%arg0: i32, %arg1: memref<2x3xi32, #tpu.memory_space<smem>>) -> (i32, i32) {
    %c0_i32 = arith.constant 0 : i32
    %c0_i32_0 = arith.constant 0 : i32
    %c0_i32_1 = arith.constant 0 : i32
    return %c0_i32, %c0_i32_0 : i32, i32
  }
  func.func @transform_1(%arg0: i32, %arg1: memref<2x3xi32, #tpu.memory_space<smem>>) -> (i32, i32) {
    %c0_i32 = arith.constant 0 : i32
    %c0_i32_0 = arith.constant 0 : i32
    %c0_i32_1 = arith.constant 0 : i32
    return %c0_i32, %c0_i32_0 : i32, i32
  }
  func.func @transform_2(%arg0: i32, %arg1: memref<2x3xi32, #tpu.memory_space<smem>>) -> (i32, i32) {
    %c0_i32 = arith.constant 0 : i32
    %c0_i32_0 = arith.constant 0 : i32
    %c0_i32_1 = arith.constant 0 : i32
    return %c0_i32, %c0_i32_0 : i32, i32
  }
  func.func @transform_3(%arg0: i32, %arg1: memref<2x3xi32, #tpu.memory_space<smem>>) -> (i32, i32) {
    %c0_i32 = arith.constant 0 : i32
    %c0_i32_0 = arith.constant 0 : i32
    %c0_i32_1 = arith.constant 0 : i32
    return %c0_i32, %c0_i32_0 : i32, i32
  }
  func.func @transform_4(%arg0: i32, %arg1: memref<2x3xi32, #tpu.memory_space<smem>>) -> (i32, i32) {
    %c0_i32 = arith.constant 0 : i32
    %c0_i32_0 = arith.constant 0 : i32
    %c0_i32_1 = arith.constant 0 : i32
    return %c0_i32, %c0_i32_0 : i32, i32
  }
  func.func @transform_5(%arg0: i32, %arg1: memref<2x3xi32, #tpu.memory_space<smem>>) -> (i32, i32) {
    %c0_i32 = arith.constant 0 : i32
    %c0_i32_0 = arith.constant 0 : i32
    %c0_i32_1 = arith.constant 0 : i32
    return %c0_i32, %c0_i32_0 : i32, i32
  }
  func.func @transform_6(%arg0: i32, %arg1: memref<2x3xi32, #tpu.memory_space<smem>>) -> (i32, i32) {
    %c0_i32 = arith.constant 0 : i32
    %c0_i32_0 = arith.constant 0 : i32
    %c0_i32_1 = arith.constant 0 : i32
    return %c0_i32, %c0_i32_0 : i32, i32
  }
  func.func @transform_7(%arg0: i32, %arg1: memref<2x3xi32, #tpu.memory_space<smem>>) -> (i32, i32, i32) {
    %c0_i32 = arith.constant 0 : i32
    %c0_i32_0 = arith.constant 0 : i32
    %c0_i32_1 = arith.constant 0 : i32
    return %arg0, %c0_i32, %c0_i32_0 : i32, i32, i32
  }
  func.func @transform_8(%arg0: i32, %arg1: memref<2x3xi32, #tpu.memory_space<smem>>) -> (i32, i32, i32) {
    %c0_i32 = arith.constant 0 : i32
    %c0_i32_0 = arith.constant 0 : i32
    %c0_i32_1 = arith.constant 0 : i32
    return %arg0, %c0_i32, %c0_i32_0 : i32, i32, i32
  }
  func.func @transform_9(%arg0: i32, %arg1: memref<2x3xi32, #tpu.memory_space<smem>>) -> (i32, i32, i32) {
    %c0_i32 = arith.constant 0 : i32
    %c0_i32_0 = arith.constant 0 : i32
    %c0_i32_1 = arith.constant 0 : i32
    return %arg0, %c0_i32, %c0_i32_0 : i32, i32, i32
  }
  func.func @transform_10(%arg0: i32, %arg1: memref<2x3xi32, #tpu.memory_space<smem>>) -> (i32, i32, i32) {
    %c0_i32 = arith.constant 0 : i32
    %c0_i32_0 = arith.constant 0 : i32
    %c0_i32_1 = arith.constant 0 : i32
    return %arg0, %c0_i32, %c0_i32_0 : i32, i32, i32
  }
  func.func @transform_11(%arg0: i32, %arg1: memref<2x3xi32, #tpu.memory_space<smem>>) -> (i32, i32, i32) {
    %c0_i32 = arith.constant 0 : i32
    %c0_i32_0 = arith.constant 0 : i32
    %c0_i32_1 = arith.constant 0 : i32
    return %arg0, %c0_i32, %c0_i32_0 : i32, i32, i32
  }
  func.func @transform_12(%arg0: i32, %arg1: memref<2x3xi32, #tpu.memory_space<smem>>) -> (i32, i32, i32) {
    %c0_i32 = arith.constant 0 : i32
    %c0_i32_0 = arith.constant 0 : i32
    %c0_i32_1 = arith.constant 0 : i32
    return %arg0, %c0_i32, %c0_i32_0 : i32, i32, i32
  }
  func.func @transform_13(%arg0: i32, %arg1: memref<2x3xi32, #tpu.memory_space<smem>>) -> (i32, i32, i32) {
    %c0_i32 = arith.constant 0 : i32
    %c0_i32_0 = arith.constant 0 : i32
    %c0_i32_1 = arith.constant 0 : i32
    return %arg0, %c0_i32, %c0_i32_0 : i32, i32, i32
  }
  func.func @transform_14(%arg0: i32, %arg1: memref<2x3xi32, #tpu.memory_space<smem>>) -> (i32, i32, i32) {
    %c0_i32 = arith.constant 0 : i32
    %c0_i32_0 = arith.constant 0 : i32
    %c0_i32_1 = arith.constant 0 : i32
    return %arg0, %c0_i32, %c0_i32_0 : i32, i32, i32
  }
  func.func @transform_15(%arg0: i32, %arg1: memref<2x3xi32, #tpu.memory_space<smem>>) -> (i32, i32, i32) {
    %c0_i32 = arith.constant 0 : i32
    %c0_i32_0 = arith.constant 0 : i32
    %c0_i32_1 = arith.constant 0 : i32
    return %arg0, %c0_i32, %c0_i32_0 : i32, i32, i32
  }
  func.func @transform_16(%arg0: i32, %arg1: memref<2x3xi32, #tpu.memory_space<smem>>) -> (i32, i32, i32) {
    %c0_i32 = arith.constant 0 : i32
    %c0_i32_0 = arith.constant 0 : i32
    %c0_i32_1 = arith.constant 0 : i32
    return %arg0, %c0_i32, %c0_i32_0 : i32, i32, i32
  }
  func.func @transform_17(%arg0: i32, %arg1: memref<2x3xi32, #tpu.memory_space<smem>>) -> (i32, i32, i32) {
    %c0_i32 = arith.constant 0 : i32
    %c0_i32_0 = arith.constant 0 : i32
    %c0_i32_1 = arith.constant 0 : i32
    return %arg0, %c0_i32, %c0_i32_0 : i32, i32, i32
  }
  func.func @transform_18(%arg0: i32, %arg1: memref<2x3xi32, #tpu.memory_space<smem>>) -> (i32, i32, i32) {
    %c0_i32 = arith.constant 0 : i32
    %c0_i32_0 = arith.constant 0 : i32
    %c0_i32_1 = arith.constant 0 : i32
    return %arg0, %c0_i32, %c0_i32_0 : i32, i32, i32
  }
  func.func @transform_19(%arg0: i32, %arg1: memref<2x3xi32, #tpu.memory_space<smem>>) -> (i32, i32, i32) {
    %c0_i32 = arith.constant 0 : i32
    %c0_i32_0 = arith.constant 0 : i32
    %c0_i32_1 = arith.constant 0 : i32
    return %arg0, %c0_i32, %c0_i32_0 : i32, i32, i32
  }
  func.func @transform_20(%arg0: i32, %arg1: memref<2x3xi32, #tpu.memory_space<smem>>) -> (i32, i32) {
    %c0_i32 = arith.constant 0 : i32
    %c0_i32_0 = arith.constant 0 : i32
    %c0_i32_1 = arith.constant 0 : i32
    return %c0_i32, %c0_i32_0 : i32, i32
  }
  func.func @transform_21(%arg0: i32, %arg1: memref<2x3xi32, #tpu.memory_space<smem>>) -> (i32, i32) {
    %c0_i32 = arith.constant 0 : i32
    %c0_i32_0 = arith.constant 0 : i32
    %c0_i32_1 = arith.constant 0 : i32
    return %c0_i32, %c0_i32_0 : i32, i32
  }
  func.func @transform_22(%arg0: i32, %arg1: memref<2x3xi32, #tpu.memory_space<smem>>) -> (i32, i32) {
    %c0_i32 = arith.constant 0 : i32
    %c0_i32_0 = arith.constant 0 : i32
    %c0_i32_1 = arith.constant 0 : i32
    return %c0_i32, %c0_i32_0 : i32, i32
  }
  func.func @transform_23(%arg0: i32, %arg1: memref<2x3xi32, #tpu.memory_space<smem>>) -> (i32, i32) {
    %c0_i32 = arith.constant 0 : i32
    %c0_i32_0 = arith.constant 0 : i32
    %c0_i32_1 = arith.constant 0 : i32
    return %c0_i32, %c0_i32_0 : i32, i32
  }
  func.func @transform_24(%arg0: i32, %arg1: memref<2x3xi32, #tpu.memory_space<smem>>) -> (i32, i32) {
    %c0_i32 = arith.constant 0 : i32
    %c0_i32_0 = arith.constant 0 : i32
    %c0_i32_1 = arith.constant 0 : i32
    return %c0_i32, %c0_i32_0 : i32, i32
  }
}

</mosaic_0001>

<bundles_post_ra>
// kernel: _lambda_.1
= control target key start
LH: loop header
LB: loop body
LE: loop exit
PB: predicated region body
PF: predicated region fallthrough
CT: control target
= control target key end

     0   :  { %s9219_s0 = inlined_call_operand.vmem [shape: s32[2,3], index: 0, kind: input, shape index: {}]   ;;  %s9220_s1 = inlined_call_operand.vmem [shape: f32[128,8], index: 1, kind: input, shape index: {}]   ;;  %s9221_s2 = inlined_call_operand.vmem [shape: f32[8,128], index: 2, kind: input, shape index: {}]   ;;  %s9222_s3 = inlined_call_operand.vmem [shape: f32[8,32], index: 3, kind: input, shape index: {}]   ;;  %s9223_s4 = inlined_call_operand.vmem [shape: f32[1,32], index: 4, kind: input, shape index: {}]   ;;  %s9224_s5 = inlined_call_operand.vmem [shape: f32[32,32], index: 5, kind: input, shape index: {}]   ;;  %s9225_s6 = inlined_call_operand.vmem [shape: f32[32,128], index: 6, kind: input, shape index: {}]   ;;  %s9226_s7 = inlined_call_operand.vmem [shape: f32[64,128], index: 7, kind: input, shape index: {}]   ;;  %s9227_s8 = inlined_call_operand.vmem [shape: f32[2,64,128], index: 8, kind: input, shape index: {}]   ;;  %s9228_s9 = inlined_call_operand.vmem [shape: f32[2,128,64], index: 9, kind: input, shape index: {}]   ;;  %s9229_s10 = inlined_call_operand.vmem [shape: f32[2,128,32], index: 10, kind: input, shape index: {}]   ;;  %s9230_s11 = inlined_call_operand.vmem [shape: f32[2,128,32], index: 11, kind: input, shape index: {}]   ;;  %s9231_s12 = inlined_call_operand.vmem [shape: f32[2,1,32], index: 12, kind: input, shape index: {}]   ;;  %s9232_s13 = inlined_call_operand.vmem [shape: f32[2,1,32], index: 13, kind: input, shape index: {}]   ;;  %s9233_s14 = inlined_call_operand.vmem [shape: f32[2,32,64], index: 14, kind: input, shape index: {}]   ;;  %s9234_s15 = inlined_call_operand.vmem [shape: f32[2,1,64], index: 15, kind: input, shape index: {}]   ;;  %s9235_s16 = inlined_call_operand.vmem [shape: f32[2,64,32], index: 16, kind: input, shape index: {}]   ;;  %s9236_s17 = inlined_call_operand.vmem [shape: f32[2,1,32], index: 17, kind: input, shape index: {}]   ;;  %s9237_s18 = inlined_call_operand.vmem [shape: f32[2,1,32], index: 18, kind: input, shape index: {}]   ;;  %s9238_s19 = inlined_call_operand.vmem [shape: f32[2,1,32], index: 19, kind: input, shape index: {}]   ;;  %s9239_s20 = inlined_call_operand.vmem [shape: f32[2,32,32], index: 20, kind: input, shape index: {}]   ;;  %s9240_s21 = inlined_call_operand.vmem [shape: f32[32,32], index: 21, kind: input, shape index: {}]   ;;  %s9241_s22 = inlined_call_operand.vmem [shape: f32[32,1], index: 22, kind: input, shape index: {}]   ;;  %s9242_s23 = inlined_call_operand.vmem [shape: f32[8,32], index: 23, kind: input, shape index: {}]   ;;  %s9243_s24 = inlined_call_operand.vmem [shape: f32[8,8], index: 24, kind: input, shape index: {}]   ;;  %s9244_s25 = inlined_call_operand.vmem [shape: f32[8,128], index: 25, kind: output, shape index: {}]  }
   0x1   :  { %9301 = sst [smem:[#allocation31_spill]] %s9219_s0 }
   0x2   :  { %9302 = sst [smem:[#allocation32_spill]] %s9220_s1 }
   0x3   :  { %9303 = sst [smem:[#allocation33_spill]] %s9221_s2 }
   0x4   :  { %9304 = sst [smem:[#allocation34_spill]] %s9222_s3 }
   0x5   :  { %9305 = sst [smem:[#allocation35_spill]] %s9223_s4 }
   0x6   :  { %9306 = sst [smem:[#allocation36_spill]] %s9224_s5 }
   0x7   :  { %9307 = sst [smem:[#allocation37_spill]] %s9225_s6 }
   0x8   :  { %9308 = sst [smem:[#allocation38_spill]] %s9226_s7 }
   0x9   :  { %9309 = sst [smem:[#allocation39_spill]] %s9227_s8 }
   0xa   :  { %9310 = sst [smem:[#allocation40_spill]] %s9228_s9 }
   0xb   :  { %9311 = sst [smem:[#allocation41_spill]] %s9229_s10 }
   0xc   :  { %9312 = sst [smem:[#allocation42_spill]] %s9230_s11 }
   0xd   :  { %9313 = sst [smem:[#allocation43_spill]] %s9233_s14 }
   0xe   :  { %9314 = sst [smem:[#allocation44_spill]] %s9234_s15 }
   0xf   :  { %9315 = sst [smem:[#allocation45_spill]] %s9238_s19 }
  0x10   :  { %9316 = sst [smem:[#allocation46_spill]] %s9240_s21 }
  0x11   :  { %9317 = sst [smem:[#allocation47_spill]] %s9241_s22 }
  0x12   :  { %9318 = sst [smem:[#allocation48_spill]] %s9242_s23 }
  0x13   :  { %9319 = sst [smem:[#allocation49_spill]] %s9243_s24 }
  0x14   :  { %9320 = sst [smem:[#allocation50_spill]] %s9244_s25 }
  0x15   :  { %s9321_s6 = sld [smem:[#allocation31_spill]] }
  0x1b   :  { %s30_s19 = sshll.u32 %s9321_s6, 4  ;;  %s31_s19 = int_to_ptr.vmem [resolvable:$true] %s30_s19 }
  0x1c   :  { %s6585_s30 = scalar_lea.vmem %s31_s19, 32  ;;  %p6590_p1 = scmp.lt.s32.totalorder %s31_s19, %s31_s19 }
  0x1d   :  { %p6586_p0 = scmp.ne.s32.totalorder %s31_s19, %s6585_s30  ;;  %p6591_p2 = scmp.lt.s32.totalorder %s6585_s30, %s6585_s30 }
  0x1f   :  { %p6592_p3 = por %p6591_p2, %p6590_p1 }
  0x21   :  { %p6593_p4 = pnand %p6592_p3, %p6586_p0 }
  0x23   :  { %6596 = shalt.err (!%p6593_p4)  }
  0x24   :  { %s6607_s7 = smov [#allocation4]  }
  0x25   :  { %33 = dma.vmem_to_smem %s31_s19, 32, %s6607_s7, [#allocation3] }
  0x26   :  { %6601 = dma.done.wait [#allocation3], 32 }
  0x27   :  { %6602 = vsyncadd [#allocation3], 4294967264 }
  0x28   :  { %35 = sfence }
  0x29   :  { %s6749_s3 = smov 0  }
  0x2a LB: > { %9322 = sst [smem:[#allocation6_spill]] %s6605_s3  ;;  %s6755_s26 = sadd.s32 4294967295, %s6605_s3   ;;  %s6605_s3 = sphi %s6749_s3, %s41_s3  }
  0x2b   : > { %p5409_p5 = scmp.ge.s32.totalorder %s6605_s3, 1  ;;  %p772_p6 = scmp.lt.s32.totalorder %s6605_s3, 3 }
  0x2d   : > { %p773_p7 = pnand %p5409_p5, %p772_p6 }
  0x2f   : > { %776 = sbr.rel (%p773_p7) target bundleno = 2695 (0xa87), region = 116 }
  0x34   : > { %p881_p8 = scmp.lt.s32.totalorder %s6755_s26, 1  ;;  %v934_v0 = vlaneseq  ;;  %s9328_s28 = sld [smem:[#allocation39_spill]] }
  0x35   : > { %s9329_s29 = sld [smem:[#allocation40_spill]]  ;;  %p5424_p9 = scmp.ne.s32.totalorder %s6755_s26, 0 }
  0x36   : > { %s6761_s19 = scalar_select %p881_p8, %s6755_s26, 1  ;;  %v6763_v1 = vshrl.u32 %v934_v0, 7 }
  0x37   : > { %s9334_s10 = sld [smem:[#allocation41_spill]] }
  0x38   : > { %9323 = vst [vmem:[#allocation7_spill] sm:$0xff] %v6763_v1  ;;  %s5611_s1 = sshll.u32 %s6761_s19, 6  ;;  %s5612_s8 = sshll.u32 %s6761_s19, 7  ;;  %v6768_v2 = vadd.s32 8, %v6763_v1  ;;  %v6771_v3 = vadd.s32 16, %v6763_v1  ;;  %v6774_v4 = vadd.s32 24, %v6763_v1 }
  0x39   : > { %v6777_v5 = vadd.s32 32, %v6763_v1  ;;  %v6790_v6 = vadd.s32 40, %v6763_v1  ;;  %v6793_v7 = vadd.s32 48, %v6763_v1  ;;  %v6796_v8 = vadd.s32 56, %v6763_v1  ;;  %s9335_s11 = sld [smem:[#allocation42_spill]]  ;;  %s5615_s27 = sshll.u32 %s6761_s19, 5 }
  0x3a   : > { %9324 = vst [vmem:[#allocation8_spill] sm:$0xff] %v6768_v2  ;;  %9325 = vst [vmem:[#allocation9_spill] sm:$0xff] %v6771_v3  ;;  %s6782_s9 = scalar_lea.vmem %s9328_s28, %s5611_s1  ;;  %v6799_v9 = vadd.s32 64, %v6763_v1  ;;  %v6812_v10 = vadd.s32 72, %v6763_v1  ;;  %v6815_v11 = vadd.s32 80, %v6763_v1  ;;  %v6818_v12 = vadd.s32 88, %v6763_v1  ;;  %s6853_s30 = scalar_lea.vmem %s9235_s16, %s5611_s1 }
  0x3b   : > { %9326 = vst [vmem:[#allocation10_spill] sm:$0xff] %v6774_v4  ;;  %9327 = vst [vmem:[#allocation11_spill] sm:$0xff] %v6777_v5  ;;  %s6787_s2 = scalar_lea.vmem %s9329_s29, %s5612_s8  ;;  %v6821_v13 = vadd.s32 96, %v6763_v1  ;;  %v6832_v14 = vadd.s32 104, %v6763_v1  ;;  %v6835_v15 = vadd.s32 112, %v6763_v1  ;;  %v6838_v16 = vadd.s32 120, %v6763_v1  ;;  %s922_s23 = scalar_lea.vmem %s9236_s17, %s6761_s19 }
  0x3c   : > { %9330 = vst [vmem:[#allocation12_spill] sm:$0xff] %v6790_v6  ;;  %9331 = vst [vmem:[#allocation13_spill] sm:$0xff] %v6793_v7  ;;  %s9344_s14 = sld [smem:[#allocation43_spill]]  ;;  %s925_s21 = scalar_lea.vmem %s9237_s18, %s6761_s19 }
  0x3d   : > { %9332 = vst [vmem:[#allocation14_spill] sm:$0xff] %v6796_v8  ;;  %9333 = vst [vmem:[#allocation15_spill] sm:$0xff] %v6799_v9  ;;  %s6804_s7 = scalar_lea.vmem %s9334_s10, %s5612_s8 }
  0x3e   : > { %9336 = vst [vmem:[#allocation16_spill] sm:$0xff] %v6812_v10  ;;  %9337 = vst [vmem:[#allocation17_spill] sm:$0xff] %v6815_v11 }
  0x3f   : > { %s6809_s28 = scalar_lea.vmem %s9335_s11, %s5612_s8  ;;  %9338 = vst [vmem:[#allocation18_spill] sm:$0xff] %v6818_v12  ;;  %9339 = vst [vmem:[#allocation19_spill] sm:$0xff] %v6821_v13  ;;  %s9345_s11 = sld [smem:[#allocation45_spill]] }
  0x40   : > { %9340 = vst [vmem:[#allocation20_spill] sm:$0xff] %v6832_v14  ;;  %9341 = vst [vmem:[#allocation21_spill] sm:$0xff] %v6835_v15 }
  0x41   : > { %9342 = vst [vmem:[#allocation22_spill] sm:$0xff] %v6838_v16  ;;  %954 = sbr.rel (%p5424_p9) target bundleno = 598 (0x256), region = 120 }
  0x42   : > { %s6848_s29 = scalar_lea.vmem %s9344_s14, %s5615_s27  ;;  %s6870_s14 = scalar_lea.vmem %s9239_s20, %s5615_s27 }
  0x45   : > { %s928_s15 = scalar_lea.vmem %s9345_s11, %s6761_s19 }
  0x46   : > { %s9346_s25 = sld [smem:[#allocation34_spill]]  ;;  %vm979_vm0 = vcmask 64512   ;;  %vm1609_vm10 = vcmask 261120  }
  0x47   : > { %s9347_s22 = sld [smem:[#allocation32_spill]] }
  0x48   : > { %s9348_s6 = sld [smem:[#allocation36_spill]] }
  0x49   : > { %s9349_s5 = sld [smem:[#allocation35_spill]] }
  0x4a   : > { %s5458_s0 = sld [smem:[#allocation4 + $0x2]] }
  0x4c   : > { %v971_v17 = vld [vmem:[%s9346_s25] sm:$0xff] }
  0x4d   : > { %v955_v18 = vld [vmem:[%s9347_s22] sm:$0xff]  ;;  %v956_v19 = vld [vmem:[%s9347_s22 + $0x8] sm:$0xff]  ;;  %5878 = vmatprep.subr.mxu0 %v971_v17  ;;  %v957_v20 = vld [vmem:[%s9347_s22 + $0x10] sm:$0xff] }
  0x4e   : > { %5880 = vmatprep.mubr.msk.f32.mxu0 %vm979_vm0, %v955_v18  ;;  %5879 = vmatpush3.msra.mxu0 %v971_v17  ;;  %v958_v21 = vld [vmem:[%s9347_s22 + $0x18] sm:$0xff]  ;;  %v959_v22 = vld [vmem:[%s9347_s22 + $0x20] sm:$0xff]  ;;  %v960_v23 = vld [vmem:[%s9347_s22 + $0x28] sm:$0xff] }
  0x4f   : > { %5881 = vmatmul.mubr.msk.f32.vlgmr.msra.gmra.mxu0 %vm979_vm0, %v956_v19  ;;  %v961_v24 = vld [vmem:[%s9347_s22 + $0x30] sm:$0xff]  ;;  %v962_v25 = vld [vmem:[%s9347_s22 + $0x38] sm:$0xff]  ;;  %v963_v26 = vld [vmem:[%s9347_s22 + $0x40] sm:$0xff] }
  0x50   : > { %5883 = vmatprep.mubr.msk.f32.mxu0 %vm979_vm0, %v957_v20  ;;  %v964_v27 = vld [vmem:[%s9347_s22 + $0x48] sm:$0xff]  ;;  %v965_v28 = vld [vmem:[%s9347_s22 + $0x50] sm:$0xff]  ;;  %v966_v29 = vld [vmem:[%s9347_s22 + $0x58] sm:$0xff] }
  0x51   : > { %v967_v30 = vld [vmem:[%s9347_s22 + $0x60] sm:$0xff]  ;;  %v968_v31 = vld [vmem:[%s9347_s22 + $0x68] sm:$0xff]  ;;  %v969_v32 = vld [vmem:[%s9347_s22 + $0x70] sm:$0xff] }
  0x52   : > { %v970_v33 = vld [vmem:[%s9347_s22 + $0x78] sm:$0xff]  ;;  %v1607_v35 = vld [vmem:[%s9348_s6 + $0x10] sm:$0xff]  ;;  %v1606_v36 = vld [vmem:[%s9348_s6 + $0x8] sm:$0xff] }
  0x53   : > { %5884 = vmatmul.mubr.msk.f32.gmra.mxu0 %vm979_vm0, %v958_v21  ;;  %v1608_v34 = vld [vmem:[%s9348_s6 + $0x18] sm:$0xff]  ;;  %v1605_v37 = vld [vmem:[%s9348_s6] sm:$0xff] }
  0x54   : > { %5886 = vmatprep.mubr.msk.f32.mxu0 %vm979_vm0, %v959_v22  ;;  %5904 = vmatprep.subr.mxu1 %v1608_v34  ;;  %v6955_v38 = vld [vmem:[%s9349_s5] ss:$0 sm:$0xff] }
  0x55   : > { %5905 = vmatpush3.msra.mxu1 %v1608_v34 }
  0x56   : > { %5906 = vmatprep.subr.mxu1 %v1607_v35 }
  0x57   : > { %5887 = vmatmul.mubr.msk.f32.gmra.mxu0 %vm979_vm0, %v960_v23  ;;  %5907 = vmatpush3.msra.mxu1 %v1607_v35 }
  0x58   : > { %5889 = vmatprep.mubr.msk.f32.mxu0 %vm979_vm0, %v961_v24  ;;  %5908 = vmatprep.subr.mxu1 %v1606_v36 }
  0x59   : > { %5909 = vmatpush3.msra.mxu1 %v1606_v36 }
  0x5a   : > { %5910 = vmatprep.subr.mxu1 %v1605_v37 }
  0x5b   : > { %5890 = vmatmul.mubr.msk.f32.gmra.mxu0 %vm979_vm0, %v962_v25  ;;  %5911 = vmatpush3.msra.mxu1 %v1605_v37 }
  0x5c   : > { %5892 = vmatprep.mubr.msk.f32.mxu0 %vm979_vm0, %v963_v26 }
  0x5f   : > { %5893 = vmatmul.mubr.msk.f32.gmra.mxu0 %vm979_vm0, %v964_v27 }
  0x60   : > { %5895 = vmatprep.mubr.msk.f32.mxu0 %vm979_vm0, %v965_v28 }
  0x63   : > { %5896 = vmatmul.mubr.msk.f32.gmra.mxu0 %vm979_vm0, %v966_v29 }
  0x64   : > { %5898 = vmatprep.mubr.msk.f32.mxu0 %vm979_vm0, %v967_v30 }
  0x67   : > { %5899 = vmatmul.mubr.msk.f32.gmra.mxu0 %vm979_vm0, %v968_v31 }
  0x68   : > { %5901 = vmatprep.mubr.msk.f32.mxu0 %vm979_vm0, %v969_v32 }
  0x6b   : > { %5902 = vmatmul.mubr.msk.f32.gmra.mxu0 %vm979_vm0, %v970_v33 }
 0x10f   : > { %v5882_v39 = vpop.f32.mrf.mxu0 }
 0x110   : > { %v6958_v40 = vadd.f32 %v5882_v39, %v6955_v38 }
 0x111   : > { %v1094_v41 = vpop.f32.mrf.mxu0 }
 0x112   : > { %v6961_v42 = vmul.f32 0.70710677, %v6958_v40  ;;  %v1095_v27 = vadd.f32 %v6955_v38, %v1094_v41 }
 0x113   : > { %v5885_v43 = vpop.f32.mrf.mxu0 }
 0x114   : > { %v1238_v44 = vand.u32 2147483647, %v6961_v42  ;;  %v6965_v45 = vadd.f32 %v5885_v43, %v6955_v38  ;;  %v1189_v31 = vmul.f32 0.70710677, %v1095_v27  ;;  %vm1206_vm1 = vcmp.ge.f32.partialorder %v6961_v42, 0.0 }
 0x115   : > { %v1104_v46 = vpop.f32.mrf.mxu0  ;;  %v7049_v42 = vmul.f32 0.5, %v1095_v27 }
 0x116   : > { %v6968_v47 = vmul.f32 0.70710677, %v6965_v45  ;;  %v6971_v48 = vadd.f32 %v6955_v38, %v1104_v46  ;;  %v1254_v50 = vmul.f32 0.3275911, %v1238_v44  ;;  %v1237_v37 = vand.u32 2147483647, %v1189_v31 }
 0x117   : > { %v5888_v49 = vpop.f32.mrf.mxu0  ;;  %vm1205_vm2 = vcmp.ge.f32.partialorder %v1189_v31, 0.0 }
 0x118   : > { %v6974_v51 = vand.u32 2147483647, %v6968_v47  ;;  %v6977_v52 = vmul.f32 0.70710677, %v6971_v48  ;;  %v1270_v54 = vadd.f32 1.0, %v1254_v50  ;;  %v6984_v57 = vadd.f32 %v5888_v49, %v6955_v38 }
 0x119   : > { %v1114_v53 = vpop.f32.mrf.mxu0  ;;  %v1462_v49 = vsub.f32 0.0, %v1238_v44  ;;  %vm1208_vm3 = vcmp.ge.f32.partialorder %v6968_v47, 0.0  ;;  %v7082_v16 = vmul.f32 0.5, %v6971_v48 }
 0x11a   : > { %v1256_v55 = vmul.f32 0.3275911, %v6974_v51  ;;  %v6981_v56 = vand.u32 2147483647, %v6977_v52  ;;  %v6988_v59 = vadd.f32 %v6955_v38, %v1114_v53  ;;  %v6991_v61 = vmul.f32 0.70710677, %v6984_v57 }
 0x11b   : > { %v5891_v60 = vpop.f32.mrf.mxu0  ;;  %6353 = vrcp.f32 %v1270_v54  ;;  %v1461_v54 = vsub.f32 0.0, %v1237_v37  ;;  %vm1207_vm4 = vcmp.ge.f32.partialorder %v6977_v52, 0.0 }
 0x11c   : > { %v1255_v58 = vmul.f32 0.3275911, %v6981_v56  ;;  %v1272_v62 = vadd.f32 1.0, %v1256_v55  ;;  %v6994_v0 = vmul.f32 0.70710677, %v6988_v59  ;;  %v7000_v18 = vadd.f32 %v5891_v60, %v6955_v38 }
 0x11d   : > { %v6997_v17 = vand.u32 2147483647, %v6991_v61  ;;  %v1124_v19 = vpop.f32.mrf.mxu0  ;;  %v7108_v12 = vmul.f32 0.5, %v6988_v59  ;;  %vm1210_vm5 = vcmp.ge.f32.partialorder %v6991_v61, 0.0 }
 0x11e   : > { %v1271_v63 = vadd.f32 1.0, %v1255_v58  ;;  %v7004_v21 = vand.u32 2147483647, %v6994_v0  ;;  %v7007_v22 = vmul.f32 0.70710677, %v7000_v18  ;;  %v7011_v25 = vadd.f32 %v6955_v38, %v1124_v19 }
 0x11f   : > { %v1258_v20 = vmul.f32 0.3275911, %v6997_v17  ;;  %v5894_v32 = vpop.f32.mrf.mxu0  ;;  %v1478_v19 = vmul.f32 %v1462_v49, %v1238_v44  ;;  %vm1209_vm6 = vcmp.ge.f32.partialorder %v6994_v0, 0.0 }
 0x120   : > { %6355 = vrcp.f32 %v1271_v63  ;;  %v1257_v24 = vmul.f32 0.3275911, %v7004_v21  ;;  %v7014_v26 = vand.u32 2147483647, %v7007_v22  ;;  %v7018_v29 = vmul.f32 0.70710677, %v7011_v25 }
 0x121   : > { %6357 = vrcp.f32 %v1272_v62  ;;  %v1274_v23 = vadd.f32 1.0, %v1258_v20  ;;  %v1134_v43 = vpop.f32.mrf.mxu0  ;;  %v7034_v53 = vadd.f32 %v5894_v32, %v6955_v38  ;;  %v7042_v63 = vmul.f32 0.5, %v6958_v40 }
 0x122   : > { %v1273_v28 = vadd.f32 1.0, %v1257_v24  ;;  %v1260_v30 = vmul.f32 0.3275911, %v7014_v26  ;;  %v7024_v34 = vand.u32 2147483647, %v7018_v29  ;;  %v7038_v55 = vadd.f32 %v6955_v38, %v1134_v43 }
 0x123   : > { %6359 = vrcp.f32 %v1274_v23  ;;  %v9252_v24 = vmov -1.0   ;;  %v7052_v32 = vmul.f32 0.70710677, %v7034_v53  ;;  %v1495_v49 = vmul.f32 1.442695, %v1478_v19  ;;  %v5897_v14 = vpop.f32.mrf.mxu0 }
 0x124   : > { %6361 = vrcp.f32 %v1273_v28  ;;  %v1276_v35 = vadd.f32 1.0, %v1260_v30  ;;  %v1259_v50 = vmul.f32 0.3275911, %v7024_v34  ;;  %v7047_v28 = vsel %vm1206_vm1, 1.0, %v9252_v24 }
 0x125   : > { %v1253_v30 = vmul.f32 0.3275911, %v1237_v37  ;;  %v7056_v40 = vmul.f32 0.70710677, %v7038_v55  ;;  %v7069_v15 = vand.u32 2147483647, %v7052_v32 }
 0x126   : > { %6363 = vrcp.f32 %v1276_v35  ;;  %v1275_v20 = vadd.f32 1.0, %v1259_v50  ;;  %v1477_v35 = vmul.f32 %v1461_v54, %v1237_v37  ;;  %v1463_v50 = vsub.f32 0.0, %v6981_v56 }
 0x127   : > { %v1269_v54 = vadd.f32 1.0, %v1253_v30  ;;  %v7078_v19 = vand.u32 2147483647, %v7056_v40  ;;  %v1262_v48 = vmul.f32 0.3275911, %v7069_v15  ;;  %v1468_v10 = vsub.f32 0.0, %v7014_v26 }
 0x128   : > { %v7021_v33 = vpop.eup %6353  ;;  %6365 = vrcp.f32 %v1275_v20  ;;  %v1479_v31 = vmul.f32 %v1463_v50, %v6981_v56  ;;  %vm1212_vm7 = vcmp.ge.f32.partialorder %v7007_v22, 0.0  ;;  %vm1211_vm8 = vcmp.ge.f32.partialorder %v7018_v29, 0.0 }
 0x129   : > { %v1318_v39 = vmul.f32 1.0614054, %v7021_v33  ;;  %6367 = vpow2.f32 %v1495_v49  ;;  %v1261_v56 = vmul.f32 0.3275911, %v7078_v19  ;;  %v7104_v49 = vmul.f32 0.5, %v6984_v57 }
 0x12a   : > { %6369 = vrcp.f32 %v1269_v54  ;;  %v1497_v50 = vmul.f32 1.442695, %v1479_v31  ;;  %v1465_v31 = vsub.f32 0.0, %v7004_v21  ;;  %vm1213_vm9 = vcmp.ge.f32.partialorder %v7056_v40, 0.0 }
 0x12b   : > { %v1334_v58 = vadd.f32 -1.4531521, %v1318_v39  ;;  %v1464_v39 = vsub.f32 0.0, %v6974_v51  ;;  %vm1214_vm11 = vcmp.ge.f32.partialorder %v7052_v32, 0.0 }
 0x12d   : > { %v7026_v36 = vpop.eup %6355  ;;  %v1350_v44 = vmul.f32 %v7021_v33, %v1334_v58  ;;  %v9350_v58 = vmov -1.0  }
 0x12e   : > { %v1319_v41 = vmul.f32 1.0614054, %v7026_v36  ;;  %v7030_v46 = vpop.eup %6357  ;;  %v7092_v52 = vsel %vm1207_vm4, 1.0, %v9350_v58  ;;  %v7120_v61 = vsel %vm1210_vm5, 1.0, %v9350_v58 }
 0x12f   : > { %v1320_v60 = vmul.f32 1.0614054, %v7030_v46  ;;  %v1366_v20 = vadd.f32 1.4214138, %v1350_v44 }
 0x130   : > { %v1335_v62 = vadd.f32 -1.4531521, %v1319_v41  ;;  %v7044_v23 = vpop.eup %6359  ;;  %v7060_v41 = vmul.f32 0.5, %v6965_v45  ;;  %v7073_v45 = vsel %vm1205_vm2, 1.0, %v9350_v58 }
 0x131   : > { %v1336_v43 = vadd.f32 -1.4531521, %v1320_v60  ;;  %v1322_v24 = vmul.f32 1.0614054, %v7044_v23  ;;  %v7065_v37 = vpop.eup %6361  ;;  %v1493_v60 = vmul.f32 1.442695, %v1477_v35 }
 0x132   : > { %v1351_v27 = vmul.f32 %v7026_v36, %v1335_v62  ;;  %v1480_v62 = vmul.f32 %v1464_v39, %v6974_v51  ;;  %v1321_v35 = vmul.f32 1.0614054, %v7065_v37  ;;  %v7089_v51 = vsel %vm1208_vm3, 1.0, %v9350_v58 }
 0x133   : > { %v1352_v30 = vmul.f32 %v7030_v46, %v1336_v43  ;;  %v1338_v11 = vadd.f32 -1.4531521, %v1322_v24  ;;  %v7095_v39 = vpop.eup %6363  ;;  %6371 = vpow2.f32 %v1493_v60  ;;  %v7099_v24 = vadd.f32 %v5897_v14, %v6955_v38 }
 0x134   : > { %v1367_v13 = vadd.f32 1.4214138, %v1351_v27  ;;  %v1499_v44 = vmul.f32 1.442695, %v1480_v62  ;;  %v1382_v43 = vmul.f32 %v7021_v33, %v1366_v20  ;;  %v1337_v60 = vadd.f32 -1.4531521, %v1321_v35 }
 0x135   : > { %9351 = vst [vmem:[#allocation23_spill] sm:$0xff] %v7099_v24  ;;  %v1368_v27 = vadd.f32 1.4214138, %v1352_v30  ;;  %v1354_v54 = vmul.f32 %v7044_v23, %v1338_v11  ;;  %v1466_v14 = vsub.f32 0.0, %v6997_v17  ;;  %v1324_v62 = vmul.f32 1.0614054, %v7095_v39 }
 0x136   : > { %v1383_v47 = vmul.f32 %v7026_v36, %v1367_v13  ;;  %v1278_v20 = vadd.f32 1.0, %v1262_v48  ;;  %6373 = vpow2.f32 %v1499_v44  ;;  %v1277_v13 = vadd.f32 1.0, %v1261_v56  ;;  %v7123_v44 = vpop.eup %6365 }
 0x137   : > { %v7115_v57 = vmul.f32 0.70710677, %v7099_v24  ;;  %v1398_v30 = vadd.f32 -0.28449672, %v1382_v43  ;;  %v1384_v11 = vmul.f32 %v7030_v46, %v1368_v27  ;;  %6375 = vpow2.f32 %v1497_v50  ;;  %v6368_v7 = vpop.eup %6367 }
 0x138   : > { %v1399_v59 = vadd.f32 -0.28449672, %v1383_v47  ;;  %v1370_v35 = vadd.f32 1.4214138, %v1354_v54  ;;  %v1353_v48 = vmul.f32 %v7065_v37, %v1337_v60  ;;  %v1482_v56 = vmul.f32 %v1466_v14, %v6997_v17 }
 0x139   : > { %v1340_v9 = vadd.f32 -1.4531521, %v1324_v62  ;;  %6377 = vrcp.f32 %v1278_v20  ;;  %v7130_v43 = vsel %vm1209_vm6, 1.0, %v9350_v58  ;;  %v1467_v27 = vsub.f32 0.0, %v7024_v34 }
 0x13a   : > { %6379 = vrcp.f32 %v1277_v13  ;;  %v7134_v47 = vand.u32 2147483647, %v7115_v57  ;;  %v1414_v50 = vmul.f32 %v7021_v33, %v1398_v30  ;;  %v1400_v54 = vadd.f32 -0.28449672, %v1384_v11  ;;  %v1144_v11 = vpop.f32.mrf.mxu0 }
 0x13b   : > { %v1415_v17 = vmul.f32 %v7026_v36, %v1399_v59  ;;  %v1481_v60 = vmul.f32 %v1465_v31, %v7004_v21  ;;  %v1386_v14 = vmul.f32 %v7044_v23, %v1370_v35  ;;  %v1369_v62 = vadd.f32 1.4214138, %v1353_v48  ;;  %v7147_v59 = vpop.eup %6369 }
 0x13c   : > { %v1323_v0 = vmul.f32 1.0614054, %v7123_v44  ;;  %v1264_v20 = vmul.f32 0.3275911, %v7134_v47  ;;  %v1503_v8 = vmul.f32 1.442695, %v1482_v56  ;;  %v1356_v5 = vmul.f32 %v7095_v39, %v1340_v9 }
 0x13d   : > { %v7143_v13 = vmul.f32 0.5, %v7000_v18  ;;  %v1484_v30 = vmul.f32 %v1468_v10, %v7014_v26  ;;  %v7151_v21 = vmul.f32 0.5, %v7011_v25  ;;  %v1483_v31 = vmul.f32 %v1467_v27, %v7024_v34 }
 0x13e   : > { %v1280_v35 = vadd.f32 1.0, %v1264_v20  ;;  %v1430_v56 = vadd.f32 0.2548296, %v1414_v50  ;;  %v1416_v18 = vmul.f32 %v7030_v46, %v1400_v54  ;;  %v1431_v6 = vadd.f32 0.2548296, %v1415_v17  ;;  %v5900_v54 = vpop.f32.mrf.mxu0 }
 0x13f   : > { %v1501_v9 = vmul.f32 1.442695, %v1481_v60  ;;  %v1402_v3 = vadd.f32 -0.28449672, %v1386_v14  ;;  %v1385_v10 = vmul.f32 %v7065_v37, %v1369_v62  ;;  %v1339_v26 = vadd.f32 -1.4531521, %v1323_v0 }
 0x140   : > { %v7154_v48 = vpop.eup %6371  ;;  %v7159_v4 = vadd.f32 %v6955_v38, %v1144_v11  ;;  %6381 = vpow2.f32 %v1503_v8  ;;  %v1372_v25 = vadd.f32 1.4214138, %v1356_v5  ;;  %v1507_v1 = vmul.f32 1.442695, %v1484_v30 }
 0x141   : > { %v1470_v34 = vsub.f32 0.0, %v7069_v15  ;;  %v7165_v27 = vsel %vm1212_vm7, 1.0, %v9350_v58  ;;  %v1505_v50 = vmul.f32 1.442695, %v1483_v31  ;;  %6383 = vrcp.f32 %v1280_v35  ;;  %v1154_v35 = vpop.f32.mrf.mxu0 }
 0x142   : > { %9352 = vst [vmem:[#allocation24_spill] sm:$0xff] %v7159_v4  ;;  %v1446_v60 = vmul.f32 %v7021_v33, %v1430_v56  ;;  %v1432_v14 = vadd.f32 0.2548296, %v1416_v18  ;;  %v1447_v8 = vmul.f32 %v7026_v36, %v1431_v6  ;;  %6385 = vpow2.f32 %v1501_v9 }
 0x143   : > { %v6374_v17 = vpop.eup %6373  ;;  %v1418_v5 = vmul.f32 %v7044_v23, %v1402_v3  ;;  %v1401_v62 = vadd.f32 -0.28449672, %v1385_v10  ;;  %v1355_v0 = vmul.f32 %v7123_v44, %v1339_v26  ;;  %v7173_v22 = vmul.f32 0.70710677, %v7159_v4 }
 0x144   : > { %v6376_v20 = vpop.eup %6375  ;;  %v1388_v30 = vmul.f32 %v7095_v39, %v1372_v25  ;;  %6387 = vpow2.f32 %v1507_v1  ;;  %v1486_v11 = vmul.f32 %v1470_v34, %v7069_v15  ;;  %v7178_v33 = vadd.f32 %v5900_v54, %v6955_v38 }
 0x145   : > { %v7185_v3 = vsel %vm1211_vm8, 1.0, %v9350_v58  ;;  %6389 = vpow2.f32 %v1505_v50  ;;  %v1469_v6 = vsub.f32 0.0, %v7078_v19  ;;  %v7189_v36 = vand.u32 2147483647, %v7173_v22 }
 0x146   : > { %9353 = vst [vmem:[#allocation25_spill] sm:$0xff] %v7178_v33  ;;  %v7180_v31 = vpop.eup %6377  ;;  %v1526_v15 = vmul.f32 %v6368_v7, %v1446_v60  ;;  %v1448_v56 = vmul.f32 %v7030_v46, %v1432_v14  ;;  %v1527_v18 = vmul.f32 %v6376_v20, %v1447_v8  ;;  %v1434_v9 = vadd.f32 0.2548296, %v1418_v5  ;;  %v5903_v8 = vpop.f32.mrf.mxu0 }
 0x147   : > { %v7191_v1 = vpop.eup %6379  ;;  %v1417_v29 = vmul.f32 %v7065_v37, %v1401_v62  ;;  %v1371_v10 = vadd.f32 1.4214138, %v1355_v0  ;;  %v1263_v26 = vmul.f32 0.3275911, %v7189_v36  ;;  %v1404_v25 = vadd.f32 -0.28449672, %v1388_v30 }
 0x148   : > { %v1511_v34 = vmul.f32 1.442695, %v1486_v11  ;;  %v7198_v50 = vmul.f32 0.70710677, %v7178_v33  ;;  %v7201_v54 = vadd.f32 %v6955_v38, %v1154_v35  ;;  %v1326_v7 = vmul.f32 1.0614054, %v7180_v31 }
 0x149   : > { %v1325_v46 = vmul.f32 1.0614054, %v7191_v1  ;;  %v1485_v60 = vmul.f32 %v1469_v6, %v7078_v19  ;;  %v1279_v14 = vadd.f32 1.0, %v1263_v26  ;;  %v1542_v5 = vsub.f32 1.0, %v1526_v15 }
 0x14a   : > { %9354 = vst [vmem:[#allocation26_spill] sm:$0xff] %v7201_v54  ;;  %v1528_v62 = vmul.f32 %v6374_v17, %v1448_v56  ;;  %v1543_v0 = vsub.f32 1.0, %v1527_v18  ;;  %v7207_v20 = vand.u32 2147483647, %v7198_v50  ;;  %v1450_v30 = vmul.f32 %v7044_v23, %v1434_v9 }
 0x14b   : > { %v1433_v11 = vadd.f32 0.2548296, %v1417_v29  ;;  %v1387_v35 = vmul.f32 %v7123_v44, %v1371_v10  ;;  %6391 = vrcp.f32 %v1279_v14  ;;  %v1420_v2 = vmul.f32 %v7095_v39, %v1404_v25 }
 0x14c   : > { %v1266_v33 = vmul.f32 0.3275911, %v7207_v20  ;;  %v7214_v19 = vmul.f32 0.70710677, %v7201_v54  ;;  %v7217_v6 = vadd.f32 %v5903_v8, %v6955_v38  ;;  %v1342_v15 = vadd.f32 -1.4531521, %v1326_v7  ;;  %v1164_v7 = vpop.f32.mrf.mxu0 }
 0x14d   : > { %v6382_v17 = vpop.eup %6381  ;;  %6393 = vpow2.f32 %v1511_v34  ;;  %v7222_v23 = vsel %vm1213_vm9, 1.0, %v9350_v58  ;;  %v1341_v56 = vadd.f32 -1.4531521, %v1325_v46  ;;  %v1558_v9 = vmul.f32 %v1542_v5, %v7047_v28 }
 0x14e   : > { %9355 = vst [vmem:[#allocation27_spill] sm:$0xff] %v7217_v6  ;;  %v7224_v18 = vpop.eup %6383  ;;  %v1544_v29 = vsub.f32 1.0, %v1528_v62  ;;  %v1509_v10 = vmul.f32 1.442695, %v1485_v60  ;;  %v1282_v26 = vadd.f32 1.0, %v1266_v33  ;;  %v1559_v14 = vmul.f32 %v1543_v0, %v7092_v52 }
 0x14f   : > { %v6386_v25 = vpop.eup %6385  ;;  %v1530_v8 = vmul.f32 %v6382_v17, %v1450_v30  ;;  %v1403_v24 = vadd.f32 -0.28449672, %v1387_v35  ;;  %v7229_v34 = vand.u32 2147483647, %v7214_v19  ;;  %v1449_v40 = vmul.f32 %v7065_v37, %v1433_v11 }
 0x150   : > { %v1436_v54 = vadd.f32 0.2548296, %v1420_v2  ;;  %6395 = vrcp.f32 %v1282_v26  ;;  %v7233_v46 = vmul.f32 0.70710677, %v7217_v6  ;;  %v1358_v60 = vmul.f32 %v7180_v31, %v1342_v15 }
 0x151   : > { %v6388_v28 = vpop.eup %6387  ;;  %v1357_v33 = vmul.f32 %v7191_v1, %v1341_v56  ;;  %v1328_v52 = vmul.f32 1.0614054, %v7224_v18  ;;  %v1265_v5 = vmul.f32 0.3275911, %v7229_v34  ;;  %v1574_v0 = vadd.f32 1.0, %v1558_v9 }
 0x152   : > { %9356 = vst [vmem:[#allocation28_spill] sm:$0xff] %v7233_v46  ;;  %v6390_v62 = vpop.eup %6389  ;;  %6397 = vpow2.f32 %v1509_v10  ;;  %v7240_v30 = vand.u32 2147483647, %v7233_v46  ;;  %v7243_v2 = vadd.f32 %v6955_v38, %v1164_v7  ;;  %v1560_v37 = vmul.f32 %v1544_v29, %v7089_v51 }
 0x153   : > { %v1575_v11 = vadd.f32 1.0, %v1559_v14  ;;  %v1419_v35 = vmul.f32 %v7123_v44, %v1403_v24  ;;  %v1281_v17 = vadd.f32 1.0, %v1265_v5  ;;  %v1546_v15 = vsub.f32 1.0, %v1530_v8 }
 0x154   : > { %9357 = vst [vmem:[#allocation29_spill] sm:$0xff] %v7243_v2  ;;  %v1529_v56 = vmul.f32 %v6386_v25, %v1449_v40  ;;  %v1452_v26 = vmul.f32 %v7095_v39, %v1436_v54  ;;  %v1268_v6 = vmul.f32 0.3275911, %v7240_v30  ;;  %v1374_v9 = vadd.f32 1.4214138, %v1358_v60 }
 0x155   : > { %v1373_v10 = vadd.f32 1.4214138, %v1357_v33  ;;  %v1344_v4 = vadd.f32 -1.4531521, %v1328_v52  ;;  %6399 = vrcp.f32 %v1281_v17  ;;  %v1471_v46 = vsub.f32 0.0, %v7189_v36 }
 0x156   : > { %v1284_v38 = vadd.f32 1.0, %v1268_v6  ;;  %v7251_v7 = vmul.f32 0.70710677, %v7243_v2  ;;  %v1317_v51 = vmul.f32 1.0614054, %v7147_v59  ;;  %v7255_v24 = vmul.f32 %v1574_v0, %v7042_v63 }
 0x157   : > { %v7257_v29 = vadd.f32 1.0, %v1560_v37  ;;  %v7260_v39 = vmul.f32 %v1575_v11, %v7082_v16  ;;  %v1435_v54 = vadd.f32 0.2548296, %v1419_v35  ;;  %v1545_v14 = vsub.f32 1.0, %v1529_v56 }
 0x158   : > { %v7262_v25 = vpop.eup %6391  ;;  %v7264_v8 = vmul.f32 %v6388_v28, %v1452_v26  ;;  %6401 = vrcp.f32 %v1284_v38  ;;  %v7267_v6 = vand.u32 2147483647, %v7251_v7  ;;  %v1390_v40 = vmul.f32 %v7180_v31, %v1374_v9 }
 0x159   : > { %v1389_v63 = vmul.f32 %v7191_v1, %v1373_v10  ;;  %v1327_v60 = vmul.f32 1.0614054, %v7262_v25  ;;  %v1333_v33 = vadd.f32 -1.4531521, %v1317_v51  ;;  %v7275_v16 = vmul.f32 %v1546_v15, %v7120_v61 }
 0x15a   : > { %v7272_v52 = vpop.eup %6393  ;;  %v1360_v5 = vmul.f32 %v7224_v18, %v1344_v4  ;;  %v1487_v28 = vmul.f32 %v1471_v46, %v7189_v36  ;;  %v1267_v0 = vmul.f32 0.3275911, %v7267_v6  ;;  %v1472_v37 = vsub.f32 0.0, %v7134_v47 }
 0x15b   : > { %v1343_v11 = vadd.f32 -1.4531521, %v1327_v60  ;;  %v1473_v35 = vsub.f32 0.0, %v7229_v34  ;;  %v1349_v17 = vmul.f32 %v7147_v59, %v1333_v33  ;;  %v1561_v56 = vmul.f32 %v1545_v14, %v7130_v43 }
 0x15c   : > { %v1451_v61 = vmul.f32 %v7123_v44, %v1435_v54  ;;  %v1283_v15 = vadd.f32 1.0, %v1267_v0  ;;  %v1406_v4 = vadd.f32 -0.28449672, %v1390_v40  ;;  %v1405_v36 = vadd.f32 -0.28449672, %v1389_v63 }
 0x15d   : > { %v7286_v9 = vpop.eup %6395  ;;  %v1359_v46 = vmul.f32 %v7262_v25, %v1343_v11  ;;  %v1365_v10 = vadd.f32 1.4214138, %v1349_v17  ;;  %v1376_v38 = vadd.f32 1.4214138, %v1360_v5  ;;  %v1513_v51 = vmul.f32 1.442695, %v1487_v28 }
 0x15e   : > { %v1330_v60 = vmul.f32 1.0614054, %v7286_v9  ;;  %6403 = vrcp.f32 %v1283_v15  ;;  %v1488_v43 = vmul.f32 %v1472_v37, %v7134_v47  ;;  %v1489_v26 = vmul.f32 %v1473_v35, %v7229_v34 }
 0x15f   : > { %v6398_v33 = vpop.eup %6397  ;;  %v1375_v14 = vadd.f32 1.4214138, %v1359_v46  ;;  %v1381_v44 = vmul.f32 %v7147_v59, %v1365_v10  ;;  %v7293_v54 = vadd.f32 1.0, %v1561_v56  ;;  %v7295_v40 = vmul.f32 %v6390_v62, %v1451_v61 }
 0x160   : > { %v1346_v63 = vadd.f32 -1.4531521, %v1330_v60  ;;  %v1474_v0 = vsub.f32 0.0, %v7207_v20  ;;  %v1422_v5 = vmul.f32 %v7180_v31, %v1406_v4  ;;  %v1421_v28 = vmul.f32 %v7191_v1, %v1405_v36 }
 0x161   : > { %v1391_v11 = vmul.f32 %v7262_v25, %v1375_v14  ;;  %v1397_v17 = vadd.f32 -0.28449672, %v1381_v44  ;;  %v1392_v34 = vmul.f32 %v7224_v18, %v1376_v38  ;;  %6405 = vpow2.f32 %v1513_v51 }
 0x162   : > { %v7301_v47 = vpop.eup %6399  ;;  %v1362_v37 = vmul.f32 %v7286_v9, %v1346_v63  ;;  %v1476_v62 = vsub.f32 0.0, %v7240_v30  ;;  %v1517_v61 = vmul.f32 1.442695, %v1489_v26  ;;  %v1515_v4 = vmul.f32 1.442695, %v1488_v43 }
 0x163   : > { %v1407_v35 = vadd.f32 -0.28449672, %v1391_v11  ;;  %v1329_v56 = vmul.f32 1.0614054, %v7301_v47  ;;  %v1413_v15 = vmul.f32 %v7147_v59, %v1397_v17  ;;  %v1490_v46 = vmul.f32 %v1474_v0, %v7207_v20 }
 0x164   : > { %v1378_v36 = vadd.f32 1.4214138, %v1362_v37  ;;  %v1475_v10 = vsub.f32 0.0, %v7267_v6  ;;  %v1437_v38 = vadd.f32 0.2548296, %v1421_v28  ;;  %6407 = vpow2.f32 %v1517_v61 }
 0x165   : > { %v7310_v60 = vpop.eup %6401  ;;  %v1423_v51 = vmul.f32 %v7262_v25, %v1407_v35  ;;  %v1345_v14 = vadd.f32 -1.4531521, %v1329_v56  ;;  %v1429_v44 = vadd.f32 0.2548296, %v1413_v15  ;;  %v1438_v63 = vadd.f32 0.2548296, %v1422_v5 }
 0x166   : > { %v1408_v11 = vadd.f32 -0.28449672, %v1392_v34  ;;  %v1394_v2 = vmul.f32 %v7286_v9, %v1378_v36  ;;  %v1332_v26 = vmul.f32 1.0614054, %v7310_v60  ;;  %v1492_v20 = vmul.f32 %v1476_v62, %v7240_v30 }
 0x167   : > { %v1361_v43 = vmul.f32 %v7301_v47, %v1345_v14  ;;  %v1445_v0 = vmul.f32 %v7147_v59, %v1429_v44  ;;  %6409 = vpow2.f32 %v1515_v4  ;;  %v1519_v17 = vmul.f32 1.442695, %v1490_v46 }
 0x168   : > { %v1348_v28 = vadd.f32 -1.4531521, %v1332_v26  ;;  %v1491_v37 = vmul.f32 %v1475_v10, %v7267_v6  ;;  %v1453_v5 = vmul.f32 %v7191_v1, %v1437_v38  ;;  %v1439_v34 = vadd.f32 0.2548296, %v1423_v51 }
 0x169   : > { %v1377_v35 = vadd.f32 1.4214138, %v1361_v43  ;;  %v1525_v56 = vmul.f32 %v7154_v48, %v1445_v0  ;;  %v1547_v15 = vsub.f32 1.0, %v7295_v40  ;;  %v1424_v61 = vmul.f32 %v7224_v18, %v1408_v11 }
 0x16a   : > { %v1410_v36 = vadd.f32 -0.28449672, %v1394_v2  ;;  %v1364_v30 = vmul.f32 %v7310_v60, %v1348_v28  ;;  %v1454_v62 = vmul.f32 %v7180_v31, %v1438_v63  ;;  %v1523_v4 = vmul.f32 1.442695, %v1492_v20 }
 0x16b   : > { %v7324_v59 = vpop.eup %6403  ;;  %v1393_v6 = vmul.f32 %v7301_v47, %v1377_v35  ;;  %v1541_v46 = vsub.f32 1.0, %v1525_v56  ;;  %6411 = vpow2.f32 %v1519_v17  ;;  %v1521_v40 = vmul.f32 1.442695, %v1491_v37 }
 0x16c   : > { %v1380_v1 = vadd.f32 1.4214138, %v1364_v30  ;;  %v1331_v48 = vmul.f32 1.0614054, %v7324_v59  ;;  %v1533_v10 = vmul.f32 %v6398_v33, %v1453_v5  ;;  %v1455_v2 = vmul.f32 %v7262_v25, %v1439_v34 }
 0x16d   : > { %v1409_v38 = vadd.f32 -0.28449672, %v1393_v6  ;;  %v1557_v51 = vmul.f32 %v1541_v46, %v7073_v45  ;;  %v1440_v14 = vadd.f32 0.2548296, %v1424_v61  ;;  %v1426_v31 = vmul.f32 %v7286_v9, %v1410_v36 }
 0x16e   : > { %v1396_v44 = vmul.f32 %v7310_v60, %v1380_v1  ;;  %v1347_v63 = vadd.f32 -1.4531521, %v1331_v48  ;;  %v6406_v11 = vpop.eup %6405  ;;  %v1563_v26 = vmul.f32 %v1547_v15, %v7185_v3  ;;  %6413 = vpow2.f32 %v1523_v4 }
 0x16f   : > { %v1425_v43 = vmul.f32 %v7301_v47, %v1409_v38  ;;  %v1573_v20 = vadd.f32 1.0, %v1557_v51  ;;  %v1534_v33 = vmul.f32 %v7272_v52, %v1454_v62  ;;  %6415 = vpow2.f32 %v1521_v40 }
 0x170   : > { %v1412_v0 = vadd.f32 -0.28449672, %v1396_v44  ;;  %v1363_v25 = vmul.f32 %v7324_v59, %v1347_v63  ;;  %v1549_v45 = vsub.f32 1.0, %v1533_v10  ;;  %v1535_v17 = vmul.f32 %v6406_v11, %v1455_v2 }
 0x171   : > { %v1441_v28 = vadd.f32 0.2548296, %v1425_v43  ;;  %v1589_v37 = vmul.f32 %v1573_v20, %v7049_v42  ;;  %v1456_v5 = vmul.f32 %v7224_v18, %v1440_v14  ;;  %v1442_v34 = vadd.f32 0.2548296, %v1426_v31  ;;  %v6408_v42 = vpop.eup %6407 }
 0x172   : > { %v1428_v3 = vmul.f32 %v7310_v60, %v1412_v0  ;;  %v1379_v35 = vadd.f32 1.4214138, %v1363_v25  ;;  %v1592_v56 = vmul.f32 %v7257_v29, %v7060_v41  ;;  %v1578_v52 = vadd.f32 1.0, %v7275_v16 }
 0x173   : > { %v9358_v15 = vsub.f32 1.0, %v7264_v8  ;;  %v1457_v36 = vmul.f32 %v7301_v47, %v1441_v28  ;;  %5912 = vmatprep.mubr.msk.f32.mxu1 %vm1609_vm10, %v1589_v37  ;;  %v1593_v18 = vmul.f32 %v7293_v54, %v7108_v12  ;;  %v1579_v30 = vadd.f32 1.0, %v1563_v26  ;;  %v9360_v37 = vld [vmem:[#allocation28_spill] sm:$0xff] }
 0x174   : > { %v1550_v62 = vsub.f32 1.0, %v1534_v33  ;;  %v1395_v6 = vmul.f32 %v7324_v59, %v1379_v35  ;;  %5913 = vmatmul.mubr.msk.f32.vlgmr.msra.gmra.mxu1 %vm1609_vm10, %v7255_v24  ;;  %v6410_v41 = vpop.eup %6409  ;;  %v1565_v29 = vmul.f32 %v1549_v45, %v7222_v23  ;;  %vm1215_vm12 = vcmp.ge.f32.partialorder %v7173_v22, 0.0  ;;  %v9359_v33 = vld [vmem:[#allocation24_spill] sm:$0xff] }
 0x175   : > { %v1564_v61 = vmul.f32 %v9358_v15, %v7165_v27  ;;  %v1551_v27 = vsub.f32 1.0, %v1535_v17  ;;  %v1537_v8 = vmul.f32 %v6408_v42, %v1457_v36  ;;  %5915 = vmatprep.mubr.msk.f32.mxu1 %vm1609_vm10, %v7260_v39  ;;  %v1536_v16 = vmul.f32 %v6410_v41, %v1456_v5  ;;  %v9362_v15 = vld [vmem:[#allocation23_spill] sm:$0xff] }
 0x176   : > { %v1458_v12 = vmul.f32 %v7286_v9, %v1442_v34  ;;  %v1444_v54 = vadd.f32 0.2548296, %v1428_v3  ;;  %v1411_v47 = vadd.f32 -0.28449672, %v1395_v6  ;;  %v1594_v4 = vmul.f32 %v1578_v52, %v7104_v49  ;;  %v9363_v6 = vld [vmem:[#allocation29_spill] sm:$0xff] }
 0x177   : > { %v1580_v46 = vadd.f32 1.0, %v1564_v61  ;;  %v1230_v24 = vsel %vm1214_vm11, 1.0, %v9350_v58  ;;  %vm1216_vm13 = vcmp.ge.f32.partialorder %v7115_v57, 0.0  ;;  %v1595_v22 = vmul.f32 %v1579_v30, %v7151_v21 }
 0x178   : > { %v1566_v23 = vmul.f32 %v1550_v62, %v1230_v24  ;;  %v1231_v1 = vsel %vm1215_vm12, 1.0, %v9350_v58  ;;  %v1427_v39 = vmul.f32 %v7324_v59, %v1411_v47  ;;  %5916 = vmatmul.mubr.msk.f32.gmra.mxu1 %vm1609_vm10, %v1592_v56  ;;  %v6412_v9 = vpop.eup %6411  ;;  %v1581_v48 = vadd.f32 1.0, %v1565_v29  ;;  %v9361_v56 = vld [vmem:[#allocation26_spill] sm:$0xff]  ;;  %v9364_v29 = vld [vmem:[#allocation25_spill] sm:$0xff] }
 0x179   : > { %v1567_v40 = vmul.f32 %v1551_v27, %v1231_v1  ;;  %vm1217_vm14 = vcmp.ge.f32.partialorder %v7214_v19, 0.0  ;;  %v1553_v49 = vsub.f32 1.0, %v1537_v8  ;;  %5918 = vmatprep.mubr.msk.f32.mxu1 %vm1609_vm10, %v1593_v18  ;;  %v1552_v32 = vsub.f32 1.0, %v1536_v16  ;;  %v9367_v24 = vld [vmem:[#allocation7_spill] sm:$0xff]  ;;  %v9368_v1 = vld [vmem:[#allocation10_spill] sm:$0xff] }
 0x17a   : > { %v1538_v10 = vmul.f32 %v6412_v9, %v1458_v12  ;;  %v1460_v2 = vmul.f32 %v7310_v60, %v1444_v54  ;;  %v1443_v21 = vadd.f32 0.2548296, %v1427_v39  ;;  %v1596_v38 = vmul.f32 %v1580_v46, %v7143_v13  ;;  %v9365_v54 = vld [vmem:[#allocation27_spill] sm:$0xff] }
 0x17b   : > { %v1182_v51 = vmul.f32 0.5, %v7034_v53  ;;  %v1181_v14 = vmul.f32 0.5, %v7038_v55  ;;  %v1232_v31 = vsel %vm1216_vm13, 1.0, %v9350_v58  ;;  %v6414_v44 = vpop.eup %6413  ;;  %v1582_v19 = vadd.f32 1.0, %v1566_v23  ;;  %v9366_v46 = vld [vmem:[#allocation8_spill] sm:$0xff] }
 0x17c   : > { %vm1218_vm15 = vcmp.ge.f32.partialorder %v7198_v50, 0.0  ;;  %v1233_v63 = vsel %vm1217_vm14, 1.0, %v9350_v58  ;;  %v1459_v11 = vmul.f32 %v7324_v59, %v1443_v21  ;;  %5919 = vmatmul.mubr.msk.f32.gmra.mxu1 %vm1609_vm10, %v1594_v4  ;;  %v6416_v60 = vpop.eup %6415  ;;  %v1583_v26 = vadd.f32 1.0, %v1567_v40  ;;  %v9369_v40 = vld [vmem:[#allocation9_spill] sm:$0xff] }
 0x17d   : > { %v1597_v13 = vmul.f32 %v1581_v48, %v1181_v14  ;;  %v1569_v53 = vmul.f32 %v1553_v49, %v1233_v63  ;;  %vm1219_vm0 = vcmp.ge.f32.partialorder %v7251_v7, 0.0  ;;  %5921 = vmatprep.mubr.msk.f32.mxu1 %vm1609_vm10, %v1595_v22  ;;  %v1568_v55 = vmul.f32 %v1552_v32, %v1232_v31  ;;  %v9371_v14 = vld [vmem:[#allocation11_spill] sm:$0xff]  ;;  %v9372_v63 = vld [vmem:[#allocation14_spill] sm:$0xff] }
 0x17e   : > { %v1554_v57 = vsub.f32 1.0, %v1538_v10  ;;  %v1540_v43 = vmul.f32 %v6414_v44, %v1460_v2  ;;  %v1539_v20 = vmul.f32 %v6416_v60, %v1459_v11  ;;  %v1183_v0 = vmul.f32 0.5, %v9359_v33  ;;  %v9370_v2 = vld [vmem:[#allocation12_spill] sm:$0xff] }
 0x17f   : > { %v1598_v25 = vmul.f32 %v1582_v19, %v1182_v51  ;;  %v1234_v59 = vsel %vm1218_vm15, 1.0, %v9350_v58  ;;  %v1585_v28 = vadd.f32 1.0, %v1569_v53  ;;  %vm1220_vm1 = vcmp.ge.f32.partialorder %v9360_v37, 0.0 }
 0x180   : > { %v1555_v45 = vsub.f32 1.0, %v1539_v20  ;;  %5922 = vmatmul.mubr.msk.f32.gmra.mxu1 %vm1609_vm10, %v1596_v38  ;;  %v1599_v17 = vmul.f32 %v1583_v26, %v1183_v0  ;;  %v1235_v7 = vsel %vm1219_vm0, 1.0, %v9350_v58  ;;  %v1584_v5 = vadd.f32 1.0, %v1568_v55  ;;  %v9373_v26 = vld [vmem:[#allocation13_spill] sm:$0xff] }
 0x181   : > { %5924 = vmatprep.mubr.msk.f32.mxu1 %vm1609_vm10, %v1597_v13  ;;  %v1570_v34 = vmul.f32 %v1554_v57, %v1234_v59  ;;  %v1556_v3 = vsub.f32 1.0, %v1540_v43  ;;  %v1185_v52 = vmul.f32 0.5, %v9361_v56  ;;  %v1184_v50 = vmul.f32 0.5, %v9362_v15  ;;  %v9374_v43 = vld [vmem:[#allocation16_spill] sm:$0xff] }
 0x182   : > { %v1571_v35 = vmul.f32 %v1555_v45, %v1235_v7  ;;  %v1236_v36 = vsel %vm1220_vm1, 1.0, %v9350_v58  ;;  %v1187_v41 = vmul.f32 0.5, %v9363_v6  ;;  %v1186_v27 = vmul.f32 0.5, %v9364_v29 }
 0x183   : > { %v1601_v61 = vmul.f32 %v1585_v28, %v1185_v52  ;;  %v1600_v18 = vmul.f32 %v1584_v5, %v1184_v50  ;;  %v1586_v30 = vadd.f32 1.0, %v1570_v34  ;;  %v1572_v62 = vmul.f32 %v1556_v3, %v1236_v36  ;;  %v9376_v28 = vld [vmem:[#allocation18_spill] sm:$0xff]  ;;  %v9377_v34 = vld [vmem:[#allocation17_spill] sm:$0xff]  ;;  %v9378_v52 = vld [vmem:[#allocation20_spill] sm:$0xff] }
 0x184   : > { %5925 = vmatmul.mubr.msk.f32.gmra.mxu1 %vm1609_vm10, %v1598_v25  ;;  %v1587_v42 = vadd.f32 1.0, %v1571_v35  ;;  %v1188_v47 = vmul.f32 0.5, %v9365_v54  ;;  %v7404_v4 = vstv %s5458_s0  ;;  %v6609_v22 = vmov 0.0   ;;  %v9375_v25 = vld [vmem:[#allocation15_spill] sm:$0xff] }
 0x185   : > { %5927 = vmatprep.mubr.msk.f32.mxu1 %vm1609_vm10, %v1599_v17  ;;  %v1602_v16 = vmul.f32 %v1586_v30, %v1186_v27  ;;  %v1588_v12 = vadd.f32 1.0, %v1572_v62  ;;  %vm1806_vm2 = vcmp.lt.s32.totalorder %v9366_v46, %v7404_v4  ;;  %vm1805_vm3 = vcmp.lt.s32.totalorder %v9367_v24, %v7404_v4  ;;  %v9379_v36 = vld [vmem:[#allocation19_spill] sm:$0xff]  ;;  %v9380_v62 = vld [vmem:[#allocation22_spill] sm:$0xff]  ;;  %v9381_v27 = vld [vmem:[#allocation21_spill] sm:$0xff] }
 0x186   : > { %v1603_v8 = vmul.f32 %v1587_v42, %v1187_v41  ;;  %v5460_v23 = vsel %vm1806_vm2, 1.0, %v6609_v22  ;;  %vm1808_vm4 = vcmp.lt.s32.totalorder %v9368_v1, %v7404_v4  ;;  %v5459_v9 = vsel %vm1805_vm3, 1.0, %v6609_v22 }
 0x187   : > { %v1604_v58 = vmul.f32 %v1588_v12, %v1188_v47  ;;  %vm1807_vm5 = vcmp.lt.s32.totalorder %v9369_v40, %v7404_v4  ;;  %v5462_v32 = vsel %vm1808_vm4, 1.0, %v6609_v22  ;;  %vm1810_vm6 = vcmp.lt.s32.totalorder %v9370_v2, %v7404_v4 }
 0x188   : > { %5928 = vmatmul.mubr.msk.f32.gmra.mxu1 %vm1609_vm10, %v1600_v18  ;;  %v5461_v38 = vsel %vm1807_vm5, 1.0, %v6609_v22  ;;  %vm1809_vm7 = vcmp.lt.s32.totalorder %v9371_v14, %v7404_v4  ;;  %v5464_v44 = vsel %vm1810_vm6, 1.0, %v6609_v22  ;;  %vm1812_vm8 = vcmp.lt.s32.totalorder %v9372_v63, %v7404_v4 }
 0x189   : > { %5930 = vmatprep.mubr.msk.f32.mxu1 %vm1609_vm10, %v1601_v61  ;;  %v5463_v60 = vsel %vm1809_vm7, 1.0, %v6609_v22  ;;  %vm1811_vm9 = vcmp.lt.s32.totalorder %v9373_v26, %v7404_v4  ;;  %v5466_v55 = vsel %vm1812_vm8, 1.0, %v6609_v22  ;;  %vm1814_vm11 = vcmp.lt.s32.totalorder %v9374_v43, %v7404_v4 }
 0x18a   : > { %v5465_v33 = vsel %vm1811_vm9, 1.0, %v6609_v22  ;;  %vm1813_vm12 = vcmp.lt.s32.totalorder %v9375_v25, %v7404_v4  ;;  %v5468_v45 = vsel %vm1814_vm11, 1.0, %v6609_v22  ;;  %vm1816_vm13 = vcmp.lt.s32.totalorder %v9376_v28, %v7404_v4 }
 0x18b   : > { %v5467_v7 = vsel %vm1813_vm12, 1.0, %v6609_v22  ;;  %vm1815_vm14 = vcmp.lt.s32.totalorder %v9377_v34, %v7404_v4  ;;  %v5470_v35 = vsel %vm1816_vm13, 1.0, %v6609_v22  ;;  %vm1818_vm15 = vcmp.lt.s32.totalorder %v9378_v52, %v7404_v4 }
 0x18c   : > { %5931 = vmatmul.mubr.msk.f32.gmra.mxu1 %vm1609_vm10, %v1602_v16  ;;  %v5469_v50 = vsel %vm1815_vm14, 1.0, %v6609_v22  ;;  %vm1817_vm0 = vcmp.lt.s32.totalorder %v9379_v36, %v7404_v4  ;;  %v5472_v18 = vsel %vm1818_vm15, 1.0, %v6609_v22  ;;  %vm1820_vm1 = vcmp.lt.s32.totalorder %v9380_v62, %v7404_v4 }
 0x18d   : > { %5933 = vmatprep.mubr.msk.f32.mxu1 %vm1609_vm10, %v1603_v8  ;;  %v5471_v41 = vsel %vm1817_vm0, 1.0, %v6609_v22  ;;  %vm1819_vm2 = vcmp.lt.s32.totalorder %v9381_v27, %v7404_v4  ;;  %v5474_v16 = vsel %vm1820_vm1, 1.0, %v6609_v22 }
 0x18e   : > { %v5473_v47 = vsel %vm1819_vm2, 1.0, %v6609_v22 }
 0x190   : > { %5934 = vmatmul.mubr.msk.f32.gmra.mxu1 %vm1609_vm10, %v1604_v58 }
 0x234   : > { %v5914_v39 = vpop.f32.mrf.mxu1 }
 0x235   : > { %v1854_v48 = vmul.f32 %v5914_v39, %v5460_v23 }
 0x236   : > { %v1724_v49 = vpop.f32.mrf.mxu1 }
 0x237   : > { %1870 = vst.msk [vmem:[#allocation2 + $0x8] sm:$0xff] %vm1609_vm10, %v1854_v48  ;;  %v1853_v10 = vmul.f32 %v5459_v9, %v1724_v49 }
 0x238   : > { %v5917_v21 = vpop.f32.mrf.mxu1 }
 0x239   : > { %1869 = vst.msk [vmem:[#allocation2] sm:$0xff] %vm1609_vm10, %v1853_v10  ;;  %v1856_v51 = vmul.f32 %v5917_v21, %v5462_v32 }
 0x23a   : > { %v1734_v31 = vpop.f32.mrf.mxu1 }
 0x23b   : > { %1872 = vst.msk [vmem:[#allocation2 + $0x18] sm:$0xff] %vm1609_vm10, %v1856_v51  ;;  %v1855_v19 = vmul.f32 %v5461_v38, %v1734_v31 }
 0x23c   : > { %v5920_v11 = vpop.f32.mrf.mxu1 }
 0x23d   : > { %1871 = vst.msk [vmem:[#allocation2 + $0x10] sm:$0xff] %vm1609_vm10, %v1855_v19  ;;  %v1858_v13 = vmul.f32 %v5920_v11, %v5464_v44 }
 0x23e   : > { %v1744_v53 = vpop.f32.mrf.mxu1 }
 0x23f   : > { %1874 = vst.msk [vmem:[#allocation2 + $0x28] sm:$0xff] %vm1609_vm10, %v1858_v13  ;;  %v1857_v57 = vmul.f32 %v5463_v60, %v1744_v53 }
 0x240   : > { %v5923_v20 = vpop.f32.mrf.mxu1 }
 0x241   : > { %1873 = vst.msk [vmem:[#allocation2 + $0x20] sm:$0xff] %vm1609_vm10, %v1857_v57  ;;  %v1860_v0 = vmul.f32 %v5923_v20, %v5466_v55 }
 0x242   : > { %v1754_v59 = vpop.f32.mrf.mxu1 }
 0x243   : > { %1876 = vst.msk [vmem:[#allocation2 + $0x38] sm:$0xff] %vm1609_vm10, %v1860_v0  ;;  %v1859_v17 = vmul.f32 %v5465_v33, %v1754_v59 }
 0x244   : > { %v5926_v37 = vpop.f32.mrf.mxu1 }
 0x245   : > { %1875 = vst.msk [vmem:[#allocation2 + $0x30] sm:$0xff] %vm1609_vm10, %v1859_v17  ;;  %v1862_v5 = vmul.f32 %v5926_v37, %v5468_v45 }
 0x246   : > { %v1764_v3 = vpop.f32.mrf.mxu1 }
 0x247   : > { %1878 = vst.msk [vmem:[#allocation2 + $0x48] sm:$0xff] %vm1609_vm10, %v1862_v5  ;;  %v1861_v56 = vmul.f32 %v5467_v7, %v1764_v3 }
 0x248   : > { %v5929_v15 = vpop.f32.mrf.mxu1 }
 0x249   : > { %1877 = vst.msk [vmem:[#allocation2 + $0x40] sm:$0xff] %vm1609_vm10, %v1861_v56  ;;  %v1864_v61 = vmul.f32 %v5929_v15, %v5470_v35 }
 0x24a   : > { %v1774_v42 = vpop.f32.mrf.mxu1 }
 0x24b   : > { %1880 = vst.msk [vmem:[#allocation2 + $0x58] sm:$0xff] %vm1609_vm10, %v1864_v61  ;;  %v1863_v30 = vmul.f32 %v5469_v50, %v1774_v42 }
 0x24c   : > { %v5932_v6 = vpop.f32.mrf.mxu1 }
 0x24d   : > { %1879 = vst.msk [vmem:[#allocation2 + $0x50] sm:$0xff] %vm1609_vm10, %v1863_v30  ;;  %v1866_v29 = vmul.f32 %v5932_v6, %v5472_v18 }
 0x24e   : > { %v1784_v8 = vpop.f32.mrf.mxu1 }
 0x24f   : > { %1882 = vst.msk [vmem:[#allocation2 + $0x68] sm:$0xff] %vm1609_vm10, %v1866_v29  ;;  %v1865_v12 = vmul.f32 %v5471_v41, %v1784_v8 }
 0x250   : > { %v5935_v54 = vpop.f32.mrf.mxu1 }
 0x251   : > { %1881 = vst.msk [vmem:[#allocation2 + $0x60] sm:$0xff] %vm1609_vm10, %v1865_v12  ;;  %v1868_v58 = vmul.f32 %v5935_v54, %v5474_v16 }
 0x252   : > { %v1794_v46 = vpop.f32.mrf.mxu1 }
 0x253   : > { %1884 = vst.msk [vmem:[#allocation2 + $0x78] sm:$0xff] %vm1609_vm10, %v1868_v58  ;;  %v1867_v24 = vmul.f32 %v5473_v47, %v1794_v46 }
 0x255   : > { %1883 = vst.msk [vmem:[#allocation2 + $0x70] sm:$0xff] %vm1609_vm10, %v1867_v24 }
 0x256 PF: > { %v1898_v1 = vld [vmem:[#allocation2 + $0x68] sm:$0xff]  ;;  %v1901_v22 = vld [vmem:[%s6782_s9] sm:$0xff]  ;;  %v1896_v9 = vld [vmem:[#allocation2 + $0x58] sm:$0xff]  ;;  %s9382_s3 = sld [smem:[#allocation37_spill]]  ;;  %vm2018_vm10 = vcmask 261120   ;;  %vm2430_vm3 = vcmask 523264   ;;  %s9418_s4 = scalar_lea.vmem %s9232_s13, %s6761_s19 }
 0x257   : > { %5968 = vmatprep.mubr.f32.mxu0 %v1901_v22  ;;  %v1895_v48 = vld [vmem:[#allocation2 + $0x50] sm:$0xff]  ;;  %v1894_v40 = vld [vmem:[#allocation2 + $0x48] sm:$0xff]  ;;  %v1893_v10 = vld [vmem:[#allocation2 + $0x40] sm:$0xff]  ;;  %s9384_s0 = sld [smem:[#allocation38_spill]]  ;;  %p5586_p11 = scmp.ne.s32.totalorder %s6755_s26, 1 }
 0x258   : > { %v1897_v39 = vld [vmem:[#allocation2 + $0x60] sm:$0xff]  ;;  %v1892_v2 = vld [vmem:[#allocation2 + $0x38] sm:$0xff]  ;;  %v1891_v21 = vld [vmem:[#allocation2 + $0x30] sm:$0xff]  ;;  %s9451_s27 = sld [smem:[#allocation46_spill]] (!%p5586_p11) }
 0x259   : > { %v1890_v38 = vld [vmem:[#allocation2 + $0x28] sm:$0xff]  ;;  %v1889_v51 = vld [vmem:[#allocation2 + $0x20] sm:$0xff]  ;;  %v1888_v14 = vld [vmem:[#allocation2 + $0x18] sm:$0xff]  ;;  %s9453_s11 = sld [smem:[#allocation33_spill]] (!%p5586_p11) }
 0x25a   : > { %v1900_v4 = vld [vmem:[#allocation2 + $0x78] sm:$0xff]  ;;  %v1887_v31 = vld [vmem:[#allocation2 + $0x10] sm:$0xff]  ;;  %v1886_v44 = vld [vmem:[#allocation2 + $0x8] sm:$0xff]  ;;  %s9455_s25 = sld [smem:[#allocation48_spill]] (!%p5586_p11) }
 0x25b   : > { %5936 = vmatprep.subr.mxu0 %v1900_v4  ;;  %v1885_v19 = vld [vmem:[#allocation2] sm:$0xff]  ;;  %v1902_v63 = vld [vmem:[%s6782_s9 + $0x8] sm:$0xff]  ;;  %v2300_v11 = vld [vmem:[%s6809_s28 + $0x78] sm:$0xff] }
 0x25c   : > { %v1899_v23 = vld [vmem:[#allocation2 + $0x70] sm:$0xff]  ;;  %5937 = vmatpush3.msra.mxu0 %v1900_v4  ;;  %s9383_s8 = smov %s9382_s3  ;;  %v2017_v49 = vld [vmem:[%s9382_s3 + $0x18] sm:$0xff]  ;;  %v2298_v53 = vld [vmem:[%s6809_s28 + $0x68] sm:$0xff]  ;;  %s5515_s3 = sshll.u32 %s6755_s26, 7 }
 0x25d   : > { %5938 = vmatprep.subr.mxu0 %v1899_v23  ;;  %5980 = vmatprep.subr.mxu1 %v2017_v49  ;;  %v2016_v32 = vld [vmem:[%s9383_s8 + $0x10] sm:$0xff]  ;;  %v1904_v26 = vld [vmem:[%s6782_s9 + $0x18] sm:$0xff]  ;;  %v1905_v55 = vld [vmem:[%s6782_s9 + $0x20] sm:$0xff]  ;;  %s7663_s24 = sld [smem:[#allocation4 + %s5515_s3]] }
 0x25e   : > { %5939 = vmatpush3.msra.mxu0 %v1899_v23  ;;  %5981 = vmatpush3.msra.mxu1 %v2017_v49  ;;  %v1903_v60 = vld [vmem:[%s6782_s9 + $0x10] sm:$0xff]  ;;  %v2297_v57 = vld [vmem:[%s6809_s28 + $0x60] sm:$0xff]  ;;  %v1906_v43 = vld [vmem:[%s6782_s9 + $0x28] sm:$0xff] }
 0x25f   : > { %5940 = vmatprep.subr.mxu0 %v1898_v1  ;;  %5982 = vmatprep.subr.mxu1 %v2016_v32  ;;  %v2299_v13 = vld [vmem:[%s6809_s28 + $0x70] sm:$0xff]  ;;  %v2296_v20 = vld [vmem:[%s6809_s28 + $0x58] sm:$0xff]  ;;  %v2294_v59 = vld [vmem:[%s6809_s28 + $0x48] sm:$0xff] }
 0x260   : > { %5941 = vmatpush3.msra.mxu0 %v1898_v1  ;;  %5983 = vmatpush3.msra.mxu1 %v2016_v32  ;;  %v1907_v33 = vld [vmem:[%s6782_s9 + $0x30] sm:$0xff]  ;;  %v1908_v25 = vld [vmem:[%s6782_s9 + $0x38] sm:$0xff]  ;;  %v2293_v45 = vld [vmem:[%s6809_s28 + $0x40] sm:$0xff]  ;;  %s9417_s9 = scalar_lea.vmem %s9231_s12, %s6761_s19 }
 0x261   : > { %5942 = vmatprep.subr.mxu0 %v1897_v39  ;;  %v2295_v0 = vld [vmem:[%s6809_s28 + $0x50] sm:$0xff]  ;;  %v2292_v17 = vld [vmem:[%s6809_s28 + $0x38] sm:$0xff]  ;;  %v2015_v37 = vld [vmem:[%s9383_s8 + $0x8] sm:$0xff] }
 0x262   : > { %5943 = vmatpush3.msra.mxu0 %v1897_v39  ;;  %v2291_v28 = vld [vmem:[%s6809_s28 + $0x30] sm:$0xff]  ;;  %5984 = vmatprep.subr.mxu1 %v2015_v37  ;;  %v2290_v7 = vld [vmem:[%s6809_s28 + $0x28] sm:$0xff]  ;;  %v2014_v5 = vld [vmem:[%s9383_s8] sm:$0xff] }
 0x263   : > { %5944 = vmatprep.subr.mxu0 %v1896_v9  ;;  %5985 = vmatpush3.msra.mxu1 %v2015_v37  ;;  %v2289_v34 = vld [vmem:[%s6809_s28 + $0x20] sm:$0xff]  ;;  %v2288_v3 = vld [vmem:[%s6809_s28 + $0x18] sm:$0xff]  ;;  %v2287_v35 = vld [vmem:[%s6809_s28 + $0x10] sm:$0xff] }
 0x264   : > { %5945 = vmatpush3.msra.mxu0 %v1896_v9  ;;  %5986 = vmatprep.subr.mxu1 %v2014_v5  ;;  %v2286_v56 = vld [vmem:[%s6809_s28 + $0x8] sm:$0xff]  ;;  %v2285_v52 = vld [vmem:[%s6809_s28] sm:$0xff]  ;;  %v2179_v15 = vld [vmem:[%s6804_s7 + $0x78] sm:$0xff]  ;;  %s2770_s28 = sadd.s32 1, %s5515_s3 }
 0x265   : > { %5946 = vmatprep.subr.mxu0 %v1895_v48  ;;  %5987 = vmatpush3.msra.mxu1 %v2014_v5  ;;  %v2178_v36 = vld [vmem:[%s6804_s7 + $0x70] sm:$0xff]  ;;  %v2177_v18 = vld [vmem:[%s6804_s7 + $0x68] sm:$0xff]  ;;  %v2176_v62 = vld [vmem:[%s6804_s7 + $0x60] sm:$0xff]  ;;  %s2771_s5 = sld [smem:[#allocation4 + %s2770_s28]] }
 0x266   : > { %5947 = vmatpush3.msra.mxu0 %v1895_v48  ;;  %6000 = vmatprep.subr.mxu1 %v2179_v15  ;;  %v2175_v41 = vld [vmem:[%s6804_s7 + $0x58] sm:$0xff]  ;;  %v2174_v27 = vld [vmem:[%s6804_s7 + $0x50] sm:$0xff]  ;;  %v2173_v16 = vld [vmem:[%s6804_s7 + $0x48] sm:$0xff] }
 0x267   : > { %5948 = vmatprep.subr.mxu0 %v1894_v40  ;;  %v2172_v54 = vld [vmem:[%s6804_s7 + $0x40] sm:$0xff]  ;;  %v2171_v47 = vld [vmem:[%s6804_s7 + $0x38] sm:$0xff]  ;;  %v2170_v58 = vld [vmem:[%s6804_s7 + $0x30] sm:$0xff] }
 0x268   : > { %5949 = vmatpush3.msra.mxu0 %v1894_v40  ;;  %v2169_v46 = vld [vmem:[%s6804_s7 + $0x28] sm:$0xff]  ;;  %v2168_v24 = vld [vmem:[%s6804_s7 + $0x20] sm:$0xff]  ;;  %v2167_v4 = vld [vmem:[%s6804_s7 + $0x18] sm:$0xff] }
 0x269   : > { %5950 = vmatprep.subr.mxu0 %v1893_v10  ;;  %v2166_v23 = vld [vmem:[%s6804_s7 + $0x10] sm:$0xff]  ;;  %v2165_v1 = vld [vmem:[%s6804_s7 + $0x8] sm:$0xff]  ;;  %v2164_v39 = vld [vmem:[%s6804_s7] sm:$0xff]  ;;  %s2876_s7 = scvt.s32.f32 %s7663_s24 }
 0x26a   : > { %5951 = vmatpush3.msra.mxu0 %v1893_v10  ;;  %v2148_v9 = vld [vmem:[%s9384_s0] sm:$0xff]  ;;  %v2149_v48 = vld [vmem:[%s9384_s0 + $0x8] sm:$0xff]  ;;  %v7631_v5 = vld [vmem:[%s6787_s2 + $0x50] sm:$0xff] }
 0x26b   : > { %5952 = vmatprep.subr.mxu0 %v1892_v2  ;;  %v7621_v37 = vld [vmem:[%s6787_s2 + $0x40] sm:$0xff]  ;;  %p2772_p10 = scmp.gt.s32.totalorder %s2771_s5, 0  ;;  %s9452_s5 = sld [smem:[#allocation47_spill]] (!%p5586_p11) }
 0x26c   : > { %5953 = vmatpush3.msra.mxu0 %v1892_v2  ;;  %v2150_v2 = vld [vmem:[%s9384_s0 + $0x10] sm:$0xff] }
 0x26d   : > { %5954 = vmatprep.subr.mxu0 %v1891_v21  ;;  %s8316_s3 = scalar_select %p2772_p10, 1, 0 }
 0x26e   : > { %5955 = vmatpush3.msra.mxu0 %v1891_v21  ;;  %v2151_v21 = vld [vmem:[%s9384_s0 + $0x18] sm:$0xff] }
 0x26f   : > { %5956 = vmatprep.subr.mxu0 %v1890_v38 }
 0x270   : > { %5957 = vmatpush3.msra.mxu0 %v1890_v38 }
 0x271   : > { %5958 = vmatprep.subr.mxu0 %v1889_v51 }
 0x272   : > { %5959 = vmatpush3.msra.mxu0 %v1889_v51 }
 0x273   : > { %5960 = vmatprep.subr.mxu0 %v1888_v14 }
 0x274   : > { %5961 = vmatpush3.msra.mxu0 %v1888_v14 }
 0x275   : > { %5962 = vmatprep.subr.mxu0 %v1887_v31 }
 0x276   : > { %5963 = vmatpush3.msra.mxu0 %v1887_v31  ;;  %v2152_v31 = vld [vmem:[%s9384_s0 + $0x20] sm:$0xff] }
 0x277   : > { %5964 = vmatprep.subr.mxu0 %v1886_v44 }
 0x278   : > { %5965 = vmatpush3.msra.mxu0 %v1886_v44 }
 0x279   : > { %5966 = vmatprep.subr.mxu0 %v1885_v19 }
 0x27a   : > { %5967 = vmatpush3.msra.mxu0 %v1885_v19  ;;  %v2153_v19 = vld [vmem:[%s9384_s0 + $0x28] sm:$0xff] }
 0x27b   : > { %5969 = vmatmul.mubr.f32.vlgmr.msra.gmra.mxu0 %v1902_v63  ;;  %6044 = vmatprep.subr.mxu0 %v2300_v11 }
 0x27c   : > { %5971 = vmatprep.mubr.f32.mxu0 %v1903_v60  ;;  %6045 = vmatpush3.msra.mxu0 %v2300_v11 }
 0x27d   : > { %6046 = vmatprep.subr.mxu0 %v2299_v13 }
 0x27e   : > { %6047 = vmatpush3.msra.mxu0 %v2299_v13  ;;  %v2154_v13 = vld [vmem:[%s9384_s0 + $0x30] sm:$0xff] }
 0x27f   : > { %5972 = vmatmul.mubr.f32.gmra.mxu0 %v1904_v26  ;;  %6048 = vmatprep.subr.mxu0 %v2298_v53 }
 0x280   : > { %5974 = vmatprep.mubr.f32.mxu0 %v1905_v55  ;;  %6049 = vmatpush3.msra.mxu0 %v2298_v53  ;;  %v2155_v53 = vld [vmem:[%s9384_s0 + $0x38] sm:$0xff] }
 0x281   : > { %6050 = vmatprep.subr.mxu0 %v2297_v57 }
 0x282   : > { %6051 = vmatpush3.msra.mxu0 %v2297_v57 }
 0x283   : > { %5975 = vmatmul.mubr.f32.gmra.mxu0 %v1906_v43  ;;  %6052 = vmatprep.subr.mxu0 %v2296_v20 }
 0x284   : > { %5977 = vmatprep.mubr.f32.mxu0 %v1907_v33  ;;  %6053 = vmatpush3.msra.mxu0 %v2296_v20  ;;  %v2414_v20 = vld [vmem:[%s6787_s2] sm:$0xff]  ;;  %v7587_v33 = vld [vmem:[%s6787_s2 + $0x8] sm:$0xff] }
 0x285   : > { %6054 = vmatprep.subr.mxu0 %v2295_v0 }
 0x286   : > { %6055 = vmatpush3.msra.mxu0 %v2295_v0  ;;  %v7591_v0 = vld [vmem:[%s6787_s2 + $0x10] sm:$0xff] }
 0x287   : > { %5978 = vmatmul.mubr.f32.gmra.mxu0 %v1908_v25  ;;  %6056 = vmatprep.subr.mxu0 %v2294_v59  ;;  %v7598_v25 = vld [vmem:[%s6787_s2 + $0x18] sm:$0xff] }
 0x288   : > { %6057 = vmatpush3.msra.mxu0 %v2294_v59  ;;  %v7601_v59 = vld [vmem:[%s6787_s2 + $0x20] sm:$0xff] }
 0x289   : > { %6058 = vmatprep.subr.mxu0 %v2293_v45 }
 0x28a   : > { %6059 = vmatpush3.msra.mxu0 %v2293_v45  ;;  %v7608_v45 = vld [vmem:[%s6787_s2 + $0x28] sm:$0xff] }
 0x28b   : > { %6060 = vmatprep.subr.mxu0 %v2292_v17 }
 0x28c   : > { %6061 = vmatpush3.msra.mxu0 %v2292_v17  ;;  %v7611_v17 = vld [vmem:[%s6787_s2 + $0x30] sm:$0xff] }
 0x28d   : > { %6062 = vmatprep.subr.mxu0 %v2291_v28 }
 0x28e   : > { %6063 = vmatpush3.msra.mxu0 %v2291_v28  ;;  %v7618_v28 = vld [vmem:[%s6787_s2 + $0x38] sm:$0xff] }
 0x28f   : > { %6064 = vmatprep.subr.mxu0 %v2290_v7 }
 0x290   : > { %6065 = vmatpush3.msra.mxu0 %v2290_v7  ;;  %v7628_v7 = vld [vmem:[%s6787_s2 + $0x48] sm:$0xff] }
 0x291   : > { %6066 = vmatprep.subr.mxu0 %v2289_v34 }
 0x292   : > { %6067 = vmatpush3.msra.mxu0 %v2289_v34  ;;  %v7638_v34 = vld [vmem:[%s6787_s2 + $0x58] sm:$0xff] }
 0x293   : > { %6068 = vmatprep.subr.mxu0 %v2288_v3 }
 0x294   : > { %6069 = vmatpush3.msra.mxu0 %v2288_v3  ;;  %v7641_v3 = vld [vmem:[%s6787_s2 + $0x60] sm:$0xff] }
 0x295   : > { %6070 = vmatprep.subr.mxu0 %v2287_v35 }
 0x296   : > { %6071 = vmatpush3.msra.mxu0 %v2287_v35  ;;  %v7648_v35 = vld [vmem:[%s6787_s2 + $0x68] sm:$0xff] }
 0x297   : > { %6072 = vmatprep.subr.mxu0 %v2286_v56 }
 0x298   : > { %6073 = vmatpush3.msra.mxu0 %v2286_v56  ;;  %v7651_v56 = vld [vmem:[%s6787_s2 + $0x70] sm:$0xff] }
 0x299   : > { %6074 = vmatprep.subr.mxu0 %v2285_v52 }
 0x29a   : > { %6075 = vmatpush3.msra.mxu0 %v2285_v52  ;;  %v7658_v52 = vld [vmem:[%s6787_s2 + $0x78] sm:$0xff] }
 0x33b   : > { %v7507_v50 = vpop.f32.mrf.mxu0 }
 0x33d   : > { %v7509_v61 = vpop.f32.mrf.mxu0 }
 0x33e   : > { %5988 = vmatprep.mubr.msk.f32.mxu1 %vm2018_vm10, %v7509_v61 }
 0x33f   : > { %v7514_v42 = vpop.f32.mrf.mxu0  ;;  %5989 = vmatmul.mubr.msk.f32.vlgmr.msra.gmra.mxu1 %vm2018_vm10, %v7507_v50 }
 0x340   : > { %6001 = vmatpush3.msra.mxu1 %v2179_v15  ;;  %v2877_v15 = vstv %s2876_s7 }
 0x341   : > { %v7519_v30 = vpop.f32.mrf.mxu0  ;;  %6002 = vmatprep.subr.mxu1 %v2178_v36  ;;  %6417 = vrcp.f32 %v2877_v15 }
 0x342   : > { %5991 = vmatprep.mubr.msk.f32.mxu1 %vm2018_vm10, %v7519_v30  ;;  %6003 = vmatpush3.msra.mxu1 %v2178_v36 }
 0x343   : > { %v7524_v6 = vpop.f32.mrf.mxu0  ;;  %5992 = vmatmul.mubr.msk.f32.gmra.mxu1 %vm2018_vm10, %v7514_v42  ;;  %6004 = vmatprep.subr.mxu1 %v2177_v18 }
 0x344   : > { %6005 = vmatpush3.msra.mxu1 %v2177_v18 }
 0x345   : > { %v7529_v29 = vpop.f32.mrf.mxu0  ;;  %6006 = vmatprep.subr.mxu1 %v2176_v62 }
 0x346   : > { %5994 = vmatprep.mubr.msk.f32.mxu1 %vm2018_vm10, %v7529_v29  ;;  %6007 = vmatpush3.msra.mxu1 %v2176_v62 }
 0x347   : > { %v5979_v8 = vpop.f32.mrf.mxu0  ;;  %5995 = vmatmul.mubr.msk.f32.gmra.mxu1 %vm2018_vm10, %v7524_v6  ;;  %6008 = vmatprep.subr.mxu1 %v2175_v41 }
 0x348   : > { %6128 = vmatprep.subr.mxu0 %v5979_v8  ;;  %6009 = vmatpush3.msra.mxu1 %v2175_v41 }
 0x349   : > { %v2005_v12 = vpop.f32.mrf.mxu0  ;;  %6010 = vmatprep.subr.mxu1 %v2174_v27 }
 0x34a   : > { %5997 = vmatprep.mubr.msk.f32.mxu1 %vm2018_vm10, %v2005_v12  ;;  %6011 = vmatpush3.msra.mxu1 %v2174_v27 }
 0x34b   : > { %5998 = vmatmul.mubr.msk.f32.gmra.mxu1 %vm2018_vm10, %v5979_v8  ;;  %6012 = vmatprep.subr.mxu1 %v2173_v16 }
 0x34c   : > { %6013 = vmatpush3.msra.mxu1 %v2173_v16 }
 0x34d   : > { %6014 = vmatprep.subr.mxu1 %v2172_v54 }
 0x34e   : > { %6015 = vmatpush3.msra.mxu1 %v2172_v54 }
 0x34f   : > { %6016 = vmatprep.subr.mxu1 %v2171_v47 }
 0x350   : > { %6017 = vmatpush3.msra.mxu1 %v2171_v47 }
 0x351   : > { %6018 = vmatprep.subr.mxu1 %v2170_v58 }
 0x352   : > { %6019 = vmatpush3.msra.mxu1 %v2170_v58 }
 0x353   : > { %6020 = vmatprep.subr.mxu1 %v2169_v46 }
 0x354   : > { %6021 = vmatpush3.msra.mxu1 %v2169_v46 }
 0x355   : > { %6022 = vmatprep.subr.mxu1 %v2168_v24 }
 0x356   : > { %6023 = vmatpush3.msra.mxu1 %v2168_v24 }
 0x357   : > { %6024 = vmatprep.subr.mxu1 %v2167_v4 }
 0x358   : > { %6025 = vmatpush3.msra.mxu1 %v2167_v4 }
 0x359   : > { %6026 = vmatprep.subr.mxu1 %v2166_v23 }
 0x35a   : > { %6027 = vmatpush3.msra.mxu1 %v2166_v23 }
 0x35b   : > { %6028 = vmatprep.subr.mxu1 %v2165_v1 }
 0x35c   : > { %6029 = vmatpush3.msra.mxu1 %v2165_v1 }
 0x35d   : > { %6030 = vmatprep.subr.mxu1 %v2164_v39 }
 0x35e   : > { %6031 = vmatpush3.msra.mxu1 %v2164_v39 }
 0x3ff   : > { %v5990_v22 = vpop.f32.mrf.mxu1 }
 0x400   : > { %v2157_v32 = vmul.f32 %v5990_v22, %v2149_v48  ;;  %v3523_v48 = vld [vmem:[%s6848_s29 + $0x18] sm:$0xff] }
 0x401   : > { %v2109_v40 = vpop.f32.mrf.mxu1 }
 0x402   : > { %v2156_v49 = vmul.f32 %v2148_v9, %v2109_v40  ;;  %v3522_v40 = vld [vmem:[%s6848_s29 + $0x10] sm:$0xff] }
 0x403   : > { %v5993_v10 = vpop.f32.mrf.mxu1 }
 0x404   : > { %6032 = vmatprep.mubr.f32.mxu1 %v2156_v49  ;;  %6076 = vmatprep.mubr.f32.mxu0 %v2156_v49  ;;  %v2159_v44 = vmul.f32 %v5993_v10, %v2151_v21  ;;  %v3521_v49 = vld [vmem:[%s6848_s29 + $0x8] sm:$0xff]  ;;  %v7703_v10 = vstv %s7663_s24  ;;  %v9386_v21 = vld [vmem:[#allocation7_spill] sm:$0xff]  ;;  %s9434_s24 = sld [smem:[#allocation44_spill]] }
 0x405   : > { %v2119_v38 = vpop.f32.mrf.mxu1  ;;  %6033 = vmatmul.mubr.f32.vlgmr.msra.gmra.mxu1 %v2157_v32  ;;  %6077 = vmatmul.mubr.f32.vlgmr.msra.gmra.mxu0 %v2157_v32  ;;  %v3520_v32 = vld [vmem:[%s6848_s29] sm:$0xff]  ;;  %vm2828_vm5 = vcmp.lt.s32.totalorder %v9386_v21, %v7703_v10 }
 0x406   : > { %v2158_v51 = vmul.f32 %v2150_v2, %v2119_v38  ;;  %6129 = vmatpush3.msra.mxu0 %v5979_v8  ;;  %v9385_v2 = vld [vmem:[#allocation8_spill] sm:$0xff]  ;;  %v6610_v38 = vmov 0.0  }
 0x407   : > { %6130 = vmatprep.subr.mxu0 %v2005_v12  ;;  %v5996_v14 = vpop.f32.mrf.mxu1  ;;  %vm2829_vm4 = vcmp.lt.s32.totalorder %v9385_v2, %v7703_v10 }
 0x408   : > { %6131 = vmatpush3.msra.mxu0 %v2005_v12  ;;  %6035 = vmatprep.mubr.f32.mxu1 %v2158_v51  ;;  %v2161_v26 = vmul.f32 %v5996_v14, %v2153_v19  ;;  %v9388_v14 = vld [vmem:[#allocation10_spill] sm:$0xff] }
 0x409   : > { %6079 = vmatprep.mubr.f32.mxu0 %v2158_v51  ;;  %6132 = vmatprep.subr.mxu0 %v7524_v6  ;;  %v2129_v63 = vpop.f32.mrf.mxu1  ;;  %v7710_v51 = vsel %vm2829_vm4, 1.0, %v6610_v38  ;;  %vm2831_vm6 = vcmp.lt.s32.totalorder %v9388_v14, %v7703_v10 }
 0x40a   : > { %v2160_v11 = vmul.f32 %v2152_v31, %v2129_v63  ;;  %6036 = vmatmul.mubr.f32.gmra.mxu1 %v2159_v44  ;;  %6080 = vmatmul.mubr.f32.gmra.mxu0 %v2159_v44  ;;  %9387 = vst [vmem:[#allocation8_spill] sm:$0xff] %v7710_v51  ;;  %v7717_v44 = vsel %vm2828_vm5, 1.0, %v6610_v38  ;;  %v9390_v63 = vld [vmem:[#allocation9_spill] sm:$0xff]  ;;  %s9435_s7 = scalar_lea.vmem %s9434_s24, %s6761_s19 }
 0x40b   : > { %6133 = vmatpush3.msra.mxu0 %v7524_v6  ;;  %v5999_v60 = vpop.f32.mrf.mxu1  ;;  %9389 = vst [vmem:[#allocation7_spill] sm:$0xff] %v7717_v44  ;;  %vm2830_vm7 = vcmp.lt.s32.totalorder %v9390_v63, %v7703_v10 }
 0x40c   : > { %6134 = vmatprep.subr.mxu0 %v7529_v29  ;;  %6038 = vmatprep.mubr.f32.mxu1 %v2160_v11  ;;  %v2163_v43 = vmul.f32 %v5999_v60, %v2155_v53  ;;  %v7726_v60 = vsel %vm2831_vm6, 1.0, %v6610_v38 }
 0x40d   : > { %6135 = vmatpush3.msra.mxu0 %v7529_v29  ;;  %6082 = vmatprep.mubr.f32.mxu0 %v2160_v11  ;;  %v2139_v55 = vpop.f32.mrf.mxu1  ;;  %9391 = vst [vmem:[#allocation10_spill] sm:$0xff] %v7726_v60 }
 0x40e   : > { %6136 = vmatprep.subr.mxu0 %v7514_v42  ;;  %v2162_v57 = vmul.f32 %v2154_v13, %v2139_v55  ;;  %6039 = vmatmul.mubr.f32.gmra.mxu1 %v2161_v26  ;;  %v7735_v55 = vsel %vm2830_vm7, 1.0, %v6610_v38 }
 0x40f   : > { %6083 = vmatmul.mubr.f32.gmra.mxu0 %v2161_v26  ;;  %v9392_v26 = vld [vmem:[#allocation12_spill] sm:$0xff]  ;;  %9393 = vst [vmem:[#allocation9_spill] sm:$0xff] %v7735_v55 }
 0x410   : > { %6137 = vmatpush3.msra.mxu0 %v7514_v42  ;;  %6041 = vmatprep.mubr.f32.mxu1 %v2162_v57  ;;  %vm2833_vm8 = vcmp.lt.s32.totalorder %v9392_v26, %v7703_v10 }
 0x411   : > { %6138 = vmatprep.subr.mxu0 %v7519_v30  ;;  %6085 = vmatprep.mubr.f32.mxu0 %v2162_v57  ;;  %v9394_v57 = vld [vmem:[#allocation11_spill] sm:$0xff] }
 0x412   : > { %6139 = vmatpush3.msra.mxu0 %v7519_v30  ;;  %6042 = vmatmul.mubr.f32.gmra.mxu1 %v2163_v43  ;;  %vm2832_vm9 = vcmp.lt.s32.totalorder %v9394_v57, %v7703_v10 }
 0x413   : > { %6140 = vmatprep.subr.mxu0 %v7507_v50  ;;  %6086 = vmatmul.mubr.f32.gmra.mxu0 %v2163_v43 }
 0x414   : > { %6141 = vmatpush3.msra.mxu0 %v7507_v50  ;;  %6104 = vmatprep.mubr.msk.f32.mxu1 %vm2430_vm3, %v2414_v20  ;;  %v6418_v50 = vpop.eup %6417 }
 0x415   : > { %6142 = vmatprep.subr.mxu0 %v7509_v61  ;;  %6144 = vmatprep.mubr.msk.f32.mxu0 %vm2430_vm3, %v2414_v20  ;;  %6334 = vpush %v6418_v50 }
 0x416   : > { %6143 = vmatpush3.msra.mxu0 %v7509_v61 }
 0x417   : > { %6145 = vmatmul.mubr.msk.f32.vlgmr.msra.gmra.mxu0 %vm2430_vm3, %v7587_v33 }
 0x418   : > { %6147 = vmatprep.mubr.msk.f32.mxu0 %vm2430_vm3, %v7591_v0 }
 0x41b   : > { %6148 = vmatmul.mubr.msk.f32.gmra.mxu0 %vm2430_vm3, %v7598_v25 }
 0x41c   : > { %6150 = vmatprep.mubr.msk.f32.mxu0 %vm2430_vm3, %v7601_v59 }
 0x41f   : > { %6151 = vmatmul.mubr.msk.f32.gmra.mxu0 %vm2430_vm3, %v7608_v45 }
 0x420   : > { %6153 = vmatprep.mubr.msk.f32.mxu0 %vm2430_vm3, %v7611_v17 }
 0x423   : > { %6154 = vmatmul.mubr.msk.f32.gmra.mxu0 %vm2430_vm3, %v7618_v28 }
 0x424   : > { %6156 = vmatprep.mubr.msk.f32.mxu0 %vm2430_vm3, %v7621_v37 }
 0x427   : > { %6157 = vmatmul.mubr.msk.f32.gmra.mxu0 %vm2430_vm3, %v7628_v7 }
 0x428   : > { %6159 = vmatprep.mubr.msk.f32.mxu0 %vm2430_vm3, %v7631_v5 }
 0x42b   : > { %6160 = vmatmul.mubr.msk.f32.gmra.mxu0 %vm2430_vm3, %v7638_v34 }
 0x42c   : > { %6162 = vmatprep.mubr.msk.f32.mxu0 %vm2430_vm3, %v7641_v3 }
 0x42f   : > { %6163 = vmatmul.mubr.msk.f32.gmra.mxu0 %vm2430_vm3, %v7648_v35 }
 0x430   : > { %6165 = vmatprep.mubr.msk.f32.mxu0 %vm2430_vm3, %v7651_v56 }
 0x433   : > { %6166 = vmatmul.mubr.msk.f32.gmra.mxu0 %vm2430_vm3, %v7658_v52 }
 0x446   : > { %s6335_s2 = spop %6334 }
 0x4c5   : > { %v6034_v61 = vpop.f32.mrf.mxu1  ;;  %v6078_v36 = vpop.f32.mrf.mxu0 }
 0x4c7   : > { %v2246_v42 = vpop.f32.mrf.mxu1  ;;  %v2367_v18 = vpop.f32.mrf.mxu0 }
 0x4ca   : > { %v6037_v30 = vpop.f32.mrf.mxu1  ;;  %v6081_v62 = vpop.f32.mrf.mxu0 }
 0x4cc   : > { %v2256_v6 = vpop.f32.mrf.mxu1  ;;  %v2377_v41 = vpop.f32.mrf.mxu0 }
 0x4ce   : > { %v6040_v29 = vpop.f32.mrf.mxu1 }
 0x4cf   : > { %v6084_v27 = vpop.f32.mrf.mxu0  ;;  %v2411_v24 = vadd.f32 %v6078_v36, %v6040_v29  ;;  %v9401_v29 = vld [vmem:[#allocation15_spill] sm:$0xff] }
 0x4d0   : > { %v2266_v8 = vpop.f32.mrf.mxu1  ;;  %v2407_v22 = vsub.f32 %v6034_v61, %v6084_v27  ;;  %vm2836_vm14 = vcmp.lt.s32.totalorder %v9401_v29, %v7703_v10 }
 0x4d1   : > { %v2387_v16 = vpop.f32.mrf.mxu0  ;;  %v2410_v4 = vadd.f32 %v2367_v18, %v2266_v8 }
 0x4d2   : > { %v6043_v12 = vpop.f32.mrf.mxu1  ;;  %v2406_v9 = vsub.f32 %v2246_v42, %v2387_v16 }
 0x4d3   : > { %v2413_v54 = vadd.f32 %v6081_v62, %v6043_v12  ;;  %v6087_v46 = vpop.f32.mrf.mxu0 }
 0x4d4   : > { %v2276_v47 = vpop.f32.mrf.mxu1  ;;  %v2409_v1 = vsub.f32 %v6037_v30, %v6087_v46  ;;  %v9400_v30 = vld [vmem:[#allocation16_spill] sm:$0xff] }
 0x4d5   : > { %v2412_v58 = vadd.f32 %v2377_v41, %v2276_v47  ;;  %6088 = vmatprep.subr.mxu1 %v2413_v54  ;;  %v2397_v23 = vpop.f32.mrf.mxu0  ;;  %vm2837_vm13 = vcmp.lt.s32.totalorder %v9400_v30, %v7703_v10 }
 0x4d6   : > { %6089 = vmatpush3.msra.mxu1 %v2413_v54  ;;  %v2408_v39 = vsub.f32 %v2256_v6, %v2397_v23 }
 0x4d7   : > { %6090 = vmatprep.subr.mxu1 %v2412_v58 }
 0x4d8   : > { %6091 = vmatpush3.msra.mxu1 %v2412_v58 }
 0x4d9   : > { %6092 = vmatprep.subr.mxu1 %v2411_v24 }
 0x4da   : > { %6093 = vmatpush3.msra.mxu1 %v2411_v24 }
 0x4db   : > { %6094 = vmatprep.subr.mxu1 %v2410_v4 }
 0x4dc   : > { %6095 = vmatpush3.msra.mxu1 %v2410_v4 }
 0x4dd   : > { %6096 = vmatprep.subr.mxu1 %v2409_v1 }
 0x4de   : > { %6097 = vmatpush3.msra.mxu1 %v2409_v1 }
 0x4df   : > { %6098 = vmatprep.subr.mxu1 %v2408_v39 }
 0x4e0   : > { %6099 = vmatpush3.msra.mxu1 %v2408_v39  ;;  %v7795_v39 = vsel %vm2837_vm13, 1.0, %v6610_v38 }
 0x4e1   : > { %6100 = vmatprep.subr.mxu1 %v2407_v22  ;;  %9403 = vst [vmem:[#allocation16_spill] sm:$0xff] %v7795_v39 }
 0x4e2   : > { %6101 = vmatpush3.msra.mxu1 %v2407_v22  ;;  %v7798_v22 = vsel %vm2836_vm14, 1.0, %v6610_v38 }
 0x4e3   : > { %6102 = vmatprep.subr.mxu1 %v2406_v9  ;;  %9404 = vst [vmem:[#allocation15_spill] sm:$0xff] %v7798_v22 }
 0x4e4   : > { %6103 = vmatpush3.msra.mxu1 %v2406_v9 }
 0x4e5   : > { %6105 = vmatmul.mubr.msk.f32.vlgmr.msra.gmra.mxu1 %vm2430_vm3, %v7587_v33  ;;  %6168 = vmatprep.subr.mxu1 %v3523_v48 }
 0x4e6   : > { %6107 = vmatprep.mubr.msk.f32.mxu1 %vm2430_vm3, %v7591_v0  ;;  %6169 = vmatpush3.msra.mxu1 %v3523_v48 }
 0x4e7   : > { %6170 = vmatprep.subr.mxu1 %v3522_v40 }
 0x4e8   : > { %6171 = vmatpush3.msra.mxu1 %v3522_v40 }
 0x4e9   : > { %6108 = vmatmul.mubr.msk.f32.gmra.mxu1 %vm2430_vm3, %v7598_v25  ;;  %6172 = vmatprep.subr.mxu1 %v3521_v49 }
 0x4ea   : > { %6110 = vmatprep.mubr.msk.f32.mxu1 %vm2430_vm3, %v7601_v59  ;;  %6173 = vmatpush3.msra.mxu1 %v3521_v49  ;;  %v7745_v59 = vsel %vm2833_vm8, 1.0, %v6610_v38  ;;  %v9405_v49 = vld [vmem:[#allocation18_spill] sm:$0xff] }
 0x4eb   : > { %6174 = vmatprep.subr.mxu1 %v3520_v32  ;;  %9395 = vst [vmem:[#allocation12_spill] sm:$0xff] %v7745_v59  ;;  %vm2839_vm15 = vcmp.lt.s32.totalorder %v9405_v49, %v7703_v10 }
 0x4ec   : > { %6175 = vmatpush3.msra.mxu1 %v3520_v32 }
 0x4ed   : > { %6111 = vmatmul.mubr.msk.f32.gmra.mxu1 %vm2430_vm3, %v7608_v45 }
 0x4ee   : > { %6113 = vmatprep.mubr.msk.f32.mxu1 %vm2430_vm3, %v7611_v17 }
 0x4f1   : > { %6114 = vmatmul.mubr.msk.f32.gmra.mxu1 %vm2430_vm3, %v7618_v28 }
 0x4f2   : > { %6116 = vmatprep.mubr.msk.f32.mxu1 %vm2430_vm3, %v7621_v37  ;;  %v9396_v37 = vld [vmem:[#allocation14_spill] sm:$0xff] }
 0x4f3   : > { %vm2835_vm11 = vcmp.lt.s32.totalorder %v9396_v37, %v7703_v10 }
 0x4f4   : > { %v7767_v18 = vsel %vm2835_vm11, 1.0, %v6610_v38 }
 0x4f5   : > { %6117 = vmatmul.mubr.msk.f32.gmra.mxu1 %vm2430_vm3, %v7628_v7  ;;  %9399 = vst [vmem:[#allocation14_spill] sm:$0xff] %v7767_v18 }
 0x4f6   : > { %6119 = vmatprep.mubr.msk.f32.mxu1 %vm2430_vm3, %v7631_v5 }
 0x4f9   : > { %6120 = vmatmul.mubr.msk.f32.gmra.mxu1 %vm2430_vm3, %v7638_v34 }
 0x4fa   : > { %6122 = vmatprep.mubr.msk.f32.mxu1 %vm2430_vm3, %v7641_v3  ;;  %v7756_v3 = vsel %vm2832_vm9, 1.0, %v6610_v38 }
 0x4fb   : > { %9397 = vst [vmem:[#allocation11_spill] sm:$0xff] %v7756_v3 }
 0x4fd   : > { %6123 = vmatmul.mubr.msk.f32.gmra.mxu1 %vm2430_vm3, %v7648_v35  ;;  %v9398_v35 = vld [vmem:[#allocation13_spill] sm:$0xff] }
 0x4fe   : > { %6125 = vmatprep.mubr.msk.f32.mxu1 %vm2430_vm3, %v7651_v56  ;;  %vm2834_vm12 = vcmp.lt.s32.totalorder %v9398_v35, %v7703_v10 }
 0x4ff   : > { %v7784_v54 = vsel %vm2834_vm12, 1.0, %v6610_v38 }
 0x500   : > { %9402 = vst [vmem:[#allocation13_spill] sm:$0xff] %v7784_v54 }
 0x501   : > { %6126 = vmatmul.mubr.msk.f32.gmra.mxu1 %vm2430_vm3, %v7658_v52 }
 0x5a5   : > { %v7714_v31 = vpop.f32.mrf.mxu1 }
 0x5a6   : > { %v2883_v19 = vmul.f32 %v7714_v31, %v7710_v51 }
 0x5a7   : > { %v7723_v11 = vpop.f32.mrf.mxu1 }
 0x5a8   : > { %v2882_v13 = vmul.f32 %v7717_v44, %v7723_v11  ;;  %v2936_v43 = vmul.f32 %v2883_v19, %v2883_v19  ;;  %v2899_v45 = vsel %vm2018_vm10, %v2883_v19, 0.0  ;;  %v9406_v19 = vld [vmem:[#allocation17_spill] sm:$0xff] }
 0x5a9   : > { %v7732_v53 = vpop.f32.mrf.mxu1  ;;  %vm2838_vm0 = vcmp.lt.s32.totalorder %v9406_v19, %v7703_v10 }
 0x5aa   : > { %v2898_v20 = vsel %vm2018_vm10, %v2882_v13, 0.0  ;;  %v2935_v33 = vmul.f32 %v2882_v13, %v2882_v13  ;;  %v2885_v0 = vmul.f32 %v7732_v53, %v7726_v60  ;;  %v2952_v56 = vsel %vm2018_vm10, %v2936_v43, 0.0 }
 0x5ab   : > { %v7742_v25 = vpop.f32.mrf.mxu1  ;;  %v2900_v7 = vadd.f32 %v2899_v45, %v2898_v20  ;;  %v9407_v45 = vld [vmem:[#allocation20_spill] sm:$0xff] }
 0x5ac   : > { %v2951_v17 = vsel %vm2018_vm10, %v2935_v33, 0.0  ;;  %v2884_v28 = vmul.f32 %v7735_v55, %v7742_v25  ;;  %v2938_v5 = vmul.f32 %v2885_v0, %v2885_v0  ;;  %v2903_v62 = vsel %vm2018_vm10, %v2885_v0, 0.0 }
 0x5ad   : > { %v7753_v34 = vpop.f32.mrf.mxu1  ;;  %v2953_v61 = vadd.f32 %v2952_v56, %v2951_v17  ;;  %v7817_v0 = vsel %vm2839_vm15, 1.0, %v6610_v38  ;;  %vm2841_vm1 = vcmp.lt.s32.totalorder %v9407_v45, %v7703_v10 }
 0x5ae   : > { %v2901_v52 = vsel %vm2018_vm10, %v2884_v28, 0.0  ;;  %v2937_v15 = vmul.f32 %v2884_v28, %v2884_v28  ;;  %v2887_v50 = vmul.f32 %v7753_v34, %v7745_v59  ;;  %v2956_v27 = vsel %vm2018_vm10, %v2938_v5, 0.0 }
 0x5af   : > { %v2902_v36 = vadd.f32 %v2901_v52, %v2900_v7  ;;  %v7764_v42 = vpop.f32.mrf.mxu1  ;;  %v9408_v7 = vld [vmem:[#allocation19_spill] sm:$0xff]  ;;  %v7845_v29 = vsel %vm2841_vm1, 1.0, %v6610_v38 }
 0x5b0   : > { %v2954_v6 = vsel %vm2018_vm10, %v2937_v15, 0.0  ;;  %v2886_v41 = vmul.f32 %v7756_v3, %v7764_v42  ;;  %v2940_v47 = vmul.f32 %v2887_v50, %v2887_v50  ;;  %v2907_v9 = vsel %vm2018_vm10, %v2887_v50, 0.0  ;;  %9409 = vst [vmem:[#allocation18_spill] sm:$0xff] %v7845_v29 }
 0x5b1   : > { %v2955_v8 = vadd.f32 %v2954_v6, %v2953_v61  ;;  %v2904_v16 = vadd.f32 %v2903_v62, %v2902_v36  ;;  %v7778_v12 = vpop.f32.mrf.mxu1  ;;  %vm2840_vm2 = vcmp.lt.s32.totalorder %v9408_v7, %v7703_v10  ;;  %v7834_v15 = vsel %vm2838_vm0, 1.0, %v6610_v38 }
 0x5b2   : > { %v2905_v58 = vsel %vm2018_vm10, %v2886_v41, 0.0  ;;  %v2939_v46 = vmul.f32 %v2886_v41, %v2886_v41  ;;  %v2889_v24 = vmul.f32 %v7778_v12, %v7767_v18  ;;  %v2960_v63 = vsel %vm2018_vm10, %v2940_v47, 0.0 }
 0x5b3   : > { %v2906_v4 = vadd.f32 %v2905_v58, %v2904_v16  ;;  %v2957_v23 = vadd.f32 %v2956_v27, %v2955_v8  ;;  %v7789_v1 = vpop.f32.mrf.mxu1  ;;  %v7848_v27 = vsel %vm2840_vm2, 1.0, %v6610_v38  ;;  %v9411_v58 = vld [vmem:[#allocation22_spill] sm:$0xff] }
 0x5b4   : > { %v2958_v48 = vsel %vm2018_vm10, %v2939_v46, 0.0  ;;  %v2888_v40 = vmul.f32 %v7784_v54, %v7789_v1  ;;  %v2942_v2 = vmul.f32 %v2889_v24, %v2889_v24  ;;  %v2911_v17 = vsel %vm2018_vm10, %v2889_v24, 0.0  ;;  %9410 = vst [vmem:[#allocation17_spill] sm:$0xff] %v7848_v27 }
 0x5b5   : > { %v2959_v32 = vadd.f32 %v2958_v48, %v2957_v23  ;;  %v2908_v21 = vadd.f32 %v2907_v9, %v2906_v4  ;;  %v7806_v14 = vpop.f32.mrf.mxu1  ;;  %vm2843_vm4 = vcmp.lt.s32.totalorder %v9411_v58, %v7703_v10  ;;  %v9412_v9 = vld [vmem:[#allocation21_spill] sm:$0xff] }
 0x5b6   : > { %v2909_v13 = vsel %vm2018_vm10, %v2888_v40, 0.0  ;;  %v2941_v26 = vmul.f32 %v2888_v40, %v2888_v40  ;;  %v2891_v57 = vmul.f32 %v7806_v14, %v7795_v39  ;;  %v2964_v5 = vsel %vm2018_vm10, %v2942_v2, 0.0 }
 0x5b7   : > { %v2910_v43 = vadd.f32 %v2909_v13, %v2908_v21  ;;  %v2961_v20 = vadd.f32 %v2960_v63, %v2959_v32  ;;  %v7814_v33 = vpop.f32.mrf.mxu1  ;;  %vm2842_vm5 = vcmp.lt.s32.totalorder %v9412_v9, %v7703_v10  ;;  %v7867_v63 = vsel %vm2843_vm4, 1.0, %v6610_v38 }
 0x5b8   : > { %v2962_v28 = vsel %vm2018_vm10, %v2941_v26, 0.0  ;;  %v2890_v37 = vmul.f32 %v7798_v22, %v7814_v33  ;;  %v2944_v50 = vmul.f32 %v2891_v57, %v2891_v57  ;;  %v2915_v8 = vsel %vm2018_vm10, %v2891_v57, 0.0  ;;  %9413 = vst [vmem:[#allocation20_spill] sm:$0xff] %v7867_v63 }
 0x5b9   : > { %v2963_v35 = vadd.f32 %v2962_v28, %v2961_v20  ;;  %v2912_v56 = vadd.f32 %v2911_v17, %v2910_v43  ;;  %v7828_v52 = vpop.f32.mrf.mxu1  ;;  %v7880_v28 = vsel %vm2842_vm5, 1.0, %v6610_v38 }
 0x5ba   : > { %v2913_v61 = vsel %vm2018_vm10, %v2890_v37, 0.0  ;;  %v2943_v36 = vmul.f32 %v2890_v37, %v2890_v37  ;;  %v2893_v30 = vmul.f32 %v7828_v52, %v7817_v0  ;;  %v2968_v48 = vsel %vm2018_vm10, %v2944_v50, 0.0  ;;  %9415 = vst [vmem:[#allocation22_spill] sm:$0xff] %v7880_v28 }
 0x5bb   : > { %v2914_v62 = vadd.f32 %v2913_v61, %v2912_v56  ;;  %v2965_v6 = vadd.f32 %v2964_v5, %v2963_v35  ;;  %v7839_v41 = vpop.f32.mrf.mxu1 }
 0x5bc   : > { %v2966_v16 = vsel %vm2018_vm10, %v2943_v36, 0.0  ;;  %v2892_v47 = vmul.f32 %v7834_v15, %v7839_v41  ;;  %v2946_v24 = vmul.f32 %v2893_v30, %v2893_v30  ;;  %v2919_v13 = vsel %vm2018_vm10, %v2893_v30, 0.0 }
 0x5bd   : > { %v2967_v46 = vadd.f32 %v2966_v16, %v2965_v6  ;;  %v2916_v4 = vadd.f32 %v2915_v8, %v2914_v62  ;;  %v7856_v23 = vpop.f32.mrf.mxu1 }
 0x5be   : > { %v2917_v40 = vsel %vm2018_vm10, %v2892_v47, 0.0  ;;  %v2945_v49 = vmul.f32 %v2892_v47, %v2892_v47  ;;  %v2895_v32 = vmul.f32 %v7856_v23, %v7845_v29  ;;  %v2972_v43 = vsel %vm2018_vm10, %v2946_v24, 0.0 }
 0x5bf   : > { %v2918_v2 = vadd.f32 %v2917_v40, %v2916_v4  ;;  %v2969_v21 = vadd.f32 %v2968_v48, %v2967_v46  ;;  %v7864_v19 = vpop.f32.mrf.mxu1 }
 0x5c0   : > { %v2970_v26 = vsel %vm2018_vm10, %v2945_v49, 0.0  ;;  %v2894_v57 = vmul.f32 %v7848_v27, %v7864_v19  ;;  %v2948_v37 = vmul.f32 %v2895_v32, %v2895_v32  ;;  %v2923_v36 = vsel %vm2018_vm10, %v2895_v32, 0.0 }
 0x5c1   : > { %v2971_v20 = vadd.f32 %v2970_v26, %v2969_v21  ;;  %v2920_v45 = vadd.f32 %v2919_v13, %v2918_v2  ;;  %v7874_v17 = vpop.f32.mrf.mxu1 }
 0x5c2   : > { %9414 = vst [vmem:[#allocation19_spill] sm:$0xff] %v7874_v17  ;;  %v2921_v7 = vsel %vm2018_vm10, %v2894_v57, 0.0  ;;  %v2947_v5 = vmul.f32 %v2894_v57, %v2894_v57  ;;  %v2897_v35 = vmul.f32 %v7874_v17, %v7867_v63  ;;  %v2976_v6 = vsel %vm2018_vm10, %v2948_v37, 0.0 }
 0x5c3   : > { %v2922_v56 = vadd.f32 %v2921_v7, %v2920_v45  ;;  %v2973_v50 = vadd.f32 %v2972_v43, %v2971_v20  ;;  %v7885_v61 = vpop.f32.mrf.mxu1  ;;  %v7896_v37 = vstv %s6335_s2  ;;  %s2774_s2 = scvt.s32.f32 %s8316_s3 }
 0x5c4   : > { %v2974_v30 = vsel %vm2018_vm10, %v2947_v5, 0.0  ;;  %v2896_v10 = vmul.f32 %v7880_v28, %v7885_v61  ;;  %v2950_v8 = vmul.f32 %v2897_v35, %v2897_v35  ;;  %v2927_v24 = vsel %vm2018_vm10, %v2897_v35, 0.0  ;;  %9416 = vst [vmem:[#allocation21_spill] sm:$0xff] %v7896_v37 }
 0x5c5   : > { %v2975_v38 = vadd.f32 %v2974_v30, %v2973_v50  ;;  %v2924_v62 = vadd.f32 %v2923_v36, %v2922_v56  ;;  %s2792_s29 = ssub.f32 1.0, %s2774_s2 }
 0x5c6   : > { %v2925_v16 = vsel %vm2018_vm10, %v2896_v10, 0.0  ;;  %v2949_v47 = vmul.f32 %v2896_v10, %v2896_v10  ;;  %v2980_v40 = vsel %vm2018_vm10, %v2950_v8, 0.0 }
 0x5c7   : > { %v2926_v58 = vadd.f32 %v2925_v16, %v2924_v62  ;;  %v2977_v46 = vadd.f32 %v2976_v6, %v2975_v38 }
 0x5c8   : > { %v2978_v4 = vsel %vm2018_vm10, %v2949_v47, 0.0 }
 0x5c9   : > { %v2928_v9 = vadd.f32 %v2927_v24, %v2926_v58  ;;  %v2979_v48 = vadd.f32 %v2978_v4, %v2977_v46 }
 0x5cb   : > { %v2929_v49 = vrot.slane %v2928_v9, 4  ;;  %v2981_v32 = vadd.f32 %v2980_v40, %v2979_v48  ;;  %v7931_v40 = vld [vmem:[%s9417_s9] ss:$0 sm:$0xff] }
 0x5cd   : > { %v2930_v2 = vadd.f32 %v2929_v49, %v2928_v9  ;;  %v2982_v21 = vrot.slane %v2981_v32, 4 }
 0x5cf   : > { %v2931_v13 = vrot.slane %v2930_v2, 2  ;;  %v2983_v26 = vadd.f32 %v2982_v21, %v2981_v32 }
 0x5d1   : > { %v2932_v57 = vadd.f32 %v2931_v13, %v2930_v2  ;;  %v2984_v43 = vrot.slane %v2983_v26, 2 }
 0x5d3   : > { %v2933_v20 = vrot.slane %v2932_v57, 1  ;;  %v2985_v45 = vadd.f32 %v2984_v43, %v2983_v26 }
 0x5d5   : > { %v2934_v7 = vadd.f32 %v2933_v20, %v2932_v57  ;;  %v2986_v5 = vrot.slane %v2985_v45, 1 }
 0x5d7   : > { %v2987_v35 = vadd.f32 %v2986_v5, %v2985_v45  ;;  %v7899_v56 = vmul.f32 %v7896_v37, %v2934_v7 }
 0x5d9   : > { %v2990_v50 = vmul.f32 %v7896_v37, %v2987_v35  ;;  %v2991_v36 = vmul.f32 %v7899_v56, %v7899_v56  ;;  %v2994_v46 = vsub.f32 %v7723_v11, %v7899_v56  ;;  %v2995_v24 = vsub.f32 %v7714_v31, %v7899_v56 }
 0x5da   : > { %v2996_v4 = vsub.f32 %v7742_v25, %v7899_v56  ;;  %v2997_v9 = vsub.f32 %v7732_v53, %v7899_v56  ;;  %v2998_v11 = vsub.f32 %v7764_v42, %v7899_v56  ;;  %v2999_v31 = vsub.f32 %v7753_v34, %v7899_v56  ;;  %v7950_v42 = vld [vmem:[%s9418_s4] ss:$0 sm:$0xff]  ;;  %s9454_s4 = sld [smem:[#allocation49_spill]] (!%p5586_p11) }
 0x5db   : > { %v2992_v30 = vsub.f32 %v2990_v50, %v2991_v36  ;;  %v3000_v25 = vsub.f32 %v7789_v1, %v7899_v56  ;;  %v3001_v53 = vsub.f32 %v7778_v12, %v7899_v56 }
 0x5dd   : > { %v2993_v8 = vmax.f32 %v2992_v30, 0.0 }
 0x5df   : > { %v3010_v58 = vadd.f32 1e-06, %v2993_v8 }
 0x5e1   : > { %6419 = vrsqrt.f32 %v3010_v58 }
 0x5ee   : > { %v7924_v48 = vpop.eup %6419 }
 0x5ef   : > { %v3012_v49 = vmul.f32 %v7924_v48, %v2994_v46  ;;  %v3013_v32 = vmul.f32 %v7924_v48, %v2995_v24  ;;  %v3014_v2 = vmul.f32 %v7924_v48, %v2996_v4  ;;  %v3015_v21 = vmul.f32 %v7924_v48, %v2997_v9 }
 0x5f0   : > { %v3016_v34 = vmul.f32 %v7924_v48, %v2998_v11  ;;  %v3017_v1 = vmul.f32 %v7924_v48, %v2999_v31  ;;  %v3018_v12 = vmul.f32 %v7924_v48, %v3000_v25  ;;  %v3019_v13 = vmul.f32 %v7924_v48, %v3001_v53 }
 0x5f1   : > { %v3034_v26 = vmul.f32 %v7931_v40, %v3012_v49  ;;  %v3035_v57 = vmul.f32 %v7931_v40, %v3013_v32  ;;  %v3036_v43 = vmul.f32 %v7931_v40, %v3014_v2  ;;  %v3037_v20 = vmul.f32 %v7931_v40, %v3015_v21 }
 0x5f2   : > { %v3038_v45 = vmul.f32 %v7931_v40, %v3016_v34  ;;  %v3039_v36 = vmul.f32 %v7931_v40, %v3017_v1  ;;  %v3040_v30 = vmul.f32 %v7931_v40, %v3018_v12  ;;  %v3041_v8 = vmul.f32 %v7931_v40, %v3019_v13 }
 0x5f3   : > { %v3056_v7 = vadd.f32 %v7950_v42, %v3034_v26  ;;  %v3057_v5 = vadd.f32 %v7950_v42, %v3035_v57  ;;  %v3058_v35 = vadd.f32 %v7950_v42, %v3036_v43  ;;  %v3059_v50 = vadd.f32 %v7950_v42, %v3037_v20 }
 0x5f4   : > { %v3060_v9 = vadd.f32 %v7950_v42, %v3038_v45  ;;  %v3061_v53 = vadd.f32 %v7950_v42, %v3039_v36  ;;  %v3062_v49 = vadd.f32 %v7950_v42, %v3040_v30  ;;  %v3063_v32 = vadd.f32 %v7950_v42, %v3041_v8 }
 0x5f5   : > { %v3072_v58 = vmul.f32 %v7717_v44, %v3056_v7  ;;  %v3073_v46 = vmul.f32 %v7710_v51, %v3057_v5  ;;  %v3074_v24 = vmul.f32 %v7735_v55, %v3058_v35  ;;  %v3075_v4 = vmul.f32 %v7726_v60, %v3059_v50 }
 0x5f6   : > { %v3076_v12 = vmul.f32 %v7756_v3, %v3060_v9  ;;  %v3077_v7 = vmul.f32 %v7745_v59, %v3061_v53  ;;  %v7981_v5 = vmul.f32 %v7784_v54, %v3062_v49  ;;  %v7984_v35 = vmul.f32 %v7767_v18, %v3063_v32 }
 0x5f7   : > { %v3104_v11 = vmul.f32 0.70710677, %v3072_v58  ;;  %v3105_v31 = vmul.f32 0.70710677, %v3073_v46  ;;  %v3106_v25 = vmul.f32 0.70710677, %v3074_v24 }
 0x5f8   : > { %v3107_v1 = vmul.f32 0.70710677, %v3075_v4  ;;  %v7986_v50 = vmul.f32 0.5, %v3072_v58  ;;  %v7988_v47 = vmul.f32 0.5, %v3073_v46  ;;  %v7990_v16 = vmul.f32 0.5, %v3074_v24 }
 0x5f9   : > { %v3152_v2 = vand.u32 2147483647, %v3104_v11  ;;  %v3153_v21 = vand.u32 2147483647, %v3105_v31  ;;  %v3154_v34 = vand.u32 2147483647, %v3106_v25 }
 0x5fa   : > { %v3155_v6 = vand.u32 2147483647, %v3107_v1  ;;  %vm3120_vm6 = vcmp.ge.f32.partialorder %v3104_v11, 0.0  ;;  %vm3121_vm7 = vcmp.ge.f32.partialorder %v3105_v31, 0.0  ;;  %vm3122_vm8 = vcmp.ge.f32.partialorder %v3106_v25, 0.0 }
 0x5fb   : > { %v3168_v26 = vmul.f32 0.3275911, %v3152_v2  ;;  %v3376_v57 = vsub.f32 0.0, %v3152_v2  ;;  %v3169_v43 = vmul.f32 0.3275911, %v3153_v21  ;;  %v3377_v20 = vsub.f32 0.0, %v3153_v21 }
 0x5fc   : > { %v3170_v45 = vmul.f32 0.3275911, %v3154_v34  ;;  %v3378_v8 = vsub.f32 0.0, %v3154_v34  ;;  %v3171_v49 = vmul.f32 0.3275911, %v3155_v6  ;;  %vm3123_vm9 = vcmp.ge.f32.partialorder %v3107_v1, 0.0 }
 0x5fd   : > { %v3184_v36 = vadd.f32 1.0, %v3168_v26  ;;  %v3185_v30 = vadd.f32 1.0, %v3169_v43  ;;  %v3392_v9 = vmul.f32 %v3376_v57, %v3152_v2  ;;  %v3393_v53 = vmul.f32 %v3377_v20, %v3153_v21 }
 0x5fe   : > { %v3186_v62 = vadd.f32 1.0, %v3170_v45  ;;  %v3394_v32 = vmul.f32 %v3378_v8, %v3154_v34  ;;  %v3108_v58 = vmul.f32 0.70710677, %v3076_v12  ;;  %v3109_v26 = vmul.f32 0.70710677, %v3077_v7 }
 0x5ff   : > { %6421 = vrcp.f32 %v3184_v36  ;;  %v3408_v43 = vmul.f32 1.442695, %v3392_v9  ;;  %v7992_v38 = vmul.f32 0.5, %v3075_v4  ;;  %v3187_v46 = vadd.f32 1.0, %v3171_v49 }
 0x600   : > { %6423 = vrcp.f32 %v3185_v30  ;;  %v3379_v2 = vsub.f32 0.0, %v3155_v6  ;;  %v9277_v24 = vmov -1.0   ;;  %v3410_v21 = vmul.f32 1.442695, %v3393_v53 }
 0x601   : > { %v7996_v57 = vsel %vm3120_vm6, 1.0, %v9277_v24  ;;  %6425 = vrcp.f32 %v3186_v62  ;;  %v3156_v20 = vand.u32 2147483647, %v3108_v58  ;;  %v8000_v45 = vsel %vm3121_vm7, 1.0, %v9277_v24 }
 0x602   : > { %v8004_v34 = vsel %vm3122_vm8, 1.0, %v9277_v24  ;;  %v8007_v4 = vsel %vm3123_vm9, 1.0, %v9277_v24  ;;  %v8009_v1 = vmul.f32 0.5, %v3076_v12  ;;  %v3412_v36 = vmul.f32 1.442695, %v3394_v32 }
 0x603   : > { %6427 = vrcp.f32 %v3187_v46  ;;  %v3172_v11 = vmul.f32 0.3275911, %v3156_v20  ;;  %v3157_v30 = vand.u32 2147483647, %v3109_v26  ;;  %v3395_v62 = vmul.f32 %v3379_v2, %v3155_v6 }
 0x604   : > { %6429 = vpow2.f32 %v3408_v43  ;;  %v8012_v8 = vmul.f32 0.70710677, %v7981_v5  ;;  %v8015_v31 = vmul.f32 0.70710677, %v7984_v35  ;;  %v3380_v9 = vsub.f32 0.0, %v3156_v20 }
 0x605   : > { %6431 = vpow2.f32 %v3410_v21  ;;  %v3188_v25 = vadd.f32 1.0, %v3172_v11  ;;  %v3173_v53 = vmul.f32 0.3275911, %v3157_v30  ;;  %vm3124_vm11 = vcmp.ge.f32.partialorder %v3108_v58, 0.0 }
 0x606   : > { %v3381_v49 = vsub.f32 0.0, %v3157_v30  ;;  %v3158_v12 = vand.u32 2147483647, %v8012_v8  ;;  %v3159_v32 = vand.u32 2147483647, %v8015_v31  ;;  %v8019_v46 = vmul.f32 0.5, %v3077_v7 }
 0x607   : > { %6433 = vrcp.f32 %v3188_v25  ;;  %vm3125_vm12 = vcmp.ge.f32.partialorder %v3109_v26, 0.0  ;;  %v3189_v6 = vadd.f32 1.0, %v3173_v53  ;;  %v3414_v43 = vmul.f32 1.442695, %v3395_v62 }
 0x608   : > { %6435 = vpow2.f32 %v3412_v36  ;;  %v3174_v2 = vmul.f32 0.3275911, %v3158_v12  ;;  %v3382_v10 = vsub.f32 0.0, %v3158_v12  ;;  %v8022_v21 = vsel %vm3124_vm11, 1.0, %v9277_v24 }
 0x609   : > { %v3396_v11 = vmul.f32 %v3380_v9, %v3156_v20  ;;  %v3175_v13 = vmul.f32 0.3275911, %v3159_v32  ;;  %v3383_v58 = vsub.f32 0.0, %v3159_v32  ;;  %6437 = vrcp.f32 %v3189_v6 }
 0x60a   : > { %v3397_v18 = vmul.f32 %v3381_v49, %v3157_v30  ;;  %v3190_v54 = vadd.f32 1.0, %v3174_v2  ;;  %v9419_v7 = vsub.f32 %v7814_v33, %v7899_v56  ;;  %v8035_v53 = vsel %vm3125_vm12, 1.0, %v9277_v24 }
 0x60b   : > { %v3398_v20 = vmul.f32 %v3382_v10, %v3158_v12  ;;  %v3191_v9 = vadd.f32 1.0, %v3175_v13  ;;  %v3399_v30 = vmul.f32 %v3383_v58, %v3159_v32  ;;  %v3416_v33 = vmul.f32 1.442695, %v3396_v11 }
 0x60c   : > { %v8024_v37 = vpop.eup %6421  ;;  %v3020_v25 = vmul.f32 %v7924_v48, %v9419_v7  ;;  %6439 = vrcp.f32 %v3190_v54  ;;  %v9420_v2 = vsub.f32 %v7806_v14, %v7899_v56  ;;  %v3418_v10 = vmul.f32 1.442695, %v3397_v18 }
 0x60d   : > { %v8030_v36 = vpop.eup %6423  ;;  %v3232_v62 = vmul.f32 1.0614054, %v8024_v37  ;;  %6441 = vrcp.f32 %v3191_v9  ;;  %v3420_v32 = vmul.f32 1.442695, %v3398_v20  ;;  %vm3126_vm13 = vcmp.ge.f32.partialorder %v8012_v8, 0.0 }
 0x60e   : > { %v3233_v59 = vmul.f32 1.0614054, %v8030_v36  ;;  %v3042_v49 = vmul.f32 %v7931_v40, %v3020_v25  ;;  %v3021_v7 = vmul.f32 %v7924_v48, %v9420_v2  ;;  %v8043_v3 = vpop.eup %6425  ;;  %6443 = vpow2.f32 %v3414_v43 }
 0x60f   : > { %v3248_v6 = vadd.f32 -1.4531521, %v3232_v62  ;;  %v3234_v12 = vmul.f32 1.0614054, %v8043_v3  ;;  %v3422_v25 = vmul.f32 1.442695, %v3399_v30  ;;  %6445 = vpow2.f32 %v3416_v33 }
 0x610   : > { %v3249_v26 = vadd.f32 -1.4531521, %v3233_v59  ;;  %v3064_v13 = vadd.f32 %v7950_v42, %v3042_v49  ;;  %v3043_v11 = vmul.f32 %v7931_v40, %v3021_v7  ;;  %v8049_v58 = vpop.eup %6427  ;;  %v9422_v59 = vsub.f32 %v7839_v41, %v7899_v56 }
 0x611   : > { %v3264_v54 = vmul.f32 %v8024_v37, %v3248_v6  ;;  %v6430_v43 = vpop.eup %6429  ;;  %v3250_v49 = vadd.f32 -1.4531521, %v3234_v12  ;;  %v3235_v20 = vmul.f32 1.0614054, %v8049_v58  ;;  %6447 = vpow2.f32 %v3418_v10 }
 0x612   : > { %v3265_v14 = vmul.f32 %v8030_v36, %v3249_v26  ;;  %v8053_v62 = vmul.f32 %v7798_v22, %v3064_v13  ;;  %v3022_v18 = vmul.f32 %v7924_v48, %v9422_v59  ;;  %v6432_v6 = vpop.eup %6431  ;;  %v3065_v30 = vadd.f32 %v7950_v42, %v3043_v11 }
 0x613   : > { %v3280_v9 = vadd.f32 1.4214138, %v3264_v54  ;;  %v3266_v41 = vmul.f32 %v8043_v3, %v3250_v49  ;;  %v3251_v13 = vadd.f32 -1.4531521, %v3235_v20  ;;  %6449 = vpow2.f32 %v3420_v32 }
 0x614   : > { %9421 = vst [vmem:[#allocation30_spill] sm:$0xff] %v8053_v62  ;;  %v3281_v2 = vadd.f32 1.4214138, %v3265_v14  ;;  %v8061_v7 = vmul.f32 0.70710677, %v8053_v62  ;;  %v8066_v59 = vpop.eup %6433  ;;  %6451 = vpow2.f32 %v3422_v25  ;;  %v8071_v10 = vmul.f32 %v7931_v40, %v3022_v18 }
 0x615   : > { %v3296_v26 = vmul.f32 %v8024_v37, %v3280_v9  ;;  %v6436_v12 = vpop.eup %6435  ;;  %v3282_v24 = vadd.f32 1.4214138, %v3266_v41  ;;  %v3267_v11 = vmul.f32 %v8049_v58, %v3251_v13  ;;  %v3236_v9 = vmul.f32 1.0614054, %v8066_v59 }
 0x616   : > { %v3297_v54 = vmul.f32 %v8030_v36, %v3281_v2  ;;  %v3160_v33 = vand.u32 2147483647, %v8061_v7  ;;  %v8076_v22 = vmul.f32 %v7795_v39, %v3065_v30  ;;  %v8078_v2 = vpop.eup %6437  ;;  %vm3127_vm14 = vcmp.ge.f32.partialorder %v8015_v31, 0.0 }
 0x617   : > { %v3312_v14 = vadd.f32 -0.28449672, %v3296_v26  ;;  %v3298_v18 = vmul.f32 %v8043_v3, %v3282_v24  ;;  %v3283_v60 = vadd.f32 1.4214138, %v3267_v11  ;;  %v3252_v55 = vadd.f32 -1.4531521, %v3236_v9 }
 0x618   : > { %v3313_v49 = vadd.f32 -0.28449672, %v3297_v54  ;;  %v3176_v20 = vmul.f32 0.3275911, %v3160_v33  ;;  %v3384_v32 = vsub.f32 0.0, %v3160_v33  ;;  %v3095_v31 = vmul.f32 0.5, %v7984_v35 }
 0x619   : > { %v3328_v25 = vmul.f32 %v8024_v37, %v3312_v14  ;;  %v3237_v41 = vmul.f32 1.0614054, %v8078_v2  ;;  %v8086_v54 = vpop.eup %6439  ;;  %v3314_v30 = vadd.f32 -0.28449672, %v3298_v18  ;;  %v3299_v39 = vmul.f32 %v8049_v58, %v3283_v60 }
 0x61a   : > { %v3329_v26 = vmul.f32 %v8030_v36, %v3313_v49  ;;  %v3192_v13 = vadd.f32 1.0, %v3176_v20  ;;  %v8084_v51 = vmul.f32 %v3384_v32, %v3160_v33  ;;  %v3268_v63 = vmul.f32 %v8066_v59, %v3252_v55  ;;  %v8090_v14 = vpop.eup %6441 }
 0x61b   : > { %v3344_v44 = vadd.f32 0.2548296, %v3328_v25  ;;  %v3253_v11 = vadd.f32 -1.4531521, %v3237_v41  ;;  %v3238_v9 = vmul.f32 1.0614054, %v8086_v54  ;;  %v6444_v49 = vpop.eup %6443  ;;  %v3330_v33 = vmul.f32 %v8043_v3, %v3314_v30 }
 0x61c   : > { %v3345_v24 = vadd.f32 0.2548296, %v3329_v26  ;;  %6453 = vrcp.f32 %v3192_v13  ;;  %v3315_v32 = vadd.f32 -0.28449672, %v3299_v39  ;;  %v3284_v28 = vadd.f32 1.4214138, %v3268_v63  ;;  %v6446_v29 = vpop.eup %6445 }
 0x61d   : > { %v3360_v20 = vmul.f32 %v8024_v37, %v3344_v44  ;;  %v3269_v60 = vmul.f32 %v8078_v2, %v3253_v11  ;;  %v3254_v18 = vadd.f32 -1.4531521, %v3238_v9  ;;  %v3239_v55 = vmul.f32 1.0614054, %v8090_v14 }
 0x61e   : > { %v3361_v25 = vmul.f32 %v8030_v36, %v3345_v24  ;;  %v3346_v26 = vadd.f32 0.2548296, %v3330_v33  ;;  %v3331_v41 = vmul.f32 %v8049_v58, %v3315_v32  ;;  %v3300_v13 = vmul.f32 %v8066_v59, %v3284_v28  ;;  %v6448_v63 = vpop.eup %6447 }
 0x61f   : > { %v3440_v62 = vmul.f32 %v6430_v43, %v3360_v20  ;;  %v3285_v44 = vadd.f32 1.4214138, %v3269_v60  ;;  %v3270_v37 = vmul.f32 %v8086_v54, %v3254_v18  ;;  %v3255_v39 = vadd.f32 -1.4531521, %v3239_v55 }
 0x620   : > { %v3441_v27 = vmul.f32 %v6432_v6, %v3361_v25  ;;  %v3362_v36 = vmul.f32 %v8043_v3, %v3346_v26  ;;  %v3347_v24 = vadd.f32 0.2548296, %v3331_v41  ;;  %v3316_v11 = vadd.f32 -0.28449672, %v3300_v13  ;;  %v6450_v9 = vpop.eup %6449 }
 0x621   : > { %v3456_v30 = vsub.f32 1.0, %v3440_v62  ;;  %v3301_v43 = vmul.f32 %v8078_v2, %v3285_v44  ;;  %v3286_v20 = vadd.f32 1.4214138, %v3270_v37  ;;  %v3271_v33 = vmul.f32 %v8090_v14, %v3255_v39  ;;  %v6452_v28 = vpop.eup %6451 }
 0x622   : > { %v3457_v17 = vsub.f32 1.0, %v3441_v27  ;;  %v3442_v32 = vmul.f32 %v6436_v12, %v3362_v36  ;;  %v3363_v25 = vmul.f32 %v8049_v58, %v3347_v24  ;;  %v3332_v60 = vmul.f32 %v8066_v59, %v3316_v11 }
 0x623   : > { %v3472_v6 = vmul.f32 %v3456_v30, %v7996_v57  ;;  %v3317_v3 = vadd.f32 -0.28449672, %v3301_v43  ;;  %v3302_v18 = vmul.f32 %v8086_v54, %v3286_v20  ;;  %v3287_v55 = vadd.f32 1.4214138, %v3271_v33 }
 0x624   : > { %v3473_v62 = vmul.f32 %v3457_v17, %v8000_v45  ;;  %v3458_v26 = vsub.f32 1.0, %v3442_v32  ;;  %v3443_v41 = vmul.f32 %v6444_v49, %v3363_v25  ;;  %v3348_v13 = vadd.f32 0.2548296, %v3332_v60 }
 0x625   : > { %v3488_v27 = vadd.f32 1.0, %v3472_v6  ;;  %v3333_v37 = vmul.f32 %v8078_v2, %v3317_v3  ;;  %v3318_v57 = vadd.f32 -0.28449672, %v3302_v18  ;;  %v3303_v58 = vmul.f32 %v8090_v14, %v3287_v55 }
 0x626   : > { %v3489_v44 = vadd.f32 1.0, %v3473_v62  ;;  %v3474_v17 = vmul.f32 %v3458_v26, %v8004_v34  ;;  %v3459_v45 = vsub.f32 1.0, %v3443_v41  ;;  %v3364_v39 = vmul.f32 %v8066_v59, %v3348_v13 }
 0x627   : > { %v3504_v12 = vmul.f32 %v3488_v27, %v7986_v50  ;;  %v3349_v36 = vadd.f32 0.2548296, %v3333_v37  ;;  %v3334_v49 = vmul.f32 %v8086_v54, %v3318_v57  ;;  %v3319_v24 = vadd.f32 -0.28449672, %v3303_v58 }
 0x628   : > { %v3505_v30 = vmul.f32 %v3489_v44, %v7988_v47  ;;  %v3490_v43 = vadd.f32 1.0, %v3474_v17  ;;  %v3475_v50 = vmul.f32 %v3459_v45, %v8007_v4  ;;  %v3444_v20 = vmul.f32 %v6446_v29, %v3364_v39 }
 0x629   : > { %v8118_v11 = vpop.eup %6453  ;;  %6176 = vmatprep.mubr.msk.f32.mxu1 %vm2018_vm10, %v3504_v12  ;;  %v3424_v34 = vmul.f32 1.442695, %v8084_v51  ;;  %v3365_v47 = vmul.f32 %v8078_v2, %v3349_v36  ;;  %v3350_v59 = vadd.f32 0.2548296, %v3334_v49  ;;  %v3335_v33 = vmul.f32 %v8090_v14, %v3319_v24 }
 0x62a   : > { %6177 = vmatmul.mubr.msk.f32.vlgmr.msra.gmra.mxu1 %vm2018_vm10, %v3505_v30  ;;  %v3240_v6 = vmul.f32 1.0614054, %v8118_v11  ;;  %v3506_v32 = vmul.f32 %v3490_v43, %v7990_v16  ;;  %v3491_v25 = vadd.f32 1.0, %v3475_v50  ;;  %v3460_v60 = vsub.f32 1.0, %v3444_v20 }
 0x62b   : > { %v3066_v62 = vadd.f32 %v7950_v42, %v8071_v10  ;;  %v3445_v4 = vmul.f32 %v6448_v63, %v3365_v47  ;;  %v3366_v29 = vmul.f32 %v8086_v54, %v3350_v59  ;;  %v3351_v51 = vadd.f32 0.2548296, %v3335_v33 }
 0x62c   : > { %v3256_v3 = vadd.f32 -1.4531521, %v3240_v6  ;;  %6179 = vmatprep.mubr.msk.f32.mxu1 %vm2018_vm10, %v3506_v32  ;;  %v3507_v2 = vmul.f32 %v3491_v25, %v7992_v38  ;;  %v3476_v18 = vmul.f32 %v3460_v60, %v8022_v21  ;;  %6455 = vpow2.f32 %v3424_v34 }
 0x62d   : > { %v8135_v55 = vmul.f32 0.70710677, %v8076_v22  ;;  %v3461_v16 = vsub.f32 1.0, %v3445_v4  ;;  %v3446_v27 = vmul.f32 %v6450_v9, %v3366_v29  ;;  %v3367_v26 = vmul.f32 %v8090_v14, %v3351_v51 }
 0x62e   : > { %v3272_v10 = vmul.f32 %v8118_v11, %v3256_v3  ;;  %6180 = vmatmul.mubr.msk.f32.gmra.mxu1 %vm2018_vm10, %v3507_v2  ;;  %v3492_v54 = vadd.f32 1.0, %v3476_v18  ;;  %v8142_v41 = vmul.f32 %v7834_v15, %v3066_v62  ;;  %v9423_v38 = vsub.f32 %v7828_v52, %v7899_v56  ;;  %v9427_v18 = vld [vmem:[#allocation19_spill] sm:$0xff] }
 0x62f   : > { %v3161_v63 = vand.u32 2147483647, %v8135_v55  ;;  %v3477_v13 = vmul.f32 %v3461_v16, %v8035_v53  ;;  %v3462_v9 = vsub.f32 1.0, %v3446_v27  ;;  %v3447_v44 = vmul.f32 %v6452_v28, %v3367_v26 }
 0x630   : > { %v3023_v21 = vmul.f32 %v7924_v48, %v9423_v38  ;;  %v3288_v14 = vadd.f32 1.4214138, %v3272_v10  ;;  %v3508_v37 = vmul.f32 %v3492_v54, %v8009_v1  ;;  %v3094_v57 = vmul.f32 0.5, %v7981_v5 }
 0x631   : > { %v9424_v58 = vmov -1.0   ;;  %v3177_v17 = vmul.f32 0.3275911, %v3161_v63  ;;  %v3493_v45 = vadd.f32 1.0, %v3477_v13  ;;  %v3463_v30 = vsub.f32 1.0, %v3447_v44  ;;  %v9429_v13 = vld [vmem:[#allocation17_spill] sm:$0xff] }
 0x632   : > { %v3142_v12 = vsel %vm3126_vm13, 1.0, %v9424_v58  ;;  %v3304_v52 = vmul.f32 %v8118_v11, %v3288_v14  ;;  %6182 = vmatprep.mubr.msk.f32.mxu1 %vm2018_vm10, %v3508_v37  ;;  %v3143_v53 = vsel %vm3127_vm14, 1.0, %v9424_v58  ;;  %v8160_v1 = vmul.f32 0.70710677, %v8142_v41  ;;  %v9430_v44 = vld [vmem:[#allocation18_spill] sm:$0xff] }
 0x633   : > { %v3478_v39 = vmul.f32 %v3462_v9, %v3142_v12  ;;  %v3193_v28 = vadd.f32 1.0, %v3177_v17  ;;  %v3045_v5 = vmul.f32 %v7931_v40, %v3023_v21  ;;  %v3509_v8 = vmul.f32 %v3493_v45, %v8019_v46 }
 0x634   : > { %v3479_v49 = vmul.f32 %v3463_v30, %v3143_v53  ;;  %v3320_v24 = vadd.f32 -0.28449672, %v3304_v52  ;;  %v3162_v43 = vand.u32 2147483647, %v8160_v1  ;;  %v3008_v46 = vsub.f32 %v7885_v61, %v7899_v56 }
 0x635   : > { %v3494_v36 = vadd.f32 1.0, %v3478_v39  ;;  %6457 = vrcp.f32 %v3193_v28  ;;  %6183 = vmatmul.mubr.msk.f32.gmra.mxu1 %vm2018_vm10, %v3509_v8  ;;  %v3067_v59 = vadd.f32 %v7950_v42, %v3045_v5  ;;  %v9425_v32 = vsub.f32 %v7864_v19, %v7899_v56  ;;  %v9431_v28 = vld [vmem:[#allocation30_spill] sm:$0xff]  ;;  %v9432_v8 = vld [vmem:[#allocation22_spill] sm:$0xff] }
 0x636   : > { %v3495_v20 = vadd.f32 1.0, %v3479_v49  ;;  %v3336_v34 = vmul.f32 %v8118_v11, %v3320_v24  ;;  %v3178_v47 = vmul.f32 0.3275911, %v3162_v43  ;;  %v9426_v35 = vsub.f32 %v7856_v23, %v7899_v56 }
 0x637   : > { %v3510_v50 = vmul.f32 %v3494_v36, %v3094_v57  ;;  %v3024_v25 = vmul.f32 %v7924_v48, %v9425_v32  ;;  %v8181_v4 = vmul.f32 %v7817_v0, %v3067_v59  ;;  %v3026_v61 = vmul.f32 %v7924_v48, %v3008_v46 }
 0x638   : > { %v3511_v33 = vmul.f32 %v3495_v20, %v3095_v31  ;;  %v3352_v6 = vadd.f32 0.2548296, %v3336_v34  ;;  %v3025_v60 = vmul.f32 %v7924_v48, %v9426_v35  ;;  %v3194_v62 = vadd.f32 1.0, %v3178_v47  ;;  %v9433_v35 = vld [vmem:[#allocation20_spill] sm:$0xff] }
 0x639   : > { %6185 = vmatprep.mubr.msk.f32.mxu1 %vm2018_vm10, %v3510_v50  ;;  %v6456_v29 = vpop.eup %6455  ;;  %vm3128_vm15 = vcmp.ge.f32.partialorder %v8061_v7, 0.0  ;;  %v3046_v51 = vmul.f32 %v7931_v40, %v3024_v25  ;;  %v3385_v23 = vsub.f32 0.0, %v3161_v63  ;;  %v8190_v2 = vmul.f32 0.70710677, %v8181_v4 }
 0x63a   : > { %6186 = vmatmul.mubr.msk.f32.gmra.mxu1 %vm2018_vm10, %v3511_v33  ;;  %v3368_v19 = vmul.f32 %v8118_v11, %v3352_v6  ;;  %v3047_v3 = vmul.f32 %v7931_v40, %v3025_v60  ;;  %6459 = vrcp.f32 %v3194_v62  ;;  %v9428_v16 = vsub.f32 %v9427_v18, %v7899_v56 }
 0x63b   : > { %v3068_v10 = vadd.f32 %v7950_v42, %v3046_v51  ;;  %v3048_v11 = vmul.f32 %v7931_v40, %v3026_v61  ;;  %v3163_v38 = vand.u32 2147483647, %v8190_v2  ;;  %v3144_v56 = vsel %vm3128_vm15, 1.0, %v9424_v58 }
 0x63c   : > { %v3027_v27 = vmul.f32 %v7924_v48, %v9428_v16  ;;  %v3448_v26 = vmul.f32 %v6456_v29, %v3368_v19  ;;  %v3069_v54 = vadd.f32 %v7950_v42, %v3047_v3  ;;  %v3401_v48 = vmul.f32 %v3385_v23, %v3161_v63 }
 0x63d   : > { %v8201_v9 = vmul.f32 %v9429_v13, %v3068_v10  ;;  %v3179_v37 = vmul.f32 0.3275911, %v3163_v38  ;;  %v3070_v57 = vadd.f32 %v7950_v42, %v3048_v11  ;;  %v3386_v17 = vsub.f32 0.0, %v3162_v43 }
 0x63e   : > { %v3464_v21 = vsub.f32 1.0, %v3448_v26  ;;  %v8204_v14 = vmul.f32 %v9430_v44, %v3069_v54  ;;  %v3049_v39 = vmul.f32 %v7931_v40, %v3027_v27  ;;  %v3096_v5 = vmul.f32 0.5, %v9431_v28 }
 0x63f   : > { %v8211_v45 = vmul.f32 0.70710677, %v8201_v9  ;;  %v3195_v30 = vadd.f32 1.0, %v3179_v37  ;;  %v8220_v36 = vmul.f32 %v9432_v8, %v3070_v57  ;;  %v3426_v24 = vmul.f32 1.442695, %v3401_v48 }
 0x640   : > { %v3480_v12 = vmul.f32 %v3464_v21, %v3144_v56  ;;  %v8215_v52 = vmul.f32 0.70710677, %v8204_v14  ;;  %v3402_v31 = vmul.f32 %v3386_v17, %v3162_v43  ;;  %v3071_v40 = vadd.f32 %v7950_v42, %v3049_v39 }
 0x641   : > { %v3164_v63 = vand.u32 2147483647, %v8211_v45  ;;  %6461 = vrcp.f32 %v3195_v30  ;;  %v8226_v46 = vmul.f32 0.70710677, %v8220_v36  ;;  %v3387_v61 = vsub.f32 0.0, %v3163_v38 }
 0x642   : > { %v6458_v53 = vpop.eup %6457  ;;  %v3496_v7 = vadd.f32 1.0, %v3480_v12  ;;  %v3165_v47 = vand.u32 2147483647, %v8215_v52  ;;  %6463 = vpow2.f32 %v3426_v24  ;;  %v3428_v25 = vmul.f32 1.442695, %v3402_v31 }
 0x643   : > { %v3241_v49 = vmul.f32 1.0614054, %v6458_v53  ;;  %v3180_v20 = vmul.f32 0.3275911, %v3164_v63  ;;  %v3166_v43 = vand.u32 2147483647, %v8226_v46  ;;  %v8230_v60 = vmul.f32 %v9433_v35, %v3071_v40 }
 0x644   : > { %v3512_v50 = vmul.f32 %v3496_v7, %v3096_v5  ;;  %v3181_v6 = vmul.f32 0.3275911, %v3165_v47  ;;  %v3403_v26 = vmul.f32 %v3387_v61, %v3163_v38  ;;  %v3388_v10 = vsub.f32 0.0, %v3164_v63 }
 0x645   : > { %v3257_v34 = vadd.f32 -1.4531521, %v3241_v49  ;;  %v3196_v59 = vadd.f32 1.0, %v3180_v20  ;;  %v3182_v19 = vmul.f32 0.3275911, %v3166_v43  ;;  %v3389_v48 = vsub.f32 0.0, %v3165_v47 }
 0x646   : > { %6188 = vmatprep.mubr.msk.f32.mxu1 %vm2018_vm10, %v3512_v50  ;;  %v3197_v29 = vadd.f32 1.0, %v3181_v6  ;;  %v8233_v18 = vmul.f32 0.70710677, %v8230_v60  ;;  %v3430_v39 = vmul.f32 1.442695, %v3403_v26  ;;  %v3404_v30 = vmul.f32 %v3388_v10, %v3164_v63 }
 0x647   : > { %v3273_v33 = vmul.f32 %v6458_v53, %v3257_v34  ;;  %v6460_v32 = vpop.eup %6459  ;;  %6465 = vrcp.f32 %v3196_v59  ;;  %v3198_v23 = vadd.f32 1.0, %v3182_v19  ;;  %vm3129_vm0 = vcmp.ge.f32.partialorder %v8135_v55, 0.0 }
 0x648   : > { %v3242_v62 = vmul.f32 1.0614054, %v6460_v32  ;;  %6467 = vrcp.f32 %v3197_v29  ;;  %v3167_v54 = vand.u32 2147483647, %v8233_v18  ;;  %v3405_v24 = vmul.f32 %v3389_v48, %v3165_v47 }
 0x649   : > { %v3289_v42 = vadd.f32 1.4214138, %v3273_v33  ;;  %6469 = vpow2.f32 %v3428_v25  ;;  %v3390_v50 = vsub.f32 0.0, %v3166_v43  ;;  %v3432_v63 = vmul.f32 1.442695, %v3404_v30 }
 0x64a   : > { %v3258_v3 = vadd.f32 -1.4531521, %v3242_v62  ;;  %6471 = vrcp.f32 %v3198_v23  ;;  %v3183_v37 = vmul.f32 0.3275911, %v3167_v54  ;;  %v3145_v47 = vsel %vm3129_vm0, 1.0, %v9424_v58 }
 0x64b   : > { %v3305_v51 = vmul.f32 %v6458_v53, %v3289_v42  ;;  %v3434_v61 = vmul.f32 1.442695, %v3405_v24  ;;  %v3406_v29 = vmul.f32 %v3390_v50, %v3166_v43  ;;  %vm3130_vm1 = vcmp.ge.f32.partialorder %v8160_v1, 0.0 }
 0x64c   : > { %v3274_v27 = vmul.f32 %v6460_v32, %v3258_v3  ;;  %v3199_v28 = vadd.f32 1.0, %v3183_v37  ;;  %v3098_v24 = vmul.f32 0.5, %v8142_v41  ;;  %vm3131_vm2 = vcmp.ge.f32.partialorder %v8190_v2, 0.0 }
 0x64d   : > { %v3321_v16 = vadd.f32 -0.28449672, %v3305_v51  ;;  %v3436_v48 = vmul.f32 1.442695, %v3406_v29  ;;  %v3147_v2 = vsel %vm3131_vm2, 1.0, %v9424_v58  ;;  %vm3132_vm4 = vcmp.ge.f32.partialorder %v8211_v45, 0.0 }
 0x64e   : > { %v3290_v21 = vadd.f32 1.4214138, %v3274_v27  ;;  %v8236_v56 = vpop.eup %6461  ;;  %6473 = vrcp.f32 %v3199_v28  ;;  %v3391_v27 = vsub.f32 0.0, %v3167_v54  ;;  %vm3133_vm5 = vcmp.ge.f32.partialorder %v8215_v52, 0.0 }
 0x64f   : > { %v3337_v11 = vmul.f32 %v6458_v53, %v3321_v16  ;;  %v3243_v17 = vmul.f32 1.0614054, %v8236_v56  ;;  %v6464_v49 = vpop.eup %6463  ;;  %6475 = vpow2.f32 %v3430_v39  ;;  %v3146_v39 = vsel %vm3130_vm1, 1.0, %v9424_v58 }
 0x650   : > { %v3306_v12 = vmul.f32 %v6460_v32, %v3290_v21  ;;  %6477 = vpow2.f32 %v3432_v63  ;;  %vm3134_vm6 = vcmp.ge.f32.partialorder %v8226_v46, 0.0  ;;  %vm3135_vm7 = vcmp.ge.f32.partialorder %v8233_v18, 0.0  ;;  %v4163_v18 = vld [vmem:[%s6853_s30 + $0x38] sm:$0xff] }
 0x651   : > { %v3353_v57 = vadd.f32 0.2548296, %v3337_v11  ;;  %v3259_v38 = vadd.f32 -1.4531521, %v3243_v17  ;;  %6479 = vpow2.f32 %v3434_v61  ;;  %6200 = vmatprep.subr.mxu0 %v4163_v18 }
 0x652   : > { %v3322_v7 = vadd.f32 -0.28449672, %v3306_v12  ;;  %6481 = vpow2.f32 %v3436_v48  ;;  %6201 = vmatpush3.msra.mxu0 %v4163_v18 }
 0x653   : > { %v3369_v5 = vmul.f32 %v6458_v53, %v3353_v57  ;;  %v3275_v34 = vmul.f32 %v8236_v56, %v3259_v38  ;;  %v3097_v53 = vmul.f32 0.5, %v8076_v22 }
 0x654   : > { %v8240_v31 = vpop.eup %6465  ;;  %v3338_v40 = vmul.f32 %v6460_v32, %v3322_v7 }
 0x655   : > { %v3449_v20 = vmul.f32 %v6464_v49, %v3369_v5  ;;  %v3244_v59 = vmul.f32 1.0614054, %v8240_v31  ;;  %v3291_v25 = vadd.f32 1.4214138, %v3275_v34  ;;  %v8245_v42 = vpop.eup %6467  ;;  %v3407_v5 = vmul.f32 %v3391_v27, %v3167_v54 }
 0x656   : > { %v3354_v6 = vadd.f32 0.2548296, %v3338_v40  ;;  %v3245_v23 = vmul.f32 1.0614054, %v8245_v42  ;;  %v6470_v16 = vpop.eup %6469 }
 0x657   : > { %v3465_v33 = vsub.f32 1.0, %v3449_v20  ;;  %v3260_v62 = vadd.f32 -1.4531521, %v3244_v59  ;;  %v3307_v3 = vmul.f32 %v8236_v56, %v3291_v25  ;;  %v8254_v26 = vpop.eup %6471  ;;  %v3438_v41 = vmul.f32 1.442695, %v3407_v5 }
 0x658   : > { %v3370_v51 = vmul.f32 %v6460_v32, %v3354_v6  ;;  %v3261_v21 = vadd.f32 -1.4531521, %v3245_v23  ;;  %v3246_v32 = vmul.f32 1.0614054, %v8254_v26 }
 0x659   : > { %v3481_v19 = vmul.f32 %v3465_v33, %v3145_v47  ;;  %v3276_v22 = vmul.f32 %v8240_v31, %v3260_v62  ;;  %v3323_v11 = vadd.f32 -0.28449672, %v3307_v3  ;;  %6483 = vpow2.f32 %v3438_v41 }
 0x65a   : > { %v3450_v10 = vmul.f32 %v6470_v16, %v3370_v51  ;;  %v3277_v17 = vmul.f32 %v8245_v42, %v3261_v21  ;;  %v3262_v28 = vadd.f32 -1.4531521, %v3246_v32 }
 0x65b   : > { %v3497_v55 = vadd.f32 1.0, %v3481_v19  ;;  %v3292_v43 = vadd.f32 1.4214138, %v3276_v22  ;;  %v3339_v12 = vmul.f32 %v8236_v56, %v3323_v11  ;;  %v8266_v40 = vpop.eup %6473 }
 0x65c   : > { %v3466_v57 = vsub.f32 1.0, %v3450_v10  ;;  %v3293_v49 = vadd.f32 1.4214138, %v3277_v17  ;;  %v3278_v20 = vmul.f32 %v8254_v26, %v3262_v28  ;;  %v6476_v59 = vpop.eup %6475  ;;  %v3247_v33 = vmul.f32 1.0614054, %v8266_v40 }
 0x65d   : > { %v3513_v37 = vmul.f32 %v3497_v55, %v3097_v53  ;;  %v3308_v30 = vmul.f32 %v8240_v31, %v3292_v43  ;;  %v3355_v38 = vadd.f32 0.2548296, %v3339_v12  ;;  %v6478_v16 = vpop.eup %6477  ;;  %v3099_v43 = vmul.f32 0.5, %v8181_v4 }
 0x65e   : > { %v3482_v7 = vmul.f32 %v3466_v57, %v3146_v39  ;;  %v3309_v54 = vmul.f32 %v8245_v42, %v3293_v49  ;;  %v3294_v53 = vadd.f32 1.4214138, %v3278_v20  ;;  %v3263_v29 = vadd.f32 -1.4531521, %v3247_v33  ;;  %v6480_v21 = vpop.eup %6479 }
 0x65f   : > { %6189 = vmatmul.mubr.msk.f32.gmra.mxu1 %vm2018_vm10, %v3513_v37  ;;  %v3324_v50 = vadd.f32 -0.28449672, %v3308_v30  ;;  %v3371_v1 = vmul.f32 %v8236_v56, %v3355_v38  ;;  %v3148_v17 = vsel %vm3132_vm4, 1.0, %v9424_v58  ;;  %v6482_v5 = vpop.eup %6481  ;;  %v3100_v4 = vmul.f32 0.5, %v8201_v9 }
 0x660   : > { %v3498_v34 = vadd.f32 1.0, %v3482_v7  ;;  %v3325_v47 = vadd.f32 -0.28449672, %v3309_v54  ;;  %v3310_v61 = vmul.f32 %v8254_v26, %v3294_v53  ;;  %v3279_v23 = vmul.f32 %v8266_v40, %v3263_v29 }
 0x661   : > { %v3340_v63 = vmul.f32 %v8240_v31, %v3324_v50  ;;  %v3451_v25 = vmul.f32 %v6476_v59, %v3371_v1  ;;  %v3150_v54 = vsel %vm3134_vm6, 1.0, %v9424_v58  ;;  %v3102_v53 = vmul.f32 0.5, %v8220_v36 }
 0x662   : > { %v3514_v6 = vmul.f32 %v3498_v34, %v3098_v24  ;;  %v3341_v19 = vmul.f32 %v8245_v42, %v3325_v47  ;;  %v3326_v3 = vadd.f32 -0.28449672, %v3310_v61  ;;  %v3295_v11 = vadd.f32 1.4214138, %v3279_v23  ;;  %v8311_v61 = vld [vmem:[%s9435_s7] ss:$0 sm:$0xff] }
 0x663   : > { %v3356_v62 = vadd.f32 0.2548296, %v3340_v63  ;;  %v3467_v56 = vsub.f32 1.0, %v3451_v25  ;;  %v3151_v25 = vsel %vm3135_vm7, 1.0, %v9424_v58  ;;  %v3103_v47 = vmul.f32 0.5, %v8230_v60  ;;  %v4162_v60 = vld [vmem:[%s6853_s30 + $0x30] sm:$0xff] }
 0x664   : > { %6191 = vmatprep.mubr.msk.f32.mxu1 %vm2018_vm10, %v3514_v6  ;;  %v3357_v27 = vadd.f32 0.2548296, %v3341_v19  ;;  %v3342_v10 = vmul.f32 %v8254_v26, %v3326_v3  ;;  %v3311_v57 = vmul.f32 %v8266_v40, %v3295_v11  ;;  %6202 = vmatprep.subr.mxu0 %v4162_v60  ;;  %v4158_v11 = vld [vmem:[%s6853_s30 + $0x10] sm:$0xff]  ;;  %s9456_s7 = sld [smem:[#allocation50_spill]] (!%p5586_p11) }
 0x665   : > { %v3372_v51 = vmul.f32 %v8240_v31, %v3356_v62  ;;  %v3483_v22 = vmul.f32 %v3467_v56, %v3147_v2  ;;  %6203 = vmatpush3.msra.mxu0 %v4162_v60  ;;  %v4161_v2 = vld [vmem:[%s6853_s30 + $0x28] sm:$0xff] }
 0x666   : > { %v3373_v48 = vmul.f32 %v8245_v42, %v3357_v27  ;;  %v3358_v37 = vadd.f32 0.2548296, %v3342_v10  ;;  %v3327_v28 = vadd.f32 -0.28449672, %v3311_v57  ;;  %v3149_v42 = vsel %vm3133_vm5, 1.0, %v9424_v58  ;;  %v6484_v63 = vpop.eup %6483  ;;  %6204 = vmatprep.subr.mxu0 %v4161_v2  ;;  %v8394_v60 = vld [vmem:[%s6870_s14 + $0x8] sm:$0xff] }
 0x667   : > { %v3452_v55 = vmul.f32 %v6478_v16, %v3372_v51  ;;  %v3499_v32 = vadd.f32 1.0, %v3483_v22  ;;  %6205 = vmatpush3.msra.mxu0 %v4161_v2  ;;  %v4160_v51 = vld [vmem:[%s6853_s30 + $0x20] sm:$0xff]  ;;  %v4159_v16 = vld [vmem:[%s6853_s30 + $0x18] sm:$0xff] }
 0x668   : > { %v3453_v45 = vmul.f32 %v6480_v21, %v3373_v48  ;;  %v3374_v30 = vmul.f32 %v8254_v26, %v3358_v37  ;;  %v3343_v49 = vmul.f32 %v8266_v40, %v3327_v28  ;;  %v3101_v26 = vmul.f32 0.5, %v8204_v14  ;;  %6206 = vmatprep.subr.mxu0 %v4160_v51  ;;  %v4157_v37 = vld [vmem:[%s6853_s30 + $0x8] sm:$0xff] }
 0x669   : > { %v3468_v31 = vsub.f32 1.0, %v3452_v55  ;;  %v3515_v12 = vmul.f32 %v3499_v32, %v3099_v43  ;;  %6207 = vmatpush3.msra.mxu0 %v4160_v51 }
 0x66a   : > { %v3469_v7 = vsub.f32 1.0, %v3453_v45  ;;  %v3454_v38 = vmul.f32 %v6482_v5, %v3374_v30  ;;  %v3359_v34 = vadd.f32 0.2548296, %v3343_v49  ;;  %6208 = vmatprep.subr.mxu0 %v4159_v16  ;;  %v4156_v30 = vld [vmem:[%s6853_s30] sm:$0xff] }
 0x66b   : > { %v3484_v39 = vmul.f32 %v3468_v31, %v3148_v17  ;;  %6192 = vmatmul.mubr.msk.f32.gmra.mxu1 %vm2018_vm10, %v3515_v12  ;;  %6209 = vmatpush3.msra.mxu0 %v4159_v16 }
 0x66c   : > { %v3485_v24 = vmul.f32 %v3469_v7, %v3149_v42  ;;  %v3470_v20 = vsub.f32 1.0, %v3454_v38  ;;  %v3375_v59 = vmul.f32 %v8266_v40, %v3359_v34  ;;  %6210 = vmatprep.subr.mxu0 %v4158_v11 }
 0x66d   : > { %v3500_v52 = vadd.f32 1.0, %v3484_v39  ;;  %6211 = vmatpush3.msra.mxu0 %v4158_v11 }
 0x66e   : > { %v3501_v1 = vadd.f32 1.0, %v3485_v24  ;;  %v3486_v9 = vmul.f32 %v3470_v20, %v3150_v54  ;;  %v3455_v41 = vmul.f32 %v6484_v63, %v3375_v59  ;;  %6212 = vmatprep.subr.mxu0 %v4157_v37 }
 0x66f   : > { %v3516_v50 = vmul.f32 %v3500_v52, %v3100_v4  ;;  %6213 = vmatpush3.msra.mxu0 %v4157_v37  ;;  %v8341_v4 = vstv %s2774_s2  ;;  %v8344_v52 = vstv %s2792_s29 }
 0x670   : > { %v3517_v46 = vmul.f32 %v3501_v1, %v3101_v26  ;;  %v3502_v33 = vadd.f32 1.0, %v3486_v9  ;;  %v3471_v6 = vsub.f32 1.0, %v3455_v41  ;;  %6214 = vmatprep.subr.mxu0 %v4156_v30  ;;  %v8371_v41 = vpop.f32.mrf.mxu0 }
 0x671   : > { %6194 = vmatprep.mubr.msk.f32.mxu1 %vm2018_vm10, %v3516_v50  ;;  %6215 = vmatpush3.msra.mxu0 %v4156_v30  ;;  %v8350_v50 = vld [vmem:[%s6870_s14 + $0x18] sm:$0xff] }
 0x672   : > { %6195 = vmatmul.mubr.msk.f32.gmra.mxu1 %vm2018_vm10, %v3517_v46  ;;  %v3518_v14 = vmul.f32 %v3502_v33, %v3102_v53  ;;  %v3487_v40 = vmul.f32 %v3471_v6, %v3151_v25  ;;  %6326 = vmatprep.subr.mxu1 %v8350_v50  ;;  %v8369_v33 = vld [vmem:[%s6870_s14 + $0x10] sm:$0xff] }
 0x673   : > { %6240 = vmatprep.subr.mxu0 %v8350_v50  ;;  %6330 = vmatpush3.msra.mxu1 %v8350_v50 }
 0x674   : > { %6197 = vmatprep.mubr.msk.f32.mxu1 %vm2018_vm10, %v3518_v14  ;;  %v3503_v36 = vadd.f32 1.0, %v3487_v40  ;;  %6327 = vmatprep.subr.mxu1 %v8369_v33 }
 0x675   : > { %6331 = vmatpush3.msra.mxu1 %v8369_v33 }
 0x676   : > { %v3519_v62 = vmul.f32 %v3503_v36, %v3103_v47  ;;  %6328 = vmatprep.subr.mxu1 %v8394_v60 }
 0x677   : > { %6332 = vmatpush3.msra.mxu1 %v8394_v60 }
 0x678   : > { %6198 = vmatmul.mubr.msk.f32.gmra.mxu1 %vm2018_vm10, %v3519_v62 }
 0x6ea   : > { %v6178_v29 = vpop.f32.mrf.mxu1 }
 0x6eb   : > { %v3651_v56 = vadd.f32 %v6178_v29, %v8311_v61 }
 0x6ec   : > { %v3645_v19 = vpop.f32.mrf.mxu1 }
 0x6ed   : > { %v8319_v3 = vmul.f32 0.70710677, %v3651_v56  ;;  %v3646_v23 = vadd.f32 %v8311_v61, %v3645_v19  ;;  %v8352_v20 = vmul.f32 0.5, %v3651_v56 }
 0x6ee   : > { %v6181_v55 = vpop.f32.mrf.mxu1 }
 0x6ef   : > { %v3789_v22 = vand.u32 2147483647, %v8319_v3  ;;  %v8324_v27 = vmul.f32 0.70710677, %v3646_v23  ;;  %v3661_v10 = vadd.f32 %v6181_v55, %v8311_v61  ;;  %vm3757_vm8 = vcmp.ge.f32.partialorder %v8319_v3, 0.0 }
 0x6f0   : > { %v3655_v32 = vpop.f32.mrf.mxu1  ;;  %v8373_v14 = vmul.f32 0.5, %v3646_v23  ;;  %v8383_v36 = vsel %vm3757_vm8, 1.0, %v9424_v58 }
 0x6f1   : > { %v3805_v21 = vmul.f32 0.3275911, %v3789_v22  ;;  %v3788_v43 = vand.u32 2147483647, %v8324_v27  ;;  %v8330_v48 = vmul.f32 0.70710677, %v3661_v10  ;;  %v8333_v31 = vadd.f32 %v8311_v61, %v3655_v32 }
 0x6f2   : > { %v4013_v42 = vsub.f32 0.0, %v3789_v22  ;;  %vm3756_vm9 = vcmp.ge.f32.partialorder %v8324_v27, 0.0  ;;  %v8390_v18 = vmul.f32 0.5, %v3661_v10  ;;  %v8408_v27 = vld [vmem:[%s6870_s14] sm:$0xff] }
 0x6f3   : > { %v3821_v57 = vadd.f32 1.0, %v3805_v21  ;;  %v3804_v12 = vmul.f32 0.3275911, %v3788_v43  ;;  %v3791_v17 = vand.u32 2147483647, %v8330_v48  ;;  %v4012_v1 = vsub.f32 0.0, %v3788_v43  ;;  %6329 = vmatprep.subr.mxu1 %v8408_v27 }
 0x6f4   : > { %v8338_v45 = vmul.f32 0.70710677, %v8333_v31  ;;  %v4029_v59 = vmul.f32 %v4013_v42, %v3789_v22  ;;  %v8388_v62 = vsel %vm3756_vm9, 1.0, %v9424_v58  ;;  %v8405_v22 = vpop.f32.mrf.mxu0  ;;  %vm3759_vm11 = vcmp.ge.f32.partialorder %v8330_v48, 0.0  ;;  %6333 = vmatpush3.msra.mxu1 %v8408_v27  ;;  %v6551_v48 = vld [vmem:[#allocation2 + $0x18] sm:$0xff] }
 0x6f5   : > { %6485 = vrcp.f32 %v3821_v57  ;;  %v3820_v39 = vadd.f32 1.0, %v3804_v12  ;;  %v3807_v28 = vmul.f32 0.3275911, %v3791_v17  ;;  %v6184_v5 = vpop.f32.mrf.mxu1  ;;  %v4015_v63 = vsub.f32 0.0, %v3791_v17 }
 0x6f6   : > { %v3790_v7 = vand.u32 2147483647, %v8338_v45  ;;  %v8347_v49 = vadd.f32 %v6184_v5, %v8311_v61  ;;  %v4028_v29 = vmul.f32 %v4012_v1, %v3788_v43  ;;  %v4046_v51 = vmul.f32 1.442695, %v4029_v59 }
 0x6f7   : > { %6487 = vrcp.f32 %v3820_v39  ;;  %v3823_v38 = vadd.f32 1.0, %v3807_v28  ;;  %v3665_v24 = vpop.f32.mrf.mxu1  ;;  %v4031_v3 = vmul.f32 %v4015_v63, %v3791_v17  ;;  %v8413_v43 = vmul.f32 0.5, %v8333_v31  ;;  %v6149_v31 = vpop.f32.mrf.mxu0 }
 0x6f8   : > { %v3806_v34 = vmul.f32 0.3275911, %v3790_v7  ;;  %v8356_v26 = vadd.f32 %v8311_v61, %v3665_v24  ;;  %v8362_v54 = vmul.f32 0.70710677, %v8347_v49  ;;  %v4014_v6 = vsub.f32 0.0, %v3790_v7 }
 0x6f9   : > { %6489 = vrcp.f32 %v3823_v38  ;;  %v4044_v12 = vmul.f32 1.442695, %v4028_v29  ;;  %vm3758_vm12 = vcmp.ge.f32.partialorder %v8338_v45, 0.0 }
 0x6fa   : > { %v6187_v9 = vpop.f32.mrf.mxu1  ;;  %v3822_v46 = vadd.f32 1.0, %v3806_v34  ;;  %v8366_v53 = vmul.f32 0.70710677, %v8356_v26  ;;  %v3793_v25 = vand.u32 2147483647, %v8362_v54  ;;  %v4030_v55 = vmul.f32 %v4014_v6, %v3790_v7 }
 0x6fb   : > { %v8377_v40 = vadd.f32 %v6187_v9, %v8311_v61  ;;  %v4050_v7 = vmul.f32 1.442695, %v4031_v3  ;;  %vm3761_vm13 = vcmp.ge.f32.partialorder %v8362_v54, 0.0 }
 0x6fc   : > { %v3675_v47 = vpop.f32.mrf.mxu1  ;;  %6491 = vrcp.f32 %v3822_v46  ;;  %v3809_v2 = vmul.f32 0.3275911, %v3793_v25  ;;  %v4017_v56 = vsub.f32 0.0, %v3793_v25  ;;  %v3792_v19 = vand.u32 2147483647, %v8366_v53 }
 0x6fd   : > { %v8399_v23 = vmul.f32 0.70710677, %v8377_v40  ;;  %v8402_v16 = vadd.f32 %v8311_v61, %v3675_v47  ;;  %v4048_v38 = vmul.f32 1.442695, %v4030_v55  ;;  %vm3760_vm14 = vcmp.ge.f32.partialorder %v8366_v53, 0.0 }
 0x6fe   : > { %v3825_v10 = vadd.f32 1.0, %v3809_v2  ;;  %v3808_v11 = vmul.f32 0.3275911, %v3792_v19  ;;  %v4016_v21 = vsub.f32 0.0, %v3792_v19  ;;  %v4033_v17 = vmul.f32 %v4017_v56, %v3793_v25  ;;  %v2700_v56 = vpop.f32.mrf.mxu0 }
 0x6ff   : > { %v3795_v32 = vand.u32 2147483647, %v8399_v23  ;;  %v8417_v37 = vmul.f32 0.70710677, %v8402_v16  ;;  %vm3763_vm15 = vcmp.ge.f32.partialorder %v8399_v23, 0.0 }
 0x700   : > { %6493 = vrcp.f32 %v3825_v10  ;;  %v3824_v39 = vadd.f32 1.0, %v3808_v11  ;;  %v4032_v28 = vmul.f32 %v4016_v21, %v3792_v19  ;;  %v4054_v46 = vmul.f32 1.442695, %v4033_v17 }
 0x701   : > { %v3811_v5 = vmul.f32 0.3275911, %v3795_v32  ;;  %v4019_v42 = vsub.f32 0.0, %v3795_v32  ;;  %6495 = vpow2.f32 %v4046_v51  ;;  %v3794_v24 = vand.u32 2147483647, %v8417_v37 }
 0x702   : > { %v8420_v57 = vpop.eup %6485  ;;  %6497 = vrcp.f32 %v3824_v39  ;;  %v4052_v29 = vmul.f32 1.442695, %v4032_v28  ;;  %vm3762_vm0 = vcmp.ge.f32.partialorder %v8417_v37, 0.0 }
 0x703   : > { %v3869_v30 = vmul.f32 1.0614054, %v8420_v57  ;;  %v3827_v9 = vadd.f32 1.0, %v3811_v5  ;;  %v4035_v59 = vmul.f32 %v4019_v42, %v3795_v32  ;;  %6499 = vpow2.f32 %v4044_v12  ;;  %v6152_v5 = vpop.f32.mrf.mxu0 }
 0x704   : > { %v8424_v34 = vpop.eup %6487  ;;  %v3810_v6 = vmul.f32 0.3275911, %v3794_v24  ;;  %v4018_v2 = vsub.f32 0.0, %v3794_v24  ;;  %v8437_v12 = vsel %vm3759_vm11, 1.0, %v9424_v58 }
 0x705   : > { %v3885_v1 = vadd.f32 -1.4531521, %v3869_v30  ;;  %v3868_v63 = vmul.f32 1.0614054, %v8424_v34  ;;  %6501 = vrcp.f32 %v3827_v9  ;;  %v4058_v10 = vmul.f32 1.442695, %v4035_v59 }
 0x706   : > { %v8427_v25 = vpop.eup %6489  ;;  %6503 = vpow2.f32 %v4050_v7  ;;  %v3826_v3 = vadd.f32 1.0, %v3810_v6  ;;  %v4034_v11 = vmul.f32 %v4018_v2, %v3794_v24  ;;  %v2797_v9 = vmul.f32 %v6551_v48, %v8344_v52 }
 0x707   : > { %v3901_v47 = vmul.f32 %v8420_v57, %v3885_v1  ;;  %v3884_v19 = vadd.f32 -1.4531521, %v3868_v63  ;;  %v3871_v51 = vmul.f32 1.0614054, %v8427_v25  ;;  %6505 = vpow2.f32 %v4048_v38 }
 0x708   : > { %6507 = vrcp.f32 %v3826_v3  ;;  %v4056_v28 = vmul.f32 1.442695, %v4034_v11  ;;  %v2779_v38 = vmul.f32 %v6149_v31, %v8341_v4  ;;  %v6552_v31 = vld [vmem:[#allocation2 + $0x10] sm:$0xff]  ;;  %v2781_v11 = vmul.f32 %v6152_v5, %v8341_v4 }
 0x709   : > { %v3917_v55 = vadd.f32 1.4214138, %v3901_v47  ;;  %v8431_v21 = vpop.eup %6491  ;;  %v3900_v32 = vmul.f32 %v8424_v34, %v3884_v19  ;;  %v3887_v17 = vadd.f32 -1.4531521, %v3871_v51  ;;  %6509 = vpow2.f32 %v4054_v46  ;;  %v2710_v51 = vpop.f32.mrf.mxu0 }
 0x70a   : > { %v3870_v30 = vmul.f32 1.0614054, %v8431_v21  ;;  %6511 = vpow2.f32 %v4052_v29  ;;  %v2778_v46 = vmul.f32 %v8341_v4, %v2700_v56  ;;  %v2813_v2 = vadd.f32 %v2797_v9, %v2779_v38 }
 0x70b   : > { %v3933_v39 = vmul.f32 %v8420_v57, %v3917_v55  ;;  %v3916_v42 = vadd.f32 1.4214138, %v3900_v32  ;;  %v3903_v7 = vmul.f32 %v8427_v25, %v3887_v17  ;;  %6513 = vpow2.f32 %v4058_v10 }
 0x70c   : > { %v3886_v1 = vadd.f32 -1.4531521, %v3870_v30  ;;  %6515 = vpow2.f32 %v4056_v28  ;;  %v2796_v19 = vmul.f32 %v6552_v31, %v8344_v52  ;;  %v6553_v30 = vld [vmem:[#allocation2 + $0x28] sm:$0xff] }
 0x70d   : > { %v3949_v24 = vadd.f32 -0.28449672, %v3933_v39  ;;  %v3932_v59 = vmul.f32 %v8424_v34, %v3916_v42  ;;  %v3919_v63 = vadd.f32 1.4214138, %v3903_v7  ;;  %v8446_v6 = vpop.eup %6493  ;;  %v2799_v28 = vmul.f32 %v6553_v30, %v8344_v52 }
 0x70e   : > { %v3902_v29 = vmul.f32 %v8431_v21, %v3886_v1  ;;  %v3873_v10 = vmul.f32 1.0614054, %v8446_v6  ;;  %v6496_v32 = vpop.eup %6495  ;;  %v2812_v39 = vadd.f32 %v2796_v19, %v2778_v46  ;;  %v2780_v1 = vmul.f32 %v8341_v4, %v2710_v51  ;;  %v6554_v19 = vld [vmem:[#allocation2 + $0x20] sm:$0xff] }
 0x70f   : > { %v3965_v47 = vmul.f32 %v8420_v57, %v3949_v24  ;;  %v3948_v3 = vadd.f32 -0.28449672, %v3932_v59  ;;  %v3935_v55 = vmul.f32 %v8427_v25, %v3919_v63  ;;  %v8455_v42 = vpop.eup %6497  ;;  %v2815_v63 = vadd.f32 %v2799_v28, %v2781_v11 }
 0x710   : > { %v3918_v17 = vadd.f32 1.4214138, %v3902_v29  ;;  %v3889_v24 = vadd.f32 -1.4531521, %v3873_v10  ;;  %v6500_v48 = vpop.eup %6499  ;;  %v3872_v59 = vmul.f32 1.0614054, %v8455_v42  ;;  %6251 = vmatprep.mubr.msk.f32.mxu1 %vm2018_vm10, %v2812_v39  ;;  %v2798_v51 = vmul.f32 %v6554_v19, %v8344_v52 }
 0x711   : > { %v3981_v56 = vadd.f32 0.2548296, %v3965_v47  ;;  %v3964_v7 = vmul.f32 %v8424_v34, %v3948_v3  ;;  %v3951_v38 = vadd.f32 -0.28449672, %v3935_v55  ;;  %6252 = vmatmul.mubr.msk.f32.vlgmr.msra.gmra.mxu1 %vm2018_vm10, %v2813_v2 }
 0x712   : > { %v3934_v9 = vmul.f32 %v8431_v21, %v3918_v17  ;;  %v8464_v46 = vpop.eup %6501  ;;  %v3905_v31 = vmul.f32 %v8446_v6, %v3889_v24  ;;  %v3888_v10 = vadd.f32 -1.4531521, %v3872_v59  ;;  %v2814_v28 = vadd.f32 %v2798_v51, %v2780_v1 }
 0x713   : > { %v3997_v5 = vmul.f32 %v8420_v57, %v3981_v56  ;;  %v3980_v47 = vadd.f32 0.2548296, %v3964_v7  ;;  %v3967_v29 = vmul.f32 %v8427_v25, %v3951_v38  ;;  %v6504_v57 = vpop.eup %6503  ;;  %v3875_v11 = vmul.f32 1.0614054, %v8464_v46 }
 0x714   : > { %v3950_v55 = vadd.f32 -0.28449672, %v3934_v9  ;;  %v6506_v56 = vpop.eup %6505  ;;  %v3921_v30 = vadd.f32 1.4214138, %v3905_v31  ;;  %v3904_v19 = vmul.f32 %v8455_v42, %v3888_v10  ;;  %6254 = vmatprep.mubr.msk.f32.mxu1 %vm2018_vm10, %v2814_v28 }
 0x715   : > { %v4077_v3 = vmul.f32 %v6496_v32, %v3997_v5  ;;  %v3996_v17 = vmul.f32 %v8424_v34, %v3980_v47  ;;  %v3983_v39 = vadd.f32 0.2548296, %v3967_v29  ;;  %v8472_v7 = vpop.eup %6507  ;;  %v3891_v2 = vadd.f32 -1.4531521, %v3875_v11  ;;  %6255 = vmatmul.mubr.msk.f32.gmra.mxu1 %vm2018_vm10, %v2815_v63 }
 0x716   : > { %v3966_v24 = vmul.f32 %v8431_v21, %v3950_v55  ;;  %v6510_v8 = vpop.eup %6509  ;;  %v3937_v9 = vmul.f32 %v8446_v6, %v3921_v30  ;;  %v3874_v59 = vmul.f32 1.0614054, %v8472_v7  ;;  %v3920_v29 = vadd.f32 1.4214138, %v3904_v19 }
 0x717   : > { %v4093_v38 = vsub.f32 1.0, %v4077_v3  ;;  %v4076_v32 = vmul.f32 %v6500_v48, %v3996_v17  ;;  %v3999_v5 = vmul.f32 %v8427_v25, %v3983_v39  ;;  %v6512_v34 = vpop.eup %6511  ;;  %v3907_v31 = vmul.f32 %v8464_v46, %v3891_v2 }
 0x718   : > { %v3982_v47 = vadd.f32 0.2548296, %v3966_v24  ;;  %v8483_v51 = vpop.eup %6513  ;;  %v3953_v25 = vadd.f32 -0.28449672, %v3937_v9  ;;  %v3890_v55 = vadd.f32 -1.4531521, %v3874_v59  ;;  %v3936_v39 = vmul.f32 %v8455_v42, %v3920_v29 }
 0x719   : > { %v4109_v1 = vmul.f32 %v4093_v38, %v8383_v36  ;;  %v4092_v48 = vsub.f32 1.0, %v4076_v32  ;;  %v4079_v3 = vmul.f32 %v6504_v57, %v3999_v5  ;;  %v8485_v10 = vpop.eup %6515  ;;  %v3923_v36 = vadd.f32 1.4214138, %v3907_v31 }
 0x71a   : > { %v3998_v17 = vmul.f32 %v8431_v21, %v3982_v47  ;;  %v3969_v38 = vmul.f32 %v8446_v6, %v3953_v25  ;;  %v3906_v63 = vmul.f32 %v8472_v7, %v3890_v55  ;;  %v3774_v57 = vsel %vm3758_vm12, 1.0, %v9424_v58 }
 0x71b   : > { %v4125_v11 = vadd.f32 1.0, %v4109_v1  ;;  %v4108_v30 = vmul.f32 %v4092_v48, %v8388_v62  ;;  %v4095_v28 = vsub.f32 1.0, %v4079_v3  ;;  %v3952_v19 = vadd.f32 -0.28449672, %v3936_v39 }
 0x71c   : > { %v4078_v24 = vmul.f32 %v6506_v56, %v3998_v17  ;;  %v3939_v2 = vmul.f32 %v8464_v46, %v3923_v36  ;;  %v3985_v5 = vadd.f32 0.2548296, %v3969_v38  ;;  %v3922_v9 = vadd.f32 1.4214138, %v3906_v63 }
 0x71d   : > { %v4124_v32 = vadd.f32 1.0, %v4108_v30  ;;  %v4111_v21 = vmul.f32 %v4095_v28, %v8437_v12  ;;  %v3968_v62 = vmul.f32 %v8455_v42, %v3952_v19  ;;  %v4141_v29 = vmul.f32 %v4125_v11, %v8352_v20  ;;  %v6155_v28 = vpop.f32.mrf.mxu0 }
 0x71e   : > { %v4094_v59 = vsub.f32 1.0, %v4078_v24  ;;  %v3955_v1 = vadd.f32 -0.28449672, %v3939_v2  ;;  %v4001_v56 = vmul.f32 %v8446_v6, %v3985_v5  ;;  %v3938_v31 = vmul.f32 %v8472_v7, %v3922_v9 }
 0x71f   : > { %v6190_v47 = vpop.f32.mrf.mxu1  ;;  %v4140_v45 = vmul.f32 %v4124_v32, %v8373_v14  ;;  %v3984_v3 = vadd.f32 0.2548296, %v3968_v62  ;;  %v4127_v17 = vadd.f32 1.0, %v4111_v21  ;;  %v3777_v14 = vsel %vm3761_vm13, 1.0, %v9424_v58 }
 0x720   : > { %v4110_v48 = vmul.f32 %v4094_v59, %v3774_v57  ;;  %v3971_v12 = vmul.f32 %v8464_v46, %v3955_v1  ;;  %v8505_v25 = vadd.f32 %v6190_v47, %v8311_v61  ;;  %v4081_v39 = vmul.f32 %v6510_v8, %v4001_v56 }
 0x721   : > { %v3685_v55 = vpop.f32.mrf.mxu1  ;;  %v3954_v36 = vadd.f32 -0.28449672, %v3938_v31  ;;  %6216 = vmatprep.mubr.msk.f32.mxu0 %vm2430_vm3, %v4140_v45  ;;  %v4000_v6 = vmul.f32 %v8455_v42, %v3984_v3  ;;  %v4143_v19 = vmul.f32 %v4127_v17, %v8390_v18  ;;  %v3776_v18 = vsel %vm3760_vm14, 1.0, %v9424_v58 }
 0x722   : > { %v8508_v30 = vadd.f32 %v8311_v61, %v3685_v55  ;;  %v4126_v20 = vadd.f32 1.0, %v4110_v48  ;;  %v3987_v11 = vadd.f32 0.2548296, %v3971_v12  ;;  %6217 = vmatmul.mubr.msk.f32.vlgmr.msra.gmra.mxu0 %vm2430_vm3, %v4141_v29  ;;  %v4097_v38 = vsub.f32 1.0, %v4081_v39  ;;  %v6555_v12 = vld [vmem:[#allocation2 + $0x38] sm:$0xff] }
 0x723   : > { %v3970_v8 = vmul.f32 %v8472_v7, %v3954_v36  ;;  %v8519_v63 = vmul.f32 0.70710677, %v8505_v25  ;;  %6241 = vmatpush3.msra.mxu0 %v8350_v50  ;;  %v4080_v54 = vmul.f32 %v6512_v34, %v4000_v6  ;;  %v3778_v56 = vsel %vm3762_vm0, 1.0, %v9424_v58 }
 0x724   : > { %v4142_v57 = vmul.f32 %v4126_v20, %v8413_v43  ;;  %v4003_v24 = vmul.f32 %v8464_v46, %v3987_v11  ;;  %v8525_v42 = vmul.f32 0.70710677, %v8508_v30  ;;  %6242 = vmatprep.subr.mxu0 %v8369_v33  ;;  %v4113_v2 = vmul.f32 %v4097_v38, %v3777_v14  ;;  %v2720_v43 = vpop.f32.mrf.mxu0 }
 0x725   : > { %v3986_v32 = vadd.f32 0.2548296, %v3970_v8  ;;  %v3797_v21 = vand.u32 2147483647, %v8519_v63  ;;  %6243 = vmatpush3.msra.mxu0 %v8369_v33  ;;  %v4096_v5 = vsub.f32 1.0, %v4080_v54  ;;  %v3728_v46 = vmul.f32 0.5, %v8356_v26 }
 0x726   : > { %v4083_v50 = vmul.f32 %v8483_v51, %v4003_v24  ;;  %6219 = vmatprep.mubr.msk.f32.mxu0 %vm2430_vm3, %v4142_v57  ;;  %6244 = vmatprep.subr.mxu0 %v8394_v60  ;;  %v8543_v51 = vand.u32 2147483647, %v8525_v42  ;;  %v4129_v62 = vadd.f32 1.0, %v4113_v2  ;;  %v3779_v26 = vsel %vm3763_vm15, 1.0, %v9424_v58  ;;  %v6158_v45 = vpop.f32.mrf.mxu0  ;;  %v6556_v24 = vld [vmem:[#allocation2 + $0x30] sm:$0xff] }
 0x727   : > { %v4002_v34 = vmul.f32 %v8472_v7, %v3986_v32  ;;  %v3813_v9 = vmul.f32 0.3275911, %v3797_v21  ;;  %6220 = vmatmul.mubr.msk.f32.gmra.mxu0 %vm2430_vm3, %v4143_v19  ;;  %v4112_v33 = vmul.f32 %v4096_v5, %v3776_v18  ;;  %v4021_v29 = vsub.f32 0.0, %v3797_v21 }
 0x728   : > { %v4099_v59 = vsub.f32 1.0, %v4083_v50  ;;  %6245 = vmatpush3.msra.mxu0 %v8394_v60  ;;  %v3812_v37 = vmul.f32 0.3275911, %v8543_v51  ;;  %v3729_v60 = vmul.f32 0.5, %v8347_v49  ;;  %v2783_v3 = vmul.f32 %v6155_v28, %v8341_v4  ;;  %v2730_v6 = vpop.f32.mrf.mxu0 }
 0x729   : > { %v4082_v53 = vmul.f32 %v8485_v10, %v4002_v34  ;;  %v3829_v7 = vadd.f32 1.0, %v3813_v9  ;;  %6246 = vmatprep.subr.mxu0 %v8408_v27  ;;  %v4128_v1 = vadd.f32 1.0, %v4112_v33  ;;  %v2801_v55 = vmul.f32 %v6555_v12, %v8344_v52 }
 0x72a   : > { %v4115_v47 = vmul.f32 %v4099_v59, %v3779_v26  ;;  %6247 = vmatpush3.msra.mxu0 %v8408_v27  ;;  %v3828_v48 = vadd.f32 1.0, %v3812_v37  ;;  %v4145_v17 = vmul.f32 %v4129_v62, %v3729_v60  ;;  %v4037_v20 = vmul.f32 %v4021_v29, %v3797_v21  ;;  %v6557_v21 = vld [vmem:[#allocation2 + $0x48] sm:$0xff]  ;;  %v6161_v34 = vpop.f32.mrf.mxu0  ;;  %v6558_v59 = vld [vmem:[#allocation2 + $0x40] sm:$0xff] }
 0x72b   : > { %v4098_v31 = vsub.f32 1.0, %v4082_v53  ;;  %6517 = vrcp.f32 %v3829_v7  ;;  %v4144_v23 = vmul.f32 %v4128_v1, %v3728_v46  ;;  %v6193_v10 = vpop.f32.mrf.mxu1  ;;  %v2782_v14 = vmul.f32 %v8341_v4, %v2720_v43 }
 0x72c   : > { %v8558_v36 = vadd.f32 %v6193_v10, %v8311_v61  ;;  %v4131_v27 = vadd.f32 1.0, %v4115_v47  ;;  %6519 = vrcp.f32 %v3828_v48  ;;  %v3730_v11 = vmul.f32 0.5, %v8402_v16  ;;  %v2740_v60 = vpop.f32.mrf.mxu0 }
 0x72d   : > { %v4114_v39 = vmul.f32 %v4098_v31, %v3778_v56  ;;  %v3695_v49 = vpop.f32.mrf.mxu1  ;;  %6222 = vmatprep.mubr.msk.f32.mxu0 %vm2430_vm3, %v4144_v23  ;;  %v3731_v57 = vmul.f32 0.5, %v8377_v40  ;;  %v2817_v54 = vadd.f32 %v2801_v55, %v2783_v3  ;;  %v2800_v19 = vmul.f32 %v6556_v24, %v8344_v52  ;;  %v6559_v55 = vld [vmem:[#allocation2 + $0x58] sm:$0xff] }
 0x72e   : > { %v8564_v38 = vmul.f32 0.70710677, %v8558_v36  ;;  %v8567_v8 = vadd.f32 %v8311_v61, %v3695_v49  ;;  %6223 = vmatmul.mubr.msk.f32.gmra.mxu0 %vm2430_vm3, %v4145_v17  ;;  %v2785_v16 = vmul.f32 %v6158_v45, %v8341_v4  ;;  %v2803_v5 = vmul.f32 %v6557_v21, %v8344_v52 }
 0x72f   : > { %v4130_v28 = vadd.f32 1.0, %v4114_v39  ;;  %v4147_v50 = vmul.f32 %v4131_v27, %v3731_v57  ;;  %v4062_v43 = vmul.f32 1.442695, %v4037_v20  ;;  %v2816_v18 = vadd.f32 %v2800_v19, %v2782_v14 }
 0x730   : > { %v3799_v32 = vand.u32 2147483647, %v8564_v38  ;;  %v8576_v46 = vmul.f32 0.70710677, %v8567_v8  ;;  %v4020_v40 = vsub.f32 0.0, %v8543_v51  ;;  %v2784_v33 = vmul.f32 %v8341_v4, %v2730_v6 }
 0x731   : > { %v4146_v2 = vmul.f32 %v4130_v28, %v3730_v11  ;;  %v2802_v62 = vmul.f32 %v6558_v59, %v8344_v52  ;;  %6257 = vmatprep.mubr.msk.f32.mxu1 %vm2018_vm10, %v2816_v18  ;;  %v2819_v47 = vadd.f32 %v2803_v5, %v2785_v16  ;;  %6521 = vpow2.f32 %v4062_v43  ;;  %v6560_v28 = vld [vmem:[#allocation2 + $0x50] sm:$0xff] }
 0x732   : > { %v3815_v9 = vmul.f32 0.3275911, %v3799_v32  ;;  %v3798_v26 = vand.u32 2147483647, %v8576_v46  ;;  %v6196_v53 = vpop.f32.mrf.mxu1  ;;  %6258 = vmatmul.mubr.msk.f32.gmra.mxu1 %vm2018_vm10, %v2817_v54  ;;  %v4036_v56 = vmul.f32 %v4020_v40, %v8543_v51  ;;  %v4023_v31 = vsub.f32 0.0, %v3799_v32 }
 0x733   : > { %6225 = vmatprep.mubr.msk.f32.mxu0 %vm2430_vm3, %v4146_v2  ;;  %v8586_v1 = vadd.f32 %v6196_v53, %v8311_v61  ;;  %v2818_v45 = vadd.f32 %v2802_v62, %v2784_v33  ;;  %v2787_v12 = vmul.f32 %v6161_v34, %v8341_v4  ;;  %v2805_v17 = vmul.f32 %v6559_v55, %v8344_v52 }
 0x734   : > { %6226 = vmatmul.mubr.msk.f32.gmra.mxu0 %vm2430_vm3, %v4147_v50  ;;  %v3831_v7 = vadd.f32 1.0, %v3815_v9  ;;  %v3814_v29 = vmul.f32 0.3275911, %v3798_v26  ;;  %v3705_v37 = vpop.f32.mrf.mxu1  ;;  %v4022_v39 = vsub.f32 0.0, %v3798_v26  ;;  %v2786_v20 = vmul.f32 %v8341_v4, %v2740_v60 }
 0x735   : > { %v8591_v23 = vmul.f32 0.70710677, %v8586_v1  ;;  %v8596_v3 = vadd.f32 %v8311_v61, %v3705_v37  ;;  %6260 = vmatprep.mubr.msk.f32.mxu1 %vm2018_vm10, %v2818_v45  ;;  %v4039_v6 = vmul.f32 %v4023_v31, %v3799_v32  ;;  %v2804_v57 = vmul.f32 %v6560_v28, %v8344_v52 }
 0x736   : > { %6523 = vrcp.f32 %v3831_v7  ;;  %v3830_v10 = vadd.f32 1.0, %v3814_v29  ;;  %6261 = vmatmul.mubr.msk.f32.gmra.mxu1 %vm2018_vm10, %v2819_v47  ;;  %v4060_v24 = vmul.f32 1.442695, %v4036_v56  ;;  %v2821_v2 = vadd.f32 %v2805_v17, %v2787_v12 }
 0x737   : > { %v3801_v27 = vand.u32 2147483647, %v8591_v23  ;;  %v8610_v19 = vmul.f32 0.70710677, %v8596_v3  ;;  %v4038_v21 = vmul.f32 %v4022_v39, %v3798_v26  ;;  %v2820_v43 = vadd.f32 %v2804_v57, %v2786_v20 }
 0x738   : > { %v8593_v48 = vpop.eup %6517  ;;  %6525 = vrcp.f32 %v3830_v10  ;;  %v6199_v50 = vpop.f32.mrf.mxu1  ;;  %v8618_v9 = vmul.f32 0.5, %v8505_v25  ;;  %v4066_v59 = vmul.f32 1.442695, %v4039_v6  ;;  %v8622_v26 = vmul.f32 0.5, %v8508_v30 }
 0x739   : > { %v3877_v51 = vmul.f32 1.0614054, %v8593_v48  ;;  %v8605_v49 = vpop.eup %6519  ;;  %v3817_v11 = vmul.f32 0.3275911, %v3801_v27  ;;  %v4025_v34 = vsub.f32 0.0, %v3801_v27  ;;  %v8615_v40 = vadd.f32 %v6199_v50, %v8311_v61  ;;  %6263 = vmatprep.mubr.msk.f32.mxu1 %vm2018_vm10, %v2820_v43  ;;  %v6561_v50 = vld [vmem:[#allocation2 + $0x68] sm:$0xff] }
 0x73a   : > { %v3876_v54 = vmul.f32 1.0614054, %v8605_v49  ;;  %v3800_v32 = vand.u32 2147483647, %v8610_v19  ;;  %v3715_v62 = vpop.f32.mrf.mxu1  ;;  %6264 = vmatmul.mubr.msk.f32.gmra.mxu1 %vm2018_vm10, %v2821_v2  ;;  %vm3765_vm1 = vcmp.ge.f32.partialorder %v8519_v63, 0.0  ;;  %vm3764_vm2 = vcmp.ge.f32.partialorder %v8525_v42, 0.0 }
 0x73b   : > { %v3893_v14 = vadd.f32 -1.4531521, %v3877_v51  ;;  %v3833_v5 = vadd.f32 1.0, %v3817_v11  ;;  %v4064_v47 = vmul.f32 1.442695, %v4038_v21  ;;  %v4041_v45 = vmul.f32 %v4025_v34, %v3801_v27  ;;  %v6164_v51 = vpop.f32.mrf.mxu0 }
 0x73c   : > { %v3892_v18 = vadd.f32 -1.4531521, %v3876_v54  ;;  %v3816_v7 = vmul.f32 0.3275911, %v3800_v32  ;;  %v8629_v29 = vmul.f32 0.70710677, %v8615_v40  ;;  %v8632_v30 = vadd.f32 %v8311_v61, %v3715_v62 }
 0x73d   : > { %v3909_v16 = vmul.f32 %v8593_v48, %v3893_v14  ;;  %6527 = vrcp.f32 %v3833_v5  ;;  %v4024_v10 = vsub.f32 0.0, %v3800_v32  ;;  %v3781_v63 = vsel %vm3765_vm1, 1.0, %v9424_v58 }
 0x73e   : > { %v3908_v53 = vmul.f32 %v8605_v49, %v3892_v18  ;;  %6529 = vpow2.f32 %v4060_v24  ;;  %v3832_v60 = vadd.f32 1.0, %v3816_v7  ;;  %v6522_v56 = vpop.eup %6521  ;;  %v3803_v12 = vand.u32 2147483647, %v8629_v29  ;;  %v2750_v18 = vpop.f32.mrf.mxu0 }
 0x73f   : > { %v3925_v33 = vadd.f32 1.4214138, %v3909_v16  ;;  %6531 = vpow2.f32 %v4066_v59  ;;  %v4070_v14 = vmul.f32 1.442695, %v4041_v45  ;;  %v8643_v6 = vmul.f32 0.70710677, %v8632_v30 }
 0x740   : > { %v3924_v37 = vadd.f32 1.4214138, %v3908_v53  ;;  %6533 = vrcp.f32 %v3832_v60  ;;  %v3819_v27 = vmul.f32 0.3275911, %v3803_v12  ;;  %v2789_v11 = vmul.f32 %v6164_v51, %v8341_v4 }
 0x741   : > { %v3941_v25 = vmul.f32 %v8593_v48, %v3925_v33  ;;  %6535 = vpow2.f32 %v4064_v47  ;;  %v4040_v24 = vmul.f32 %v4024_v10, %v3800_v32  ;;  %v8651_v5 = vand.u32 2147483647, %v8643_v6  ;;  %v6167_v10 = vpop.f32.mrf.mxu0 }
 0x742   : > { %v3940_v17 = vmul.f32 %v8605_v49, %v3924_v37  ;;  %v3835_v2 = vadd.f32 1.0, %v3819_v27  ;;  %v2807_v43 = vmul.f32 %v6561_v50, %v8344_v52  ;;  %v3780_v33 = vsel %vm3764_vm2, 1.0, %v9424_v58 }
 0x743   : > { %v3957_v31 = vadd.f32 -0.28449672, %v3941_v25  ;;  %v8635_v55 = vpop.eup %6523  ;;  %v4027_v53 = vsub.f32 0.0, %v3803_v12  ;;  %v4068_v47 = vmul.f32 1.442695, %v4040_v24  ;;  %vm3767_vm4 = vcmp.ge.f32.partialorder %v8564_v38, 0.0 }
 0x744   : > { %v3879_v61 = vmul.f32 1.0614054, %v8635_v55  ;;  %v3956_v20 = vadd.f32 -0.28449672, %v3940_v17  ;;  %6537 = vrcp.f32 %v3835_v2  ;;  %v3818_v37 = vmul.f32 0.3275911, %v8651_v5 }
 0x745   : > { %v3973_v39 = vmul.f32 %v8593_v48, %v3957_v31  ;;  %v8646_v28 = vpop.eup %6525  ;;  %6539 = vpow2.f32 %v4070_v14  ;;  %v2823_v42 = vadd.f32 %v2807_v43, %v2789_v11  ;;  %v2788_v31 = vmul.f32 %v8341_v4, %v2750_v18  ;;  %v2760_v43 = vpop.f32.mrf.mxu0 }
 0x746   : > { %v3895_v54 = vadd.f32 -1.4531521, %v3879_v61  ;;  %v3972_v16 = vmul.f32 %v8605_v49, %v3956_v20  ;;  %v3878_v21 = vmul.f32 1.0614054, %v8646_v28  ;;  %v3834_v61 = vadd.f32 1.0, %v3818_v37 }
 0x747   : > { %v3989_v57 = vadd.f32 0.2548296, %v3973_v39  ;;  %v4043_v14 = vmul.f32 %v4027_v53, %v3803_v12  ;;  %vm3766_vm5 = vcmp.ge.f32.partialorder %v8576_v46, 0.0  ;;  %v3734_v46 = vmul.f32 0.5, %v8567_v8 }
 0x748   : > { %v3911_v32 = vmul.f32 %v8635_v55, %v3895_v54  ;;  %v3988_v59 = vadd.f32 0.2548296, %v3972_v16  ;;  %v3894_v62 = vadd.f32 -1.4531521, %v3878_v21  ;;  %6541 = vrcp.f32 %v3834_v61 }
 0x749   : > { %v4005_v34 = vmul.f32 %v8593_v48, %v3989_v57  ;;  %v6562_v57 = vld [vmem:[#allocation2 + $0x60] sm:$0xff]  ;;  %6543 = vpow2.f32 %v4068_v47  ;;  %vm3769_vm6 = vcmp.ge.f32.partialorder %v8591_v23, 0.0  ;;  %vm3768_vm7 = vcmp.ge.f32.partialorder %v8610_v19, 0.0 }
 0x74a   : > { %v3927_v25 = vadd.f32 1.4214138, %v3911_v32  ;;  %v8660_v45 = vpop.eup %6527  ;;  %v4004_v48 = vmul.f32 %v8605_v49, %v3988_v59  ;;  %v3910_v60 = vmul.f32 %v8646_v28, %v3894_v62  ;;  %v2806_v54 = vmul.f32 %v6562_v57, %v8344_v52 }
 0x74b   : > { %v4085_v7 = vmul.f32 %v6522_v56, %v4005_v34  ;;  %v6530_v17 = vpop.eup %6529  ;;  %v3881_v56 = vmul.f32 1.0614054, %v8660_v45  ;;  %v3736_v19 = vmul.f32 0.5, %v8596_v3  ;;  %vm3771_vm8 = vcmp.ge.f32.partialorder %v8629_v29, 0.0 }
 0x74c   : > { %v3943_v39 = vmul.f32 %v8635_v55, %v3927_v25  ;;  %v4084_v27 = vmul.f32 %v6530_v17, %v4004_v48  ;;  %v3926_v20 = vadd.f32 1.4214138, %v3910_v60  ;;  %v6532_v2 = vpop.eup %6531  ;;  %v2822_v50 = vadd.f32 %v2806_v54, %v2788_v31  ;;  %v6563_v25 = vld [vmem:[#allocation2 + $0x78] sm:$0xff] }
 0x74d   : > { %v4101_v51 = vsub.f32 1.0, %v4085_v7  ;;  %v3897_v24 = vadd.f32 -1.4531521, %v3881_v56  ;;  %v8670_v18 = vpop.eup %6533  ;;  %v2809_v37 = vmul.f32 %v6563_v25, %v8344_v52  ;;  %v4074_v60 = vmul.f32 1.442695, %v4043_v14 }
 0x74e   : > { %v3959_v11 = vadd.f32 -0.28449672, %v3943_v39  ;;  %v4100_v16 = vsub.f32 1.0, %v4084_v27  ;;  %v3942_v21 = vmul.f32 %v8646_v28, %v3926_v20  ;;  %v6536_v59 = vpop.eup %6535  ;;  %v3880_v7 = vmul.f32 1.0614054, %v8670_v18  ;;  %6266 = vmatprep.mubr.msk.f32.mxu1 %vm2018_vm10, %v2822_v50  ;;  %v6564_v27 = vld [vmem:[#allocation2 + $0x70] sm:$0xff] }
 0x74f   : > { %v4117_v49 = vmul.f32 %v4101_v51, %v3781_v63  ;;  %v3913_v32 = vmul.f32 %v8660_v45, %v3897_v24  ;;  %v2791_v63 = vmul.f32 %v6167_v10, %v8341_v4  ;;  %v2790_v31 = vmul.f32 %v8341_v4, %v2760_v43  ;;  %6267 = vmatmul.mubr.msk.f32.gmra.mxu1 %vm2018_vm10, %v2823_v42 }
 0x750   : > { %v3975_v12 = vmul.f32 %v8635_v55, %v3959_v11  ;;  %v4116_v62 = vmul.f32 %v4100_v16, %v3780_v33  ;;  %v3958_v53 = vadd.f32 -0.28449672, %v3942_v21  ;;  %v3896_v51 = vadd.f32 -1.4531521, %v3880_v7 }
 0x751   : > { %v4133_v34 = vadd.f32 1.0, %v4117_v49  ;;  %v3929_v48 = vadd.f32 1.4214138, %v3913_v32  ;;  %v4026_v33 = vsub.f32 0.0, %v8651_v5  ;;  %v2808_v20 = vmul.f32 %v6564_v27, %v8344_v52  ;;  %v8686_v14 = vpop.eup %6537 }
 0x752   : > { %v3991_v47 = vadd.f32 0.2548296, %v3975_v12  ;;  %v4132_v17 = vadd.f32 1.0, %v4116_v62  ;;  %v3974_v10 = vmul.f32 %v8646_v28, %v3958_v53  ;;  %v3912_v54 = vmul.f32 %v8670_v18, %v3896_v51  ;;  %v6540_v11 = vpop.eup %6539 }
 0x753   : > { %v4149_v39 = vmul.f32 %v4133_v34, %v8618_v9  ;;  %v3945_v61 = vmul.f32 %v8660_v45, %v3929_v48  ;;  %v2825_v49 = vadd.f32 %v2809_v37, %v2791_v63  ;;  %v3883_v9 = vmul.f32 1.0614054, %v8686_v14 }
 0x754   : > { %v4007_v56 = vmul.f32 %v8635_v55, %v3991_v47  ;;  %v4148_v57 = vmul.f32 %v4132_v17, %v8622_v26  ;;  %v3990_v42 = vadd.f32 0.2548296, %v3974_v10  ;;  %v2824_v21 = vadd.f32 %v2808_v20, %v2790_v31 }
 0x755   : > { %v3961_v16 = vadd.f32 -0.28449672, %v3945_v61  ;;  %v3928_v50 = vadd.f32 1.4214138, %v3912_v54  ;;  %v3899_v34 = vadd.f32 -1.4531521, %v3883_v9  ;;  %v4042_v12 = vmul.f32 %v4026_v33, %v8651_v5  ;;  %v6542_v7 = vpop.eup %6541 }
 0x756   : > { %v4087_v24 = vmul.f32 %v6532_v2, %v4007_v56  ;;  %v4006_v55 = vmul.f32 %v8646_v28, %v3990_v42  ;;  %6228 = vmatprep.mubr.msk.f32.mxu0 %vm2430_vm3, %v4148_v57  ;;  %6269 = vmatprep.mubr.msk.f32.mxu1 %vm2018_vm10, %v2824_v21  ;;  %v3783_v2 = vsel %vm3767_vm4, 1.0, %v9424_v58  ;;  %6545 = vpow2.f32 %v4074_v60  ;;  %v6544_v47 = vpop.eup %6543 }
 0x757   : > { %v3977_v26 = vmul.f32 %v8660_v45, %v3961_v16  ;;  %6229 = vmatmul.mubr.msk.f32.gmra.mxu0 %vm2430_vm3, %v4149_v39  ;;  %v3944_v28 = vmul.f32 %v8670_v18, %v3928_v50  ;;  %6270 = vmatmul.mubr.msk.f32.gmra.mxu1 %vm2018_vm10, %v2825_v49  ;;  %v3915_v53 = vmul.f32 %v8686_v14, %v3899_v34  ;;  %v3782_v5 = vsel %vm3766_vm5, 1.0, %v9424_v58 }
 0x758   : > { %v4103_v43 = vsub.f32 1.0, %v4087_v24  ;;  %v4086_v32 = vmul.f32 %v6536_v59, %v4006_v55  ;;  %v3882_v48 = vmul.f32 1.0614054, %v6542_v7  ;;  %v4072_v31 = vmul.f32 1.442695, %v4042_v12 }
 0x759   : > { %v3993_v62 = vadd.f32 0.2548296, %v3977_v26  ;;  %v3960_v37 = vadd.f32 -0.28449672, %v3944_v28  ;;  %v3931_v59 = vadd.f32 1.4214138, %v3915_v53  ;;  %v2776_v29 = vmul.f32 %v8341_v4, %v8405_v22 }
 0x75a   : > { %v4119_v63 = vmul.f32 %v4103_v43, %v3783_v2  ;;  %v4102_v25 = vsub.f32 1.0, %v4086_v32  ;;  %v3735_v17 = vmul.f32 0.5, %v8558_v36  ;;  %v3898_v56 = vadd.f32 -1.4531521, %v3882_v48  ;;  %v6565_v48 = vld [vmem:[#allocation2] sm:$0xff] }
 0x75b   : > { %v4009_v38 = vmul.f32 %v8660_v45, %v3993_v62  ;;  %v3976_v51 = vmul.f32 %v8670_v18, %v3960_v37  ;;  %v3947_v39 = vmul.f32 %v8686_v14, %v3931_v59  ;;  %6547 = vpow2.f32 %v4072_v31 }
 0x75c   : > { %v4118_v10 = vmul.f32 %v4102_v25, %v3782_v5  ;;  %v4135_v33 = vadd.f32 1.0, %v4119_v63  ;;  %v3914_v57 = vmul.f32 %v6542_v7, %v3898_v56  ;;  %v3785_v24 = vsel %vm3769_vm6, 1.0, %v9424_v58 }
 0x75d   : > { %v4089_v60 = vmul.f32 %v6540_v11, %v4009_v38  ;;  %v3992_v27 = vadd.f32 0.2548296, %v3976_v51  ;;  %v3963_v20 = vadd.f32 -0.28449672, %v3947_v39  ;;  %v3784_v55 = vsel %vm3768_vm7, 1.0, %v9424_v58 }
 0x75e   : > { %v4134_v61 = vadd.f32 1.0, %v4118_v10  ;;  %v4151_v54 = vmul.f32 %v4135_v33, %v3735_v17  ;;  %v3930_v11 = vadd.f32 1.4214138, %v3914_v57  ;;  %v3737_v28 = vmul.f32 0.5, %v8586_v1  ;;  %v6566_v33 = vld [vmem:[#allocation2 + $0x8] sm:$0xff] }
 0x75f   : > { %v4105_v45 = vsub.f32 1.0, %v4089_v60  ;;  %v4008_v36 = vmul.f32 %v8670_v18, %v3992_v27  ;;  %v3979_v49 = vmul.f32 %v8686_v14, %v3963_v20  ;;  %vm3770_vm9 = vcmp.ge.f32.partialorder %v8643_v6, 0.0  ;;  %v9436_v20 = vld [vmem:[#allocation7_spill] sm:$0xff] }
 0x760   : > { %v4150_v42 = vmul.f32 %v4134_v61, %v3734_v46  ;;  %v3946_v9 = vmul.f32 %v6542_v7, %v3930_v11  ;;  %v3786_v1 = vsel %vm3770_vm9, 1.0, %v9424_v58  ;;  %v3738_v17 = vmul.f32 0.5, %v8632_v30 }
 0x761   : > { %v4088_v8 = vmul.f32 %v6544_v47, %v4008_v36  ;;  %v4121_v23 = vmul.f32 %v4105_v45, %v3785_v24  ;;  %v3995_v16 = vadd.f32 0.2548296, %v3979_v49  ;;  %v3739_v6 = vmul.f32 0.5, %v8615_v40 }
 0x762   : > { %6231 = vmatprep.mubr.msk.f32.mxu0 %vm2430_vm3, %v4150_v42  ;;  %v3962_v50 = vadd.f32 -0.28449672, %v3946_v9  ;;  %v2777_v51 = vmul.f32 %v8371_v41, %v8341_v4  ;;  %v8746_v4 = vld [vmem:[%s922_s23] ss:$0 sm:$0xff]  ;;  %v9437_v42 = vld [vmem:[#allocation8_spill] sm:$0xff] }
 0x763   : > { %6232 = vmatmul.mubr.msk.f32.gmra.mxu0 %vm2430_vm3, %v4151_v54  ;;  %v4104_v21 = vsub.f32 1.0, %v4088_v8  ;;  %v4011_v18 = vmul.f32 %v8686_v14, %v3995_v16  ;;  %v6546_v43 = vpop.eup %6545  ;;  %v4137_v34 = vadd.f32 1.0, %v4121_v23  ;;  %v3787_v14 = vsel %vm3771_vm8, 1.0, %v9424_v58  ;;  %v9438_v54 = vld [vmem:[#allocation9_spill] sm:$0xff] }
 0x764   : > { %v3978_v2 = vmul.f32 %v6542_v7, %v3962_v50  ;;  %v2795_v58 = vmul.f32 %v6566_v33, %v8344_v52 }
 0x765   : > { %v4120_v26 = vmul.f32 %v4104_v21, %v3784_v55  ;;  %v4091_v12 = vmul.f32 %v6546_v43, %v4011_v18  ;;  %v4153_v5 = vmul.f32 %v4137_v34, %v3737_v28  ;;  %v9439_v43 = vld [vmem:[#allocation10_spill] sm:$0xff] }
 0x766   : > { %v3994_v63 = vadd.f32 0.2548296, %v3978_v2  ;;  %v2811_v22 = vadd.f32 %v2795_v58, %v2777_v51 }
 0x767   : > { %v4136_v32 = vadd.f32 1.0, %v4120_v26  ;;  %v4107_v53 = vsub.f32 1.0, %v4091_v12 }
 0x768   : > { %v4010_v25 = vmul.f32 %v6542_v7, %v3994_v63  ;;  %v6548_v37 = vpop.eup %6547  ;;  %v2794_v7 = vmul.f32 %v6565_v48, %v8344_v52 }
 0x769   : > { %v4152_v62 = vmul.f32 %v4136_v32, %v3736_v19  ;;  %v4123_v3 = vmul.f32 %v4107_v53, %v3787_v14  ;;  %v9440_v32 = vld [vmem:[#allocation11_spill] sm:$0xff] }
 0x76a   : > { %v4090_v47 = vmul.f32 %v6548_v37, %v4010_v25  ;;  %v2810_v39 = vadd.f32 %v2794_v7, %v2776_v29 }
 0x76b   : > { %6234 = vmatprep.mubr.msk.f32.mxu0 %vm2430_vm3, %v4152_v62  ;;  %v4139_v31 = vadd.f32 1.0, %v4123_v3 }
 0x76c   : > { %6235 = vmatmul.mubr.msk.f32.gmra.mxu0 %vm2430_vm3, %v4153_v5  ;;  %v4106_v38 = vsub.f32 1.0, %v4090_v47 }
 0x76d   : > { %v4155_v56 = vmul.f32 %v4139_v31, %v3739_v6 }
 0x76e   : > { %v4122_v59 = vmul.f32 %v4106_v38, %v3786_v1 }
 0x770   : > { %v4138_v10 = vadd.f32 1.0, %v4122_v59  ;;  %v9441_v59 = vld [vmem:[#allocation12_spill] sm:$0xff] }
 0x772   : > { %v4154_v60 = vmul.f32 %v4138_v10, %v3738_v17  ;;  %v9442_v17 = vld [vmem:[#allocation13_spill] sm:$0xff] }
 0x774   : > { %6237 = vmatprep.mubr.msk.f32.mxu0 %vm2430_vm3, %v4154_v60 }
 0x775   : > { %6238 = vmatmul.mubr.msk.f32.gmra.mxu0 %vm2430_vm3, %v4155_v56 }
 0x776   : > { %6248 = vmatprep.mubr.msk.f32.mxu0 %vm2018_vm10, %v2810_v39 }
 0x779   : > { %6249 = vmatmul.mubr.msk.f32.vlgmr.msra.gmra.mxu0 %vm2018_vm10, %v2811_v22 }
 0x7e2   : > { %v6218_v30 = vpop.f32.mrf.mxu0 }
 0x7e3   : > { %v8752_v61 = vadd.f32 %v6218_v30, %v8746_v4 }
 0x7e4   : > { %v4285_v40 = vpop.f32.mrf.mxu0 }
 0x7e5   : > { %v8749_v41 = vadd.f32 %v8746_v4, %v4285_v40  ;;  %v4367_v36 = vmul.f32 %v9437_v42, %v8752_v61 }
 0x7e7   : > { %v6221_v46 = vpop.f32.mrf.mxu0  ;;  %v4366_v57 = vmul.f32 %v9436_v20, %v8749_v41  ;;  %v4420_v23 = vmul.f32 %v4367_v36, %v4367_v36  ;;  %v4383_v18 = vsel %vm2018_vm10, %v4367_v36, 0.0 }
 0x7e8   : > { %v8764_v8 = vadd.f32 %v6221_v46, %v8746_v4 }
 0x7e9   : > { %v4295_v52 = vpop.f32.mrf.mxu0  ;;  %v4419_v24 = vmul.f32 %v4366_v57, %v4366_v57  ;;  %v4382_v16 = vsel %vm2018_vm10, %v4366_v57, 0.0  ;;  %v4436_v2 = vsel %vm2018_vm10, %v4420_v23, 0.0 }
 0x7ea   : > { %v8755_v27 = vadd.f32 %v8746_v4, %v4295_v52  ;;  %v4369_v26 = vmul.f32 %v9439_v43, %v8764_v8  ;;  %v4384_v12 = vadd.f32 %v4383_v18, %v4382_v16  ;;  %v9443_v52 = vld [vmem:[#allocation14_spill] sm:$0xff] }
 0x7eb   : > { %v4435_v50 = vsel %vm2018_vm10, %v4419_v24, 0.0 }
 0x7ec   : > { %v4368_v49 = vmul.f32 %v9438_v54, %v8755_v27  ;;  %v4437_v63 = vadd.f32 %v4436_v2, %v4435_v50  ;;  %v4422_v5 = vmul.f32 %v4369_v26, %v4369_v26  ;;  %v4387_v14 = vsel %vm2018_vm10, %v4369_v26, 0.0  ;;  %v9445_v2 = vld [vmem:[#allocation16_spill] sm:$0xff] }
 0x7ee   : > { %v6224_v45 = vpop.f32.mrf.mxu0  ;;  %v4421_v9 = vmul.f32 %v4368_v49, %v4368_v49  ;;  %v4385_v34 = vsel %vm2018_vm10, %v4368_v49, 0.0  ;;  %v4440_v1 = vsel %vm2018_vm10, %v4422_v5, 0.0 }
 0x7ef   : > { %v4386_v62 = vadd.f32 %v4385_v34, %v4384_v12  ;;  %v8780_v25 = vadd.f32 %v6224_v45, %v8746_v4 }
 0x7f0   : > { %v4305_v11 = vpop.f32.mrf.mxu0  ;;  %v4438_v19 = vsel %vm2018_vm10, %v4421_v9, 0.0 }
 0x7f1   : > { %v8768_v21 = vadd.f32 %v8746_v4, %v4305_v11  ;;  %v4439_v37 = vadd.f32 %v4438_v19, %v4437_v63  ;;  %v4388_v38 = vadd.f32 %v4387_v14, %v4386_v62  ;;  %v4371_v29 = vmul.f32 %v9441_v59, %v8780_v25  ;;  %v9444_v11 = vld [vmem:[#allocation15_spill] sm:$0xff] }
 0x7f3   : > { %v4370_v28 = vmul.f32 %v9440_v32, %v8768_v21  ;;  %v4441_v7 = vadd.f32 %v4440_v1, %v4439_v37  ;;  %v4424_v33 = vmul.f32 %v4371_v29, %v4371_v29  ;;  %v4391_v56 = vsel %vm2018_vm10, %v4371_v29, 0.0 }
 0x7f4   : > { %v6227_v55 = vpop.f32.mrf.mxu0 }
 0x7f5   : > { %v4423_v47 = vmul.f32 %v4370_v28, %v4370_v28  ;;  %v4389_v48 = vsel %vm2018_vm10, %v4370_v28, 0.0  ;;  %v8794_v58 = vadd.f32 %v6227_v55, %v8746_v4  ;;  %v4444_v46 = vsel %vm2018_vm10, %v4424_v33, 0.0 }
 0x7f6   : > { %v4315_v53 = vpop.f32.mrf.mxu0  ;;  %v4390_v51 = vadd.f32 %v4389_v48, %v4388_v38 }
 0x7f7   : > { %v8784_v3 = vadd.f32 %v8746_v4, %v4315_v53  ;;  %v4442_v31 = vsel %vm2018_vm10, %v4423_v47, 0.0  ;;  %v4373_v45 = vmul.f32 %v9443_v52, %v8794_v58 }
 0x7f8   : > { %v4443_v39 = vadd.f32 %v4442_v31, %v4441_v7  ;;  %v4392_v40 = vadd.f32 %v4391_v56, %v4390_v51 }
 0x7f9   : > { %v4372_v10 = vmul.f32 %v9442_v17, %v8784_v3  ;;  %v4426_v16 = vmul.f32 %v4373_v45, %v4373_v45  ;;  %v4395_v18 = vsel %vm2018_vm10, %v4373_v45, 0.0 }
 0x7fa   : > { %v4445_v36 = vadd.f32 %v4444_v46, %v4443_v39 }
 0x7fb   : > { %v4425_v22 = vmul.f32 %v4372_v10, %v4372_v10  ;;  %v4393_v57 = vsel %vm2018_vm10, %v4372_v10, 0.0  ;;  %v4448_v12 = vsel %vm2018_vm10, %v4426_v16, 0.0 }
 0x7fc   : > { %v4394_v23 = vadd.f32 %v4393_v57, %v4392_v40 }
 0x7fd   : > { %v4446_v49 = vsel %vm2018_vm10, %v4425_v22, 0.0 }
 0x7fe   : > { %v4447_v55 = vadd.f32 %v4446_v49, %v4445_v36  ;;  %v4396_v34 = vadd.f32 %v4395_v18, %v4394_v23 }
 0x800   : > { %v4449_v62 = vadd.f32 %v4448_v12, %v4447_v55 }
 0x817   : > { %v6230_v6 = vpop.f32.mrf.mxu0 }
 0x818   : > { %v8808_v9 = vadd.f32 %v6230_v6, %v8746_v4 }
 0x819   : > { %v4325_v60 = vpop.f32.mrf.mxu0 }
 0x81a   : > { %v8798_v30 = vadd.f32 %v8746_v4, %v4325_v60  ;;  %v4375_v19 = vmul.f32 %v9445_v2, %v8808_v9 }
 0x81c   : > { %v4374_v24 = vmul.f32 %v9444_v11, %v8798_v30  ;;  %v4428_v47 = vmul.f32 %v4375_v19, %v4375_v19  ;;  %v4399_v29 = vsel %vm2018_vm10, %v4375_v19, 0.0 }
 0x81e   : > { %v4427_v50 = vmul.f32 %v4374_v24, %v4374_v24  ;;  %v4397_v28 = vsel %vm2018_vm10, %v4374_v24, 0.0  ;;  %v4452_v31 = vsel %vm2018_vm10, %v4428_v47, 0.0 }
 0x81f   : > { %v4398_v37 = vadd.f32 %v4397_v28, %v4396_v34 }
 0x820   : > { %v4450_v5 = vsel %vm2018_vm10, %v4427_v50, 0.0 }
 0x821   : > { %v4451_v1 = vadd.f32 %v4450_v5, %v4449_v62  ;;  %v4400_v7 = vadd.f32 %v4399_v29, %v4398_v37 }
 0x823   : > { %v6233_v26 = vpop.f32.mrf.mxu0  ;;  %v4453_v33 = vadd.f32 %v4452_v31, %v4451_v1  ;;  %v9446_v1 = vld [vmem:[#allocation22_spill] sm:$0xff] }
 0x824   : > { %v8822_v38 = vadd.f32 %v6233_v26, %v8746_v4 }
 0x825   : > { %v4335_v63 = vpop.f32.mrf.mxu0 }
 0x826   : > { %v8816_v53 = vadd.f32 %v8746_v4, %v4335_v63  ;;  %v4377_v10 = vmul.f32 %v7817_v0, %v8822_v38 }
 0x828   : > { %v4376_v14 = vmul.f32 %v7834_v15, %v8816_v53  ;;  %v4430_v40 = vmul.f32 %v4377_v10, %v4377_v10  ;;  %v4403_v36 = vsel %vm2018_vm10, %v4377_v10, 0.0 }
 0x82a   : > { %v4429_v48 = vmul.f32 %v4376_v14, %v4376_v14  ;;  %v4401_v6 = vsel %vm2018_vm10, %v4376_v14, 0.0  ;;  %v4456_v23 = vsel %vm2018_vm10, %v4430_v40, 0.0 }
 0x82b   : > { %v4402_v56 = vadd.f32 %v4401_v6, %v4400_v7 }
 0x82c   : > { %v6236_v51 = vpop.f32.mrf.mxu0  ;;  %v4454_v60 = vsel %vm2018_vm10, %v4429_v48, 0.0 }
 0x82d   : > { %v8834_v46 = vadd.f32 %v6236_v51, %v8746_v4  ;;  %v4455_v45 = vadd.f32 %v4454_v60, %v4453_v33  ;;  %v4404_v49 = vadd.f32 %v4403_v36, %v4402_v56  ;;  %v8857_v36 = vpop.f32.mrf.mxu1 }
 0x82e   : > { %v4345_v39 = vpop.f32.mrf.mxu0 }
 0x82f   : > { %v8831_v22 = vadd.f32 %v8746_v4, %v4345_v39  ;;  %v4379_v16 = vmul.f32 %v9430_v44, %v8834_v46  ;;  %v4457_v18 = vadd.f32 %v4456_v23, %v4455_v45 }
 0x831   : > { %v4378_v57 = vmul.f32 %v9429_v13, %v8831_v22  ;;  %v4432_v12 = vmul.f32 %v4379_v16, %v4379_v16  ;;  %v4407_v62 = vsel %vm2018_vm10, %v4379_v16, 0.0 }
 0x833   : > { %v4431_v24 = vmul.f32 %v4378_v57, %v4378_v57  ;;  %v4405_v55 = vsel %vm2018_vm10, %v4378_v57, 0.0  ;;  %v4460_v47 = vsel %vm2018_vm10, %v4432_v12, 0.0 }
 0x834   : > { %v4406_v26 = vadd.f32 %v4405_v55, %v4404_v49  ;;  %v8859_v55 = vpop.f32.mrf.mxu1 }
 0x835   : > { %v4458_v50 = vsel %vm2018_vm10, %v4431_v24, 0.0  ;;  %v6239_v34 = vpop.f32.mrf.mxu0 }
 0x836   : > { %v8845_v19 = vadd.f32 %v6239_v34, %v8746_v4  ;;  %v4459_v28 = vadd.f32 %v4458_v50, %v4457_v18  ;;  %v4408_v14 = vadd.f32 %v4407_v62, %v4406_v26  ;;  %v8861_v12 = vpop.f32.mrf.mxu1 }
 0x837   : > { %v4355_v63 = vpop.f32.mrf.mxu0 }
 0x838   : > { %v4381_v5 = vmul.f32 %v9433_v35, %v8845_v19  ;;  %v4356_v37 = vadd.f32 %v8746_v4, %v4355_v63  ;;  %v4461_v48 = vadd.f32 %v4460_v47, %v4459_v28  ;;  %v9447_v63 = vld [vmem:[#allocation21_spill] sm:$0xff]  ;;  %v8869_v47 = vpop.f32.mrf.mxu1 }
 0x83a   : > { %v4380_v29 = vmul.f32 %v9446_v1, %v4356_v37  ;;  %v4434_v7 = vmul.f32 %v4381_v5, %v4381_v5  ;;  %v4411_v51 = vsel %vm2018_vm10, %v4381_v5, 0.0 }
 0x83c   : > { %v4409_v31 = vsel %vm2018_vm10, %v4380_v29, 0.0  ;;  %v4433_v10 = vmul.f32 %v4380_v29, %v4380_v29  ;;  %v4464_v56 = vsel %vm2018_vm10, %v4434_v7, 0.0  ;;  %v8871_v7 = vpop.f32.mrf.mxu1 }
 0x83d   : > { %v4410_v6 = vadd.f32 %v4409_v31, %v4408_v14 }
 0x83e   : > { %v4462_v33 = vsel %vm2018_vm10, %v4433_v10, 0.0  ;;  %v8873_v10 = vpop.f32.mrf.mxu1 }
 0x83f   : > { %v4412_v60 = vadd.f32 %v4411_v51, %v4410_v6  ;;  %v4463_v39 = vadd.f32 %v4462_v33, %v4461_v48 }
 0x840   : > { %v8875_v6 = vpop.f32.mrf.mxu1 }
 0x841   : > { %v4413_v4 = vrot.slane %v4412_v60, 4  ;;  %v4465_v40 = vadd.f32 %v4464_v56, %v4463_v39 }
 0x842   : > { %v8877_v51 = vpop.f32.mrf.mxu1 }
 0x843   : > { %v4414_v45 = vadd.f32 %v4413_v4, %v4412_v60  ;;  %v4466_v57 = vrot.slane %v4465_v40, 4 }
 0x845   : > { %v4415_v49 = vrot.slane %v4414_v45, 2  ;;  %v4467_v24 = vadd.f32 %v4466_v57, %v4465_v40 }
 0x847   : > { %v4416_v23 = vadd.f32 %v4415_v49, %v4414_v45  ;;  %v4468_v16 = vrot.slane %v4467_v24, 2 }
 0x849   : > { %v4417_v18 = vrot.slane %v4416_v23, 1  ;;  %v4469_v50 = vadd.f32 %v4468_v16, %v4467_v24 }
 0x84b   : > { %v4418_v26 = vadd.f32 %v4417_v18, %v4416_v23  ;;  %v4470_v34 = vrot.slane %v4469_v50, 1 }
 0x84d   : > { %v4471_v28 = vadd.f32 %v4470_v34, %v4469_v50  ;;  %v8864_v62 = vmul.f32 %v4418_v26, %v9447_v63  ;;  %v8932_v26 = vld [vmem:[%s928_s15] ss:$0 sm:$0xff] }
 0x84f   : > { %v4473_v5 = vmul.f32 %v4471_v28, %v9447_v63  ;;  %v4474_v14 = vmul.f32 %v8864_v62, %v8864_v62  ;;  %v4491_v33 = vsub.f32 %v4356_v37, %v8864_v62  ;;  %v4478_v60 = vsub.f32 %v8752_v61, %v8864_v62 }
 0x850   : > { %v4477_v39 = vsub.f32 %v8749_v41, %v8864_v62  ;;  %v4480_v56 = vsub.f32 %v8764_v8, %v8864_v62  ;;  %v4479_v4 = vsub.f32 %v8755_v27, %v8864_v62  ;;  %v4482_v40 = vsub.f32 %v8780_v25, %v8864_v62 }
 0x851   : > { %v4475_v29 = vsub.f32 %v4473_v5, %v4474_v14  ;;  %v4481_v45 = vsub.f32 %v8768_v21, %v8864_v62  ;;  %v4484_v37 = vsub.f32 %v8794_v58, %v8864_v62  ;;  %v4483_v61 = vsub.f32 %v8784_v3, %v8864_v62  ;;  %v8909_v21 = vld [vmem:[%s925_s21] ss:$0 sm:$0xff]  ;;  %v8911_v58 = vpop.f32.mrf.mxu1 }
 0x852   : > { %v4486_v41 = vsub.f32 %v8808_v9, %v8864_v62  ;;  %v4485_v8 = vsub.f32 %v8798_v30, %v8864_v62  ;;  %v4488_v27 = vsub.f32 %v8822_v38, %v8864_v62  ;;  %v4487_v3 = vsub.f32 %v8816_v53, %v8864_v62 }
 0x853   : > { %v4476_v48 = vmax.f32 %v4475_v29, 0.0  ;;  %v4490_v57 = vsub.f32 %v8834_v46, %v8864_v62  ;;  %v9449_v30 = vsub.f32 %v8831_v22, %v8864_v62  ;;  %v9450_v9 = vsub.f32 %v8845_v19, %v8864_v62 }
 0x855   : > { %v4493_v31 = vadd.f32 1e-06, %v4476_v48 }
 0x857   : > { %6549 = vrsqrt.f32 %v4493_v31 }
 0x864   : > { %v8902_v25 = vpop.eup %6549 }
 0x865   : > { %v8922_v23 = vmul.f32 %v8902_v25, %v4491_v33  ;;  %v4496_v16 = vmul.f32 %v8902_v25, %v4478_v60  ;;  %v4495_v18 = vmul.f32 %v8902_v25, %v4477_v39  ;;  %v4498_v50 = vmul.f32 %v8902_v25, %v4480_v56  ;;  %v6250_v33 = vpop.f32.mrf.mxu0 }
 0x866   : > { %v4497_v34 = vmul.f32 %v8902_v25, %v4479_v4  ;;  %v4500_v28 = vmul.f32 %v8902_v25, %v4482_v40  ;;  %v4499_v63 = vmul.f32 %v8902_v25, %v4481_v45  ;;  %v4502_v5 = vmul.f32 %v8902_v25, %v4484_v37  ;;  %v8946_v40 = vpop.f32.mrf.mxu1 }
 0x867   : > { %v4518_v14 = vmul.f32 %v8909_v21, %v4496_v16  ;;  %v4517_v29 = vmul.f32 %v8909_v21, %v4495_v18  ;;  %v4520_v48 = vmul.f32 %v8909_v21, %v4498_v50  ;;  %v4501_v31 = vmul.f32 %v8902_v25, %v4483_v61  ;;  %v4689_v24 = vpop.f32.mrf.mxu0 }
 0x868   : > { %v4519_v60 = vmul.f32 %v8909_v21, %v4497_v34  ;;  %v4522_v39 = vmul.f32 %v8909_v21, %v4500_v28  ;;  %v4521_v56 = vmul.f32 %v8909_v21, %v4499_v63  ;;  %v4524_v4 = vmul.f32 %v8909_v21, %v4502_v5 }
 0x869   : > { %v4540_v45 = vadd.f32 %v8932_v26, %v4518_v14  ;;  %v4539_v37 = vadd.f32 %v8932_v26, %v4517_v29  ;;  %v4542_v16 = vadd.f32 %v8932_v26, %v4520_v48  ;;  %v4523_v18 = vmul.f32 %v8909_v21, %v4501_v31 }
 0x86a   : > { %v4541_v61 = vadd.f32 %v8932_v26, %v4519_v60  ;;  %v4544_v50 = vadd.f32 %v8932_v26, %v4522_v39  ;;  %v4543_v34 = vadd.f32 %v8932_v26, %v4521_v56  ;;  %v4546_v28 = vadd.f32 %v8932_v26, %v4524_v4  ;;  %v8964_v56 = vpop.f32.mrf.mxu1 }
 0x86b   : > { %v4556_v63 = vmul.f32 %v9437_v42, %v4540_v45  ;;  %v4555_v5 = vmul.f32 %v9436_v20, %v4539_v37  ;;  %v4558_v14 = vmul.f32 %v9439_v43, %v4542_v16  ;;  %v4545_v29 = vadd.f32 %v8932_v26, %v4523_v18 }
 0x86c   : > { %v4557_v48 = vmul.f32 %v9438_v54, %v4541_v61  ;;  %v4560_v31 = vmul.f32 %v9441_v59, %v4544_v50  ;;  %v4559_v60 = vmul.f32 %v9440_v32, %v4543_v34  ;;  %v4562_v39 = vmul.f32 %v9443_v52, %v4546_v28 }
 0x86d   : > { %v4769_v4 = vadd.f32 %v6250_v33, %v4556_v63  ;;  %v4768_v49 = vadd.f32 %v4689_v24, %v4555_v5  ;;  %v4771_v45 = vadd.f32 %v8857_v36, %v4558_v14  ;;  %v4561_v37 = vmul.f32 %v9442_v17, %v4545_v29 }
 0x86e   : > { %v4770_v16 = vadd.f32 %v8859_v55, %v4557_v48  ;;  %v4773_v18 = vadd.f32 %v8861_v12, %v4560_v31  ;;  %v4772_v61 = vadd.f32 %v8869_v47, %v4559_v60  ;;  %v4775_v50 = vadd.f32 %v8871_v7, %v4562_v39  ;;  %v4749_v47 = vpop.f32.mrf.mxu1 }
 0x86f   : > { %v8973_v34 = vmul.f32 %v9437_v42, %v4769_v4  ;;  %v8976_v28 = vmul.f32 %v9436_v20, %v4768_v49  ;;  %v8979_v24 = vmul.f32 %v9439_v43, %v4771_v45  ;;  %v4774_v36 = vadd.f32 %v8873_v10, %v4561_v37 }
 0x870   : > { %v8983_v33 = vmul.f32 %v9438_v54, %v4770_v16  ;;  %v8986_v55 = vmul.f32 %v9441_v59, %v4773_v18  ;;  %v8989_v12 = vmul.f32 %v9440_v32, %v4772_v61  ;;  %v8992_v42 = vmul.f32 %v9443_v52, %v4775_v50 }
 0x871   : > { %4801 = vst.msk [vmem:[#allocation2 + $0x8] sm:$0xff] %vm2018_vm10, %v8973_v34  ;;  %4800 = vst.msk [vmem:[#allocation2] sm:$0xff] %vm2018_vm10, %v8976_v28  ;;  %v9001_v20 = vmul.f32 %v9442_v17, %v4774_v36  ;;  %v4504_v54 = vmul.f32 %v8902_v25, %v4486_v41  ;;  %v4503_v43 = vmul.f32 %v8902_v25, %v4485_v8  ;;  %v6271_v8 = vpop.f32.mrf.mxu1 }
 0x872   : > { %4803 = vst.msk [vmem:[#allocation2 + $0x18] sm:$0xff] %vm2018_vm10, %v8979_v24  ;;  %v4506_v32 = vmul.f32 %v8902_v25, %v4488_v27  ;;  %4802 = vst.msk [vmem:[#allocation2 + $0x10] sm:$0xff] %vm2018_vm10, %v8983_v33  ;;  %v4505_v59 = vmul.f32 %v8902_v25, %v4487_v3  ;;  %v4508_v17 = vmul.f32 %v8902_v25, %v4490_v57 }
 0x873   : > { %4805 = vst.msk [vmem:[#allocation2 + $0x28] sm:$0xff] %vm2018_vm10, %v8986_v55  ;;  %4804 = vst.msk [vmem:[#allocation2 + $0x20] sm:$0xff] %vm2018_vm10, %v8989_v12  ;;  %v4507_v52 = vmul.f32 %v8902_v25, %v9449_v30  ;;  %v4510_v38 = vmul.f32 %v8902_v25, %v9450_v9  ;;  %v4526_v53 = vmul.f32 %v8909_v21, %v4504_v54  ;;  %v4759_v45 = vpop.f32.mrf.mxu1 }
 0x874   : > { %4807 = vst.msk [vmem:[#allocation2 + $0x38] sm:$0xff] %vm2018_vm10, %v8992_v42  ;;  %4806 = vst.msk [vmem:[#allocation2 + $0x30] sm:$0xff] %vm2018_vm10, %v9001_v20  ;;  %v4525_v7 = vmul.f32 %v8909_v21, %v4503_v43  ;;  %v4528_v46 = vmul.f32 %v8909_v21, %v4506_v32  ;;  %v4531_v10 = vmul.f32 %v8909_v21, %v8922_v23 }
 0x875   : > { %v4527_v22 = vmul.f32 %v8909_v21, %v4505_v59  ;;  %v4530_v41 = vmul.f32 %v8909_v21, %v4508_v17  ;;  %v4529_v19 = vmul.f32 %v8909_v21, %v4507_v52  ;;  %v4532_v62 = vmul.f32 %v8909_v21, %v4510_v38 }
 0x876   : > { %v4548_v27 = vadd.f32 %v8932_v26, %v4526_v53  ;;  %v4547_v25 = vadd.f32 %v8932_v26, %v4525_v7  ;;  %v4550_v3 = vadd.f32 %v8932_v26, %v4528_v46  ;;  %v4553_v57 = vadd.f32 %v8932_v26, %v4531_v10 }
 0x877   : > { %v4549_v49 = vadd.f32 %v8932_v26, %v4527_v22  ;;  %v4552_v23 = vadd.f32 %v8932_v26, %v4530_v41  ;;  %v4551_v63 = vadd.f32 %v8932_v26, %v4529_v19  ;;  %v4554_v5 = vadd.f32 %v8932_v26, %v4532_v62 }
 0x878   : > { %v4564_v14 = vmul.f32 %v9445_v2, %v4548_v27  ;;  %v4563_v21 = vmul.f32 %v9444_v11, %v4547_v25  ;;  %v4566_v29 = vmul.f32 %v7817_v0, %v4550_v3  ;;  %v4569_v48 = vmul.f32 %v9446_v1, %v4553_v57 }
 0x879   : > { %v4565_v31 = vmul.f32 %v7834_v15, %v4549_v49  ;;  %v4568_v60 = vmul.f32 %v9430_v44, %v4552_v23  ;;  %v4567_v39 = vmul.f32 %v9429_v13, %v4551_v63  ;;  %v4570_v4 = vmul.f32 %v9433_v35, %v4554_v5 }
 0x87a   : > { %v4777_v37 = vadd.f32 %v8875_v6, %v4564_v14  ;;  %v4776_v26 = vadd.f32 %v8877_v51, %v4563_v21  ;;  %v4779_v16 = vadd.f32 %v8911_v58, %v4566_v29  ;;  %v4782_v18 = vadd.f32 %v4759_v45, %v4569_v48 }
 0x87b   : > { %v4778_v61 = vadd.f32 %v8946_v40, %v4565_v31  ;;  %v4781_v50 = vadd.f32 %v8964_v56, %v4568_v60  ;;  %v4780_v36 = vadd.f32 %v4749_v47, %v4567_v39  ;;  %v4783_v54 = vadd.f32 %v6271_v8, %v4570_v4 }
 0x87c   : > { %v4793_v43 = vmul.f32 %v9445_v2, %v4777_v37  ;;  %v4792_v32 = vmul.f32 %v9444_v11, %v4776_v26  ;;  %v4795_v59 = vmul.f32 %v7817_v0, %v4779_v16  ;;  %v4798_v17 = vmul.f32 %v9446_v1, %v4782_v18 }
 0x87d   : > { %v4794_v6 = vmul.f32 %v7834_v15, %v4778_v61  ;;  %v4797_v51 = vmul.f32 %v9430_v44, %v4781_v50  ;;  %v4796_v58 = vmul.f32 %v9429_v13, %v4780_v36  ;;  %v4799_v40 = vmul.f32 %v9433_v35, %v4783_v54  ;;  %4819 = sbr.rel (%p5586_p11) target bundleno = 2695 (0xa87), region = 124 }
 0x87e   : > { %4809 = vst.msk [vmem:[#allocation2 + $0x48] sm:$0xff] %vm2018_vm10, %v4793_v43  ;;  %4808 = vst.msk [vmem:[#allocation2 + $0x40] sm:$0xff] %vm2018_vm10, %v4792_v32 }
 0x87f   : > { %4811 = vst.msk [vmem:[#allocation2 + $0x58] sm:$0xff] %vm2018_vm10, %v4795_v59  ;;  %4814 = vst.msk [vmem:[#allocation2 + $0x70] sm:$0xff] %vm2018_vm10, %v4798_v17 }
 0x880   : > { %4810 = vst.msk [vmem:[#allocation2 + $0x50] sm:$0xff] %vm2018_vm10, %v4794_v6  ;;  %4813 = vst.msk [vmem:[#allocation2 + $0x68] sm:$0xff] %vm2018_vm10, %v4797_v51 }
 0x881   : > { %4812 = vst.msk [vmem:[#allocation2 + $0x60] sm:$0xff] %vm2018_vm10, %v4796_v58  ;;  %4815 = vst.msk [vmem:[#allocation2 + $0x78] sm:$0xff] %vm2018_vm10, %v4799_v40 }
 0x882   : > { %6272 = vmatprep.subr.msk.mxu0 %vm2018_vm10, %v4799_v40  ;;  %v4820_v0 = vld [vmem:[%s9451_s27] sm:$0xff]  ;;  %v4827_v15 = vld [vmem:[%s9452_s5 + $0x18] sm:$0xff]  ;;  %v4825_v13 = vld [vmem:[%s9452_s5 + $0x8] sm:$0xff]  ;;  %v6612_v44 = vmov 0   ;;  %vm6614_vm3 = vmmov 0   ;;  %vm5104_vm11 = vcmask 64512  }
 0x883   : > { %6273 = vmatpush3.xpose.msk.msra.mxu0 %vm2018_vm10, %v4799_v40  ;;  %6304 = vmatprep.mubr.msk.f32.mxu0 %vm2018_vm10, %v4820_v0  ;;  %v4824_v35 = vld [vmem:[%s9452_s5] sm:$0xff]  ;;  %v4826_v11 = vld [vmem:[%s9452_s5 + $0x10] sm:$0xff]  ;;  %v4821_v2 = vld [vmem:[%s9451_s27 + $0x8] sm:$0xff] }
 0x884   : > { %6274 = vmatprep.subr.msk.mxu0 %vm2018_vm10, %v4798_v17  ;;  %6568 = vset.pattern.permute.xlu1 %v6612_v44  ;;  %v4822_v1 = vld [vmem:[%s9451_s27 + $0x10] sm:$0xff]  ;;  %v4823_v56 = vld [vmem:[%s9451_s27 + $0x18] sm:$0xff] }
 0x885   : > { %6567 = vset.pattern.permute.xlu0 %v6612_v44  ;;  %4835 = vperm.xlu1 %6568, %v4825_v13  }
 0x886   : > { %4845 = vperm.xlu0 %6567, %v4827_v15  }
 0x887   : > { %6275 = vmatpush3.xpose.msk.msra.mxu0 %vm2018_vm10, %v4798_v17 }
 0x888   : > { %6276 = vmatprep.subr.msk.mxu0 %vm2018_vm10, %v4797_v51 }
 0x889   : > { %4830 = vperm.xlu1 %6568, %v4824_v35  }
 0x88a   : > { %4840 = vperm.xlu0 %6567, %v4826_v11  }
 0x88b   : > { %6277 = vmatpush3.xpose.msk.msra.mxu0 %vm2018_vm10, %v4797_v51 }
 0x88c   : > { %6278 = vmatprep.subr.msk.mxu0 %vm2018_vm10, %v4796_v58 }
 0x88f   : > { %6279 = vmatpush3.xpose.msk.msra.mxu0 %vm2018_vm10, %v4796_v58 }
 0x890   : > { %6280 = vmatprep.subr.msk.mxu0 %vm2018_vm10, %v4795_v59 }
 0x893   : > { %6281 = vmatpush3.xpose.msk.msra.mxu0 %vm2018_vm10, %v4795_v59 }
 0x894   : > { %6282 = vmatprep.subr.msk.mxu0 %vm2018_vm10, %v4794_v6 }
 0x897   : > { %6283 = vmatpush3.xpose.msk.msra.mxu0 %vm2018_vm10, %v4794_v6 }
 0x898   : > { %6284 = vmatprep.subr.msk.mxu0 %vm2018_vm10, %v4793_v43 }
 0x89b   : > { %6285 = vmatpush3.xpose.msk.msra.mxu0 %vm2018_vm10, %v4793_v43 }
 0x89c   : > { %6286 = vmatprep.subr.msk.mxu0 %vm2018_vm10, %v4792_v32 }
 0x89f   : > { %6287 = vmatpush3.xpose.msk.msra.mxu0 %vm2018_vm10, %v4792_v32 }
 0x8a0   : > { %6288 = vmatprep.subr.msk.mxu0 %vm2018_vm10, %v8992_v42 }
 0x8a3   : > { %6289 = vmatpush3.xpose.msk.msra.mxu0 %vm2018_vm10, %v8992_v42 }
 0x8a4   : > { %6290 = vmatprep.subr.msk.mxu0 %vm2018_vm10, %v9001_v20 }
 0x8a7   : > { %6291 = vmatpush3.xpose.msk.msra.mxu0 %vm2018_vm10, %v9001_v20 }
 0x8a8   : > { %6292 = vmatprep.subr.msk.mxu0 %vm2018_vm10, %v8986_v55 }
 0x8ab   : > { %6293 = vmatpush3.xpose.msk.msra.mxu0 %vm2018_vm10, %v8986_v55 }
 0x8ac   : > { %6294 = vmatprep.subr.msk.mxu0 %vm2018_vm10, %v8989_v12 }
 0x8af   : > { %6295 = vmatpush3.xpose.msk.msra.mxu0 %vm2018_vm10, %v8989_v12 }
 0x8b0   : > { %6296 = vmatprep.subr.msk.mxu0 %vm2018_vm10, %v8979_v24 }
 0x8b3   : > { %6297 = vmatpush3.xpose.msk.msra.mxu0 %vm2018_vm10, %v8979_v24  ;;  %v5102_v24 = vld [vmem:[%s9454_s4] sm:$0xff] }
 0x8b4   : > { %6298 = vmatprep.subr.msk.mxu0 %vm2018_vm10, %v8983_v33 }
 0x8b7   : > { %6299 = vmatpush3.xpose.msk.msra.mxu0 %vm2018_vm10, %v8983_v33 }
 0x8b8   : > { %6300 = vmatprep.subr.msk.mxu0 %vm2018_vm10, %v8973_v34 }
 0x8bb   : > { %6301 = vmatpush3.xpose.msk.msra.mxu0 %vm2018_vm10, %v8973_v34  ;;  %v6613_v34 = vmov 0.0  }
 0x8bc   : > { %6302 = vmatprep.subr.msk.mxu0 %vm2018_vm10, %v8976_v28  ;;  %6310 = vmatprep.subr.mxu1 %v6613_v34 }
 0x8bd   : > { %6312 = vmatprep.mubr.msk.f32.mxu1 %vm6614_vm3, %v6613_v34 }
 0x8bf   : > { %6303 = vmatpush3.xpose.msk.msra.mxu0 %vm2018_vm10, %v8976_v28  ;;  %v5103_v28 = vld [vmem:[%s9453_s11] sm:$0xff] }
 0x8c0   : > { %6311 = vmatpush3.msra.mxu1 %v5103_v28 }
 0x8c1   : > { %6313 = vmatmul.mubr.msk.f32.vlgmr.msra.gmra.mxu1 %vm5104_vm11, %v5102_v24  ;;  %6315 = vmatprep.subr.mxu1 %v6613_v34 }
 0x8c2   : > { %6305 = vmatmul.mubr.msk.f32.vlgmr.msra.gmra.mxu0 %vm2018_vm10, %v4821_v2  ;;  %6323 = vmatprep.mubr.msk.f32.mxu1 %vm6614_vm3, %v6613_v34 }
 0x8c3   : > { %6307 = vmatprep.mubr.msk.f32.mxu0 %vm2018_vm10, %v4822_v1 }
 0x8c6   : > { %6308 = vmatmul.mubr.msk.f32.gmra.mxu0 %vm2018_vm10, %v4823_v56 }
 0x900   : > { %v4836_v33 = vpop.permute.xlu1 %4835 }
 0x901   : > { %v4846_v42 = vpop.permute.xlu0 %4845 }
 0x904   : > { %v4831_v12 = vpop.permute.xlu1 %4830 }
 0x905   : > { %v4841_v22 = vpop.permute.xlu0 %4840 }
 0x982   : > { %v6306_v55 = vpop.f32.mrf.mxu0 }
 0x983   : > { %v9174_v47 = vadd.f32 %v6306_v55, %v4836_v33 }
 0x984   : > { %v4974_v20 = vpop.f32.mrf.mxu0 }
 0x985   : > { %v9177_v30 = vmul.f32 0.70710677, %v9174_v47  ;;  %v9179_v52 = vadd.f32 %v4974_v20, %v4831_v12 }
 0x986   : > { %v6309_v9 = vpop.f32.mrf.mxu0 }
 0x987   : > { %v5010_v38 = vand.u32 2147483647, %v9177_v30  ;;  %v9183_v53 = vmul.f32 0.70710677, %v9179_v52  ;;  %v9185_v7 = vadd.f32 %v6309_v9, %v4846_v42  ;;  %vm5002_vm13 = vcmp.ge.f32.partialorder %v9177_v30, 0.0 }
 0x988   : > { %v4984_v46 = vpop.f32.mrf.mxu0 }
 0x989   : > { %v5014_v10 = vmul.f32 0.3275911, %v5010_v38  ;;  %v5009_v41 = vand.u32 2147483647, %v9183_v53  ;;  %v9189_v19 = vmul.f32 0.70710677, %v9185_v7  ;;  %v9191_v62 = vadd.f32 %v4984_v46, %v4841_v22 }
 0x98a   : > { %v5066_v21 = vsub.f32 0.0, %v5010_v38  ;;  %vm5001_vm14 = vcmp.ge.f32.partialorder %v9183_v53, 0.0 }
 0x98b   : > { %v5018_v8 = vadd.f32 1.0, %v5014_v10  ;;  %v5013_v27 = vmul.f32 0.3275911, %v5009_v41  ;;  %v5012_v25 = vand.u32 2147483647, %v9189_v19  ;;  %v5065_v29 = vsub.f32 0.0, %v5009_v41 }
 0x98c   : > { %v9195_v3 = vmul.f32 0.70710677, %v9191_v62  ;;  %v5070_v31 = vmul.f32 %v5066_v21, %v5010_v38  ;;  %vm5004_vm12 = vcmp.ge.f32.partialorder %v9189_v19, 0.0 }
 0x98d   : > { %6569 = vrcp.f32 %v5018_v8  ;;  %v5017_v57 = vadd.f32 1.0, %v5013_v27  ;;  %v5016_v49 = vmul.f32 0.3275911, %v5012_v25  ;;  %v5068_v48 = vsub.f32 0.0, %v5012_v25 }
 0x98e   : > { %v5011_v23 = vand.u32 2147483647, %v9195_v3  ;;  %v5069_v4 = vmul.f32 %v5065_v29, %v5009_v41  ;;  %v5075_v18 = vmul.f32 1.442695, %v5070_v31  ;;  %vm5003_vm15 = vcmp.ge.f32.partialorder %v9195_v3, 0.0 }
 0x98f   : > { %6571 = vrcp.f32 %v5017_v57  ;;  %v5020_v63 = vadd.f32 1.0, %v5016_v49  ;;  %v5072_v37 = vmul.f32 %v5068_v48, %v5012_v25  ;;  %v4994_v3 = vmul.f32 0.5, %v9174_v47  ;;  %v5174_v47 = vpop.f32.mrf.mxu1 }
 0x990   : > { %v5015_v5 = vmul.f32 0.3275911, %v5011_v23  ;;  %v5067_v45 = vsub.f32 0.0, %v5011_v23  ;;  %v5073_v54 = vmul.f32 1.442695, %v5069_v4 }
 0x991   : > { %6573 = vrcp.f32 %v5020_v63  ;;  %v5079_v17 = vmul.f32 1.442695, %v5072_v37 }
 0x992   : > { %v5019_v14 = vadd.f32 1.0, %v5015_v5  ;;  %v5071_v43 = vmul.f32 %v5067_v45, %v5011_v23  ;;  %v6615_v45 = vmov -1.0  }
 0x993   : > { %v5008_v37 = vsel %vm5004_vm12, 1.0, %v6615_v45  ;;  %v5005_v19 = vsel %vm5001_vm14, 1.0, %v6615_v45 }
 0x994   : > { %6575 = vrcp.f32 %v5019_v14  ;;  %v5077_v13 = vmul.f32 1.442695, %v5071_v43 }
 0x995   : > { %6577 = vpow2.f32 %v5075_v18 }
 0x996   : > { %6579 = vpow2.f32 %v5073_v54  ;;  %v5007_v54 = vsel %vm5003_vm15, 1.0, %v6615_v45 }
 0x997   : > { %6581 = vpow2.f32 %v5079_v17  ;;  %v4995_v17 = vmul.f32 0.5, %v9191_v62  ;;  %v5101_v62 = vld [vmem:[%s9455_s25] sm:$0xff] }
 0x998   : > { %6583 = vpow2.f32 %v5077_v13 }
 0x99a   : > { %v6570_v60 = vpop.eup %6569 }
 0x99b   : > { %v5030_v39 = vmul.f32 1.0614054, %v6570_v60 }
 0x99c   : > { %v6572_v26 = vpop.eup %6571 }
 0x99d   : > { %v5034_v16 = vadd.f32 -1.4531521, %v5030_v39  ;;  %v5029_v61 = vmul.f32 1.0614054, %v6572_v26 }
 0x99e   : > { %v6574_v50 = vpop.eup %6573 }
 0x99f   : > { %v5038_v36 = vmul.f32 %v6570_v60, %v5034_v16  ;;  %v5033_v32 = vadd.f32 -1.4531521, %v5029_v61  ;;  %v5032_v59 = vmul.f32 1.0614054, %v6574_v50  ;;  %v5006_v16 = vsel %vm5002_vm13, 1.0, %v6615_v45 }
 0x9a1   : > { %v5042_v6 = vadd.f32 1.4214138, %v5038_v36  ;;  %v6576_v51 = vpop.eup %6575  ;;  %v5037_v58 = vmul.f32 %v6572_v26, %v5033_v32  ;;  %v5036_v40 = vadd.f32 -1.4531521, %v5032_v59  ;;  %v4996_v36 = vmul.f32 0.5, %v9185_v7 }
 0x9a2   : > { %v5031_v15 = vmul.f32 1.0614054, %v6576_v51  ;;  %v6578_v8 = vpop.eup %6577 }
 0x9a3   : > { %v5046_v0 = vmul.f32 %v6570_v60, %v5042_v6  ;;  %v5041_v44 = vadd.f32 1.4214138, %v5037_v58  ;;  %v5040_v35 = vmul.f32 %v6574_v50, %v5036_v40  ;;  %v6580_v23 = vpop.eup %6579 }
 0x9a4   : > { %v5035_v2 = vadd.f32 -1.4531521, %v5031_v15  ;;  %v6582_v5 = vpop.eup %6581  ;;  %v6314_v15 = vpop.f32.mrf.mxu1 }
 0x9a5   : > { %v5050_v11 = vadd.f32 -0.28449672, %v5046_v0  ;;  %v5045_v1 = vmul.f32 %v6572_v26, %v5041_v44  ;;  %v5044_v56 = vadd.f32 1.4214138, %v5040_v35  ;;  %v4993_v0 = vmul.f32 0.5, %v9179_v52 }
 0x9a6   : > { %v5039_v24 = vmul.f32 %v6576_v51, %v5035_v2 }
 0x9a7   : > { %v5054_v28 = vmul.f32 %v6570_v60, %v5050_v11  ;;  %v5049_v33 = vadd.f32 -0.28449672, %v5045_v1  ;;  %v5048_v55 = vmul.f32 %v6574_v50, %v5044_v56 }
 0x9a8   : > { %v5043_v42 = vadd.f32 1.4214138, %v5039_v24 }
 0x9a9   : > { %v5058_v12 = vadd.f32 0.2548296, %v5054_v28  ;;  %v5053_v20 = vmul.f32 %v6572_v26, %v5049_v33  ;;  %v5052_v9 = vadd.f32 -0.28449672, %v5048_v55 }
 0x9aa   : > { %v5047_v46 = vmul.f32 %v6576_v51, %v5043_v42 }
 0x9ab   : > { %v5062_v38 = vmul.f32 %v6570_v60, %v5058_v12  ;;  %v5057_v10 = vadd.f32 0.2548296, %v5053_v20  ;;  %v5056_v22 = vmul.f32 %v6574_v50, %v5052_v9  ;;  %v6584_v60 = vpop.eup %6583 }
 0x9ac   : > { %v5051_v41 = vadd.f32 -0.28449672, %v5047_v46 }
 0x9ad   : > { %v5061_v27 = vmul.f32 %v6572_v26, %v5057_v10  ;;  %v5060_v25 = vadd.f32 0.2548296, %v5056_v22  ;;  %v5082_v57 = vmul.f32 %v6578_v8, %v5062_v38 }
 0x9ae   : > { %v5055_v49 = vmul.f32 %v6576_v51, %v5051_v41 }
 0x9af   : > { %v5064_v63 = vmul.f32 %v6574_v50, %v5060_v25  ;;  %v5081_v14 = vmul.f32 %v6580_v23, %v5061_v27  ;;  %v5086_v48 = vsub.f32 1.0, %v5082_v57 }
 0x9b0   : > { %v5059_v21 = vadd.f32 0.2548296, %v5055_v49 }
 0x9b1   : > { %v5084_v29 = vmul.f32 %v6582_v5, %v5064_v63  ;;  %v5085_v4 = vsub.f32 1.0, %v5081_v14  ;;  %v5090_v61 = vmul.f32 %v5086_v48, %v5006_v16 }
 0x9b2   : > { %v5063_v31 = vmul.f32 %v6576_v51, %v5059_v21 }
 0x9b3   : > { %v5088_v39 = vsub.f32 1.0, %v5084_v29  ;;  %v5089_v43 = vmul.f32 %v5085_v4, %v5005_v19  ;;  %v5094_v53 = vadd.f32 1.0, %v5090_v61 }
 0x9b4   : > { %v5083_v26 = vmul.f32 %v6584_v60, %v5063_v31 }
 0x9b5   : > { %v5092_v18 = vmul.f32 %v5088_v39, %v5008_v37  ;;  %v5093_v51 = vadd.f32 1.0, %v5089_v43  ;;  %v5098_v40 = vmul.f32 %v5094_v53, %v4994_v3 }
 0x9b6   : > { %v5087_v50 = vsub.f32 1.0, %v5083_v26 }
 0x9b7   : > { %v5096_v30 = vadd.f32 1.0, %v5092_v18  ;;  %v5097_v7 = vmul.f32 %v5093_v51, %v4993_v0 }
 0x9b8   : > { %v5091_v32 = vmul.f32 %v5087_v50, %v5007_v54 }
 0x9b9   : > { %v5100_v59 = vmul.f32 %v5096_v30, %v4996_v36 }
 0x9ba   : > { %v5095_v6 = vadd.f32 1.0, %v5091_v32 }
 0x9bb   : > { %6316 = vmatpush3.msra.mxu1 %v5100_v59 }
 0x9bc   : > { %v5099_v58 = vmul.f32 %v5095_v6, %v4995_v17  ;;  %6317 = vmatprep.subr.mxu1 %v6613_v34 }
 0x9be   : > { %6318 = vmatpush3.msra.mxu1 %v5099_v58 }
 0x9bf   : > { %6319 = vmatprep.subr.mxu1 %v6613_v34 }
 0x9c0   : > { %6320 = vmatpush3.msra.mxu1 %v5098_v40 }
 0x9c1   : > { %6321 = vmatprep.subr.mxu1 %v6613_v34 }
 0x9c2   : > { %6322 = vmatpush3.msra.mxu1 %v5097_v7 }
 0x9c3   : > { %6324 = vmatmul.mubr.msk.f32.vlgmr.msra.gmra.mxu1 %vm2018_vm10, %v5101_v62 }
 0xa83   : > { %v5247_v13 = vpop.f32.mrf.mxu1 }
 0xa84   : > { %v5248_v44 = vadd.f32 %v5247_v13, %v5174_v47 }
 0xa85   : > { %v6325_v35 = vpop.f32.mrf.mxu1 }
 0xa86   : > { %5251 = vst [vmem:[%s9456_s7] sm:$0xff] %v5248_v44 }
 0xa87 PF: > { %s9457_s3 = sld [smem:[#allocation6_spill]] }
 0xa8d   : > { %s41_s3 = sadd.s32 1, %s9457_s3  }
 0xa8e   : > { %p38_p12 = scmp.ge.s32.totalorder %s41_s3, 4  }
 0xa90   :  { %40 = sbr.rel (!%p38_p12) target bundleno = 42 (0x2a), region = 186 }

</bundles_post_ra>
